<compile_context>
chip_gen: v7x
topology: tpu7x:2x2x1
jax: 0.10.0
libtpu: 0.0.40
codegen_flags: <defaults>
</compile_context>

<pallas_src>
import jax
import jax.numpy as jnp
from jax.experimental import pallas as pl
from jax.experimental.pallas import tpu as pltpu

# ---------------- model hyper-parameters (small, synthetic) ----------------
VOCAB = 128
D_MODEL = 32
D_FF = 64
N_HEADS = 4
HEAD_DIM = D_MODEL // N_HEADS
B = 2
S_ENC = 8
S_DEC = 8
PAD_ID = 0
DEC_START_ID = 0           # T5 uses the pad token as decoder_start_token_id
IGNORE_INDEX = -100
NEG_INF = -1e9
MXU_DTYPE = jnp.bfloat16   # MXU input dtype (f32 accumulation everywhere)
BH = B * N_HEADS

assert S_ENC == S_DEC, "stacked attention-bias operand assumes equal enc/dec length"

# rows of the packed (8, D_MODEL) rms-scale operand
LN_E1, LN_E2, LN_EF, LN_D1, LN_D2, LN_D3, LN_DF = range(7)


# ---------------------------------------------------------------------------
# Fused forward kernel: encoder block + decoder block + LM head + masked CE
# ---------------------------------------------------------------------------
def _fused_forward_kernel(x_enc_ref, y_dec_ref, labels_ref, bias_ref,
                          emb_ref, ln_ref, wqkv_ref, wo_ref,
                          cq_ref, ckv_ref, co_ref, wi_ref, wf_ref,
                          loss_ref):
    f32 = jnp.float32

    def mm(a, w):
        # 2D matmul: bf16 MXU inputs, f32 accumulation (weights already bf16).
        return jnp.dot(a.astype(MXU_DTYPE), w, preferred_element_type=f32)

    def bmm(a, w):
        # batched matmul, single leading batch dim: (P,n,k) x (P,k,m) -> (P,n,m)
        return jnp.einsum('pnk,pkm->pnm', a, w, preferred_element_type=f32)

    def rms(x, row):
        # T5 LayerNorm: no mean subtraction, no bias.  f32 elementwise path.
        w = ln_ref[row:row + 1, :]                         # (1, D)
        var = jnp.mean(x * x, axis=-1, keepdims=True)
        return x * jax.lax.rsqrt(var + 1e-6) * w

    def to_heads(x2, w3, s):
        # x2: (B*s, D) f32 residual-stream activations; w3: (H, D, E) bf16.
        # -> (B*H, s, E) f32, batch index p = b*H + h  (heads on the LEADING dim,
        #    so no sub-128-lane slicing of activations is needed).
        parts = []
        for b in range(B):
            xb_b = x2[b * s:(b + 1) * s].astype(MXU_DTYPE)[None]   # (1, s, D)
            parts.extend([xb_b] * N_HEADS)
        xb = jnp.concatenate(parts, axis=0)                         # (BH, s, D)
        wb = jnp.broadcast_to(w3[None], (B,) + w3.shape).reshape(
            (BH,) + w3.shape[1:])                                   # (BH, D, E)
        return bmm(xb, wb)

    def from_heads(ctx, wo3, s_q):
        # ctx: (B*H, s_q, Hd) f32; wo3: (H, Hd, D) bf16.
        # Output projection applied per head then summed over heads -> (B*s_q, D);
        # avoids any head-merge lane concatenate.
        wb = jnp.broadcast_to(wo3[None], (B,) + wo3.shape).reshape(
            (BH,) + wo3.shape[1:])                                  # (BH, Hd, D)
        proj = bmm(ctx.astype(MXU_DTYPE), wb)                       # (BH, s_q, D)
        rows = []
        for b in range(B):
            acc = proj[b * N_HEADS]
            for h in range(1, N_HEADS):
                acc = acc + proj[b * N_HEADS + h]
            rows.append(acc)                                        # (s_q, D)
        return jnp.concatenate(rows, axis=0)                        # (B*s_q, D)

    def head_bias(idx):
        # (B, s_q, s_k) additive bias -> (B*H, s_q, s_k), shared over heads.
        b3 = bias_ref[idx]
        return jnp.broadcast_to(b3[:, None], (B, N_HEADS) + b3.shape[1:]).reshape(
            (BH,) + b3.shape[1:])

    def attention(q, k, v, bias):
        # q:(BH,s_q,Hd) k/v:(BH,s_k,Hd) bias:(BH,s_q,s_k).  T5: no 1/sqrt(d) scale.
        s = jnp.einsum('pqd,pkd->pqk', q.astype(MXU_DTYPE), k.astype(MXU_DTYPE),
                       preferred_element_type=f32)
        s = s + bias
        s = s - jnp.max(s, axis=-1, keepdims=True)
        p = jnp.exp(s)
        p = p * pl.reciprocal(jnp.sum(p, axis=-1, keepdims=True), approx=True)
        return jnp.einsum('pqk,pkd->pqd', p.astype(MXU_DTYPE), v.astype(MXU_DTYPE),
                          preferred_element_type=f32)

    # ----------------- encoder (1 pre-norm block) -----------------
    x = x_enc_ref[...]                                     # (B*S_ENC, D) f32
    xn = rms(x, LN_E1)
    qkv = to_heads(xn, wqkv_ref[0], S_ENC)                 # (BH, S_ENC, 3*Hd)
    q, k, v = (qkv[..., :HEAD_DIM], qkv[..., HEAD_DIM:2 * HEAD_DIM],
               qkv[..., 2 * HEAD_DIM:])
    x = x + from_heads(attention(q, k, v, head_bias(0)), wo_ref[0], S_ENC)

    xn = rms(x, LN_E2)
    x = x + mm(jnp.maximum(mm(xn, wi_ref[0]), 0.0), wf_ref[0])
    enc_out = rms(x, LN_EF)                                # (B*S_ENC, D)

    # ----------------- decoder (self-attn, cross-attn, ffn) -----------------
    y = y_dec_ref[...]                                     # (B*S_DEC, D)
    yn = rms(y, LN_D1)
    qkv = to_heads(yn, wqkv_ref[1], S_DEC)
    q, k, v = (qkv[..., :HEAD_DIM], qkv[..., HEAD_DIM:2 * HEAD_DIM],
               qkv[..., 2 * HEAD_DIM:])
    y = y + from_heads(attention(q, k, v, head_bias(1)), wo_ref[1], S_DEC)

    yn = rms(y, LN_D2)
    qc = to_heads(yn, cq_ref[...], S_DEC)                  # (BH, S_DEC, Hd)
    kv = to_heads(enc_out, ckv_ref[...], S_ENC)            # (BH, S_ENC, 2*Hd)
    kc, vc = kv[..., :HEAD_DIM], kv[..., HEAD_DIM:]
    y = y + from_heads(attention(qc, kc, vc, head_bias(2)), co_ref[...], S_DEC)

    yn = rms(y, LN_D3)
    y = y + mm(jnp.maximum(mm(yn, wi_ref[1]), 0.0), wf_ref[1])
    y = rms(y, LN_DF)

    # ------ tied LM head (d_model**-0.5 scale) + label-masked cross-entropy ------
    logits = jax.lax.dot_general(y.astype(MXU_DTYPE), emb_ref[...],
                                 (((1,), (1,)), ((), ())),
                                 preferred_element_type=f32) * (D_MODEL ** -0.5)
    labels = labels_ref[...]                               # (N, 1) i32, may be -100
    m = jnp.max(logits, axis=-1, keepdims=True)
    lse = jnp.log(jnp.sum(jnp.exp(logits - m), axis=-1, keepdims=True)) + m
    col = jax.lax.broadcasted_iota(jnp.int32, logits.shape, 1)
    lab_logit = jnp.sum(jnp.where(col == labels, logits, 0.0), axis=-1, keepdims=True)
    valid = labels != IGNORE_INDEX
    nll = jnp.where(valid, lse - lab_logit, 0.0)
    denom = jnp.maximum(jnp.sum(valid.astype(f32)), 1.0)   # guard all-ignored 0/0
    loss_ref[...] = jnp.broadcast_to(jnp.sum(nll) / denom, loss_ref.shape).astype(f32)


# ---------------------------------------------------------------------------
# Parameters (deterministic synthetic T5-style weights, per-head layout)
# ---------------------------------------------------------------------------
def init_params(key):
    ks = jax.random.split(key, 8)
    w = lambda k, s: jax.random.normal(k, s, jnp.float32) * 0.05
    return {
        "emb":  w(ks[0], (VOCAB, D_MODEL)),
        "ln":   jnp.ones((8, D_MODEL), jnp.float32),              # 7 rms scales + pad
        "wqkv": w(ks[1], (2, N_HEADS, D_MODEL, 3 * HEAD_DIM)),    # [enc, dec] self QKV
        "wo":   w(ks[2], (2, N_HEADS, HEAD_DIM, D_MODEL)),        # [enc, dec] self out
        "cq":   w(ks[3], (N_HEADS, D_MODEL, HEAD_DIM)),           # cross Q
        "ckv":  w(ks[4], (N_HEADS, D_MODEL, 2 * HEAD_DIM)),       # cross fused K/V
        "co":   w(ks[5], (N_HEADS, HEAD_DIM, D_MODEL)),           # cross out
        "wi":   w(ks[6], (2, D_MODEL, D_FF)),                     # [enc, dec] FFN in
        "wf":   w(ks[7], (2, D_FF, D_MODEL)),                     # [enc, dec] FFN out
    }


# ---------------------------------------------------------------------------
# Forward wrapper (equivalent of LLMBackbone.forward -> scalar loss)
# ---------------------------------------------------------------------------
def llm_backbone_forward(params, input_ids, input_masks, output_ids, output_masks):
    # --- label prep: output_ids[output_ids == pad_token_id] = -100 ---
    labels = jnp.where(output_ids == PAD_ID, IGNORE_INDEX, output_ids)

    # --- T5 shift-right to build decoder_input_ids (decoder_input_ids=None) ---
    dec_in = jnp.concatenate(
        [jnp.full((labels.shape[0], 1), DEC_START_ID, labels.dtype), labels[:, :-1]],
        axis=1)
    dec_in = jnp.where(dec_in == IGNORE_INDEX, PAD_ID, dec_in)

    im = input_masks.astype(jnp.float32)
    om = output_masks.astype(jnp.float32)

    # additive attention biases (0 = attend, -1e9 = masked), stacked into ONE operand
    enc_bias = jnp.broadcast_to((1.0 - im)[:, None, :] * NEG_INF, (B, S_ENC, S_ENC))
    causal = (jnp.arange(S_DEC)[:, None] >= jnp.arange(S_DEC)[None, :]).astype(jnp.float32)
    dec_bias = (1.0 - causal[None, :, :] * om[:, None, :]) * NEG_INF
    cross_bias = jnp.broadcast_to((1.0 - im)[:, None, :] * NEG_INF, (B, S_DEC, S_ENC))
    att_bias = jnp.stack([enc_bias, dec_bias, cross_bias], axis=0)  # (3, B, S, S)

    emb = params["emb"]
    # TODO(synk): token-embedding gather stays in XLA; T5 relative-position bias and
    # dropout of the real checkpoint are omitted in this synthetic model.
    x_enc = emb[input_ids].reshape(B * S_ENC, D_MODEL)
    y_dec = emb[dec_in].reshape(B * S_DEC, D_MODEL)
    labels2 = labels.reshape(B * S_DEC, 1).astype(jnp.int32)

    bf16 = lambda a: a.astype(MXU_DTYPE)   # pre-cast weights: halves entry DMA bytes
    operands = (
        x_enc, y_dec, labels2, att_bias,
        bf16(emb), params["ln"],
        bf16(params["wqkv"]), bf16(params["wo"]),
        bf16(params["cq"]), bf16(params["ckv"]), bf16(params["co"]),
        bf16(params["wi"]), bf16(params["wf"]),
    )

    loss = pl.pallas_call(
        _fused_forward_kernel,
        out_shape=jax.ShapeDtypeStruct((1, 128), jnp.float32),   # lane-dense VMEM writeback
        in_specs=[pl.BlockSpec(memory_space=pltpu.MemorySpace.VMEM)] * len(operands),
        out_specs=pl.BlockSpec(memory_space=pltpu.MemorySpace.VMEM),
    )(*operands)
    return loss[0, 0]


# ---------------------------------------------------------------------------
if __name__ == "__main__":
    key = jax.random.PRNGKey(0)
    k_par, k_in, k_out = jax.random.split(key, 3)

    params = init_params(k_par)

    input_ids = jax.random.randint(k_in, (B, S_ENC), 1, VOCAB, dtype=jnp.int32)
    output_ids = jax.random.randint(k_out, (B, S_DEC), 1, VOCAB, dtype=jnp.int32)

    # pad the tail of the second sequence (pad_token_id = 0), masks mark real tokens
    input_masks = jnp.ones((B, S_ENC), jnp.int32).at[1, 6:].set(0)
    input_ids = jnp.where(input_masks == 1, input_ids, PAD_ID)
    output_masks = jnp.ones((B, S_DEC), jnp.int32).at[1, 5:].set(0)
    output_ids = jnp.where(output_masks == 1, output_ids, PAD_ID)

    loss = jax.jit(llm_backbone_forward)(params, input_ids, input_masks,
                                         output_ids, output_masks)
    loss = jax.block_until_ready(loss)
    assert jnp.isfinite(loss), "loss is not finite"
    print("KERNEL_OK")
</pallas_src>

<mosaic_0001>
module attributes {stable_mosaic.version = 11 : i64} {
  func.func @_fused_forward_kernel(%arg0: memref<16x32xf32, #tpu.memory_space<vmem>>, %arg1: memref<16x32xf32, #tpu.memory_space<vmem>>, %arg2: memref<16x1xi32, #tpu.memory_space<vmem>>, %arg3: memref<3x2x8x8xf32, #tpu.memory_space<vmem>>, %arg4: memref<128x32xbf16, #tpu.memory_space<vmem>>, %arg5: memref<8x32xf32, #tpu.memory_space<vmem>>, %arg6: memref<2x4x32x24xbf16, #tpu.memory_space<vmem>>, %arg7: memref<2x4x8x32xbf16, #tpu.memory_space<vmem>>, %arg8: memref<4x32x8xbf16, #tpu.memory_space<vmem>>, %arg9: memref<4x32x16xbf16, #tpu.memory_space<vmem>>, %arg10: memref<4x8x32xbf16, #tpu.memory_space<vmem>>, %arg11: memref<2x32x64xbf16, #tpu.memory_space<vmem>>, %arg12: memref<2x64x32xbf16, #tpu.memory_space<vmem>>, %arg13: memref<1x128xf32, #tpu.memory_space<vmem>>) attributes {dimension_semantics = [], scalar_prefetch = 0 : i64, scratch_operands = 0 : i64, tpu.core_type = #tpu.core_type<tc>} {
    %c0 = arith.constant 0 : index
    %c0_0 = arith.constant 0 : index
    %0 = vector.load %arg0[%c0, %c0_0] : memref<16x32xf32, #tpu.memory_space<vmem>>, vector<16x32xf32>
    %c0_1 = arith.constant 0 : index
    %c0_2 = arith.constant 0 : index
    %1 = vector.load %arg5[%c0_1, %c0_2] : memref<8x32xf32, #tpu.memory_space<vmem>>, vector<1x32xf32>
    %2 = arith.mulf %0, %0 : vector<16x32xf32>
    %cst = arith.constant dense<0.000000e+00> : vector<16xf32>
    %3 = vector.multi_reduction <add>, %2, %cst [1] : vector<16x32xf32> to vector<16xf32>
    %4 = vector.shape_cast %3 : vector<16xf32> to vector<16x1xf32>
    %cst_3 = arith.constant 3.200000e+01 : f32
    %5 = vector.broadcast %cst_3 : f32 to vector<16x1xf32>
    %6 = arith.divf %4, %5 : vector<16x1xf32>
    %cst_4 = arith.constant 9.99999997E-7 : f32
    %7 = vector.broadcast %cst_4 : f32 to vector<16x1xf32>
    %8 = arith.addf %6, %7 : vector<16x1xf32>
    %9 = math.rsqrt %8 : vector<16x1xf32>
    %10 = vector.broadcast %9 : vector<16x1xf32> to vector<16x32xf32>
    %11 = arith.mulf %0, %10 : vector<16x32xf32>
    %12 = vector.broadcast %1 : vector<1x32xf32> to vector<16x32xf32>
    %13 = arith.mulf %11, %12 : vector<16x32xf32>
    %c0_5 = arith.constant 0 : index
    %c0_6 = arith.constant 0 : index
    %c0_7 = arith.constant 0 : index
    %c0_8 = arith.constant 0 : index
    %14 = vector.load %arg6[%c0_5, %c0_6, %c0_7, %c0_8] : memref<2x4x32x24xbf16, #tpu.memory_space<vmem>>, vector<1x4x32x24xbf16>
    %15 = vector.shape_cast %14 : vector<1x4x32x24xbf16> to vector<4x32x24xbf16>
    %16 = vector.extract_strided_slice %13 {offsets = [0, 0], sizes = [8, 32], strides = [1, 1]} : vector<16x32xf32> to vector<8x32xf32>
    %17 = arith.truncf %16 : vector<8x32xf32> to vector<8x32xbf16>
    %18 = vector.shape_cast %17 : vector<8x32xbf16> to vector<1x8x32xbf16>
    %19 = vector.extract_strided_slice %13 {offsets = [8, 0], sizes = [8, 32], strides = [1, 1]} : vector<16x32xf32> to vector<8x32xf32>
    %20 = arith.truncf %19 : vector<8x32xf32> to vector<8x32xbf16>
    %21 = vector.shape_cast %20 : vector<8x32xbf16> to vector<1x8x32xbf16>
    %22 = tpu.concatenate %18, %18, %18, %18, %21, %21, %21, %21 in 0 : vector<1x8x32xbf16>, vector<1x8x32xbf16>, vector<1x8x32xbf16>, vector<1x8x32xbf16>, vector<1x8x32xbf16>, vector<1x8x32xbf16>, vector<1x8x32xbf16>, vector<1x8x32xbf16> -> vector<8x8x32xbf16>
    %23 = vector.shape_cast %15 : vector<4x32x24xbf16> to vector<1x4x32x24xbf16>
    %24 = vector.shape_cast %23 : vector<1x4x32x24xbf16> to vector<1x4x32x24xbf16>
    %25 = vector.broadcast %24 : vector<1x4x32x24xbf16> to vector<2x4x32x24xbf16>
    %26 = vector.shape_cast %25 : vector<2x4x32x24xbf16> to vector<8x32x24xbf16>
    "tpu.trace_start"() <{level = 10 : i32, message = "pnk,pkm->pnm"}> : () -> ()
    %cst_9 = arith.constant dense<0.000000e+00> : vector<8x8x24xf32>
    %27 = tpu.matmul %22, %26, %cst_9 {dimension_numbers = #tpu.dot_dimension_numbers<[2], [1], [1], [2], [0, 0, 0, 1, 1, 2], [0], [0]>} : vector<8x8x32xbf16>, vector<8x32x24xbf16>, vector<8x8x24xf32> -> vector<8x8x24xf32>
    "tpu.trace_stop"() : () -> ()
    %28 = vector.extract_strided_slice %27 {offsets = [0, 0, 0], sizes = [8, 8, 8], strides = [1, 1, 1]} : vector<8x8x24xf32> to vector<8x8x8xf32>
    %29 = vector.extract_strided_slice %27 {offsets = [0, 0, 8], sizes = [8, 8, 8], strides = [1, 1, 1]} : vector<8x8x24xf32> to vector<8x8x8xf32>
    %30 = vector.extract_strided_slice %27 {offsets = [0, 0, 16], sizes = [8, 8, 8], strides = [1, 1, 1]} : vector<8x8x24xf32> to vector<8x8x8xf32>
    %c0_10 = arith.constant 0 : index
    %c0_11 = arith.constant 0 : index
    %c0_12 = arith.constant 0 : index
    %c0_13 = arith.constant 0 : index
    %31 = vector.load %arg3[%c0_10, %c0_11, %c0_12, %c0_13] : memref<3x2x8x8xf32, #tpu.memory_space<vmem>>, vector<1x2x8x8xf32>
    %32 = vector.shape_cast %31 : vector<1x2x8x8xf32> to vector<2x8x8xf32>
    %33 = vector.shape_cast %32 : vector<2x8x8xf32> to vector<2x1x8x8xf32>
    %34 = vector.shape_cast %33 : vector<2x1x8x8xf32> to vector<2x1x8x8xf32>
    %35 = vector.broadcast %34 : vector<2x1x8x8xf32> to vector<2x4x8x8xf32>
    %36 = vector.shape_cast %35 : vector<2x4x8x8xf32> to vector<8x8x8xf32>
    %37 = arith.truncf %28 : vector<8x8x8xf32> to vector<8x8x8xbf16>
    %38 = arith.truncf %29 : vector<8x8x8xf32> to vector<8x8x8xbf16>
    "tpu.trace_start"() <{level = 10 : i32, message = "pqd,pkd->pqk"}> : () -> ()
    %cst_14 = arith.constant dense<0.000000e+00> : vector<8x8x8xf32>
    %39 = tpu.matmul %37, %38, %cst_14 {dimension_numbers = #tpu.dot_dimension_numbers<[2], [2], [1], [1], [0, 0, 0, 1, 1, 1], [0], [0]>} : vector<8x8x8xbf16>, vector<8x8x8xbf16>, vector<8x8x8xf32> -> vector<8x8x8xf32>
    "tpu.trace_stop"() : () -> ()
    %40 = arith.addf %39, %36 : vector<8x8x8xf32>
    %cst_15 = arith.constant dense<0xFF800000> : vector<8x8xf32>
    %41 = vector.multi_reduction <maximumf>, %40, %cst_15 [2] : vector<8x8x8xf32> to vector<8x8xf32>
    %42 = vector.shape_cast %41 : vector<8x8xf32> to vector<8x8x1xf32>
    %43 = vector.broadcast %42 : vector<8x8x1xf32> to vector<8x8x8xf32>
    %44 = arith.subf %40, %43 : vector<8x8x8xf32>
    %45 = math.exp %44 : vector<8x8x8xf32>
    %cst_16 = arith.constant dense<0.000000e+00> : vector<8x8xf32>
    %46 = vector.multi_reduction <add>, %45, %cst_16 [2] : vector<8x8x8xf32> to vector<8x8xf32>
    %47 = vector.shape_cast %46 : vector<8x8xf32> to vector<8x8x1xf32>
    %48 = tpu.reciprocal %47 {approx = true} : vector<8x8x1xf32> -> vector<8x8x1xf32>
    %49 = vector.broadcast %48 : vector<8x8x1xf32> to vector<8x8x8xf32>
    %50 = arith.mulf %45, %49 : vector<8x8x8xf32>
    %51 = arith.truncf %50 : vector<8x8x8xf32> to vector<8x8x8xbf16>
    %52 = arith.truncf %30 : vector<8x8x8xf32> to vector<8x8x8xbf16>
    "tpu.trace_start"() <{level = 10 : i32, message = "pqk,pkd->pqd"}> : () -> ()
    %cst_17 = arith.constant dense<0.000000e+00> : vector<8x8x8xf32>
    %53 = tpu.matmul %51, %52, %cst_17 {dimension_numbers = #tpu.dot_dimension_numbers<[2], [1], [1], [2], [0, 0, 0, 1, 1, 2], [0], [0]>} : vector<8x8x8xbf16>, vector<8x8x8xbf16>, vector<8x8x8xf32> -> vector<8x8x8xf32>
    "tpu.trace_stop"() : () -> ()
    %c0_18 = arith.constant 0 : index
    %c0_19 = arith.constant 0 : index
    %c0_20 = arith.constant 0 : index
    %c0_21 = arith.constant 0 : index
    %54 = vector.load %arg7[%c0_18, %c0_19, %c0_20, %c0_21] : memref<2x4x8x32xbf16, #tpu.memory_space<vmem>>, vector<1x4x8x32xbf16>
    %55 = vector.shape_cast %54 : vector<1x4x8x32xbf16> to vector<4x8x32xbf16>
    %56 = vector.shape_cast %55 : vector<4x8x32xbf16> to vector<1x4x8x32xbf16>
    %57 = vector.shape_cast %56 : vector<1x4x8x32xbf16> to vector<1x4x8x32xbf16>
    %58 = vector.broadcast %57 : vector<1x4x8x32xbf16> to vector<2x4x8x32xbf16>
    %59 = vector.shape_cast %58 : vector<2x4x8x32xbf16> to vector<8x8x32xbf16>
    %60 = arith.truncf %53 : vector<8x8x8xf32> to vector<8x8x8xbf16>
    "tpu.trace_start"() <{level = 10 : i32, message = "pnk,pkm->pnm"}> : () -> ()
    %cst_22 = arith.constant dense<0.000000e+00> : vector<8x8x32xf32>
    %61 = tpu.matmul %60, %59, %cst_22 {dimension_numbers = #tpu.dot_dimension_numbers<[2], [1], [1], [2], [0, 0, 0, 1, 1, 2], [0], [0]>} : vector<8x8x8xbf16>, vector<8x8x32xbf16>, vector<8x8x32xf32> -> vector<8x8x32xf32>
    "tpu.trace_stop"() : () -> ()
    %62 = vector.extract_strided_slice %61 {offsets = [0, 0, 0], sizes = [1, 8, 32], strides = [1, 1, 1]} : vector<8x8x32xf32> to vector<1x8x32xf32>
    %63 = vector.shape_cast %62 : vector<1x8x32xf32> to vector<8x32xf32>
    %64 = vector.extract_strided_slice %61 {offsets = [1, 0, 0], sizes = [1, 8, 32], strides = [1, 1, 1]} : vector<8x8x32xf32> to vector<1x8x32xf32>
    %65 = vector.shape_cast %64 : vector<1x8x32xf32> to vector<8x32xf32>
    %66 = arith.addf %63, %65 : vector<8x32xf32>
    %67 = vector.extract_strided_slice %61 {offsets = [2, 0, 0], sizes = [1, 8, 32], strides = [1, 1, 1]} : vector<8x8x32xf32> to vector<1x8x32xf32>
    %68 = vector.shape_cast %67 : vector<1x8x32xf32> to vector<8x32xf32>
    %69 = arith.addf %66, %68 : vector<8x32xf32>
    %70 = vector.extract_strided_slice %61 {offsets = [3, 0, 0], sizes = [1, 8, 32], strides = [1, 1, 1]} : vector<8x8x32xf32> to vector<1x8x32xf32>
    %71 = vector.shape_cast %70 : vector<1x8x32xf32> to vector<8x32xf32>
    %72 = arith.addf %69, %71 : vector<8x32xf32>
    %73 = vector.extract_strided_slice %61 {offsets = [4, 0, 0], sizes = [1, 8, 32], strides = [1, 1, 1]} : vector<8x8x32xf32> to vector<1x8x32xf32>
    %74 = vector.shape_cast %73 : vector<1x8x32xf32> to vector<8x32xf32>
    %75 = vector.extract_strided_slice %61 {offsets = [5, 0, 0], sizes = [1, 8, 32], strides = [1, 1, 1]} : vector<8x8x32xf32> to vector<1x8x32xf32>
    %76 = vector.shape_cast %75 : vector<1x8x32xf32> to vector<8x32xf32>
    %77 = arith.addf %74, %76 : vector<8x32xf32>
    %78 = vector.extract_strided_slice %61 {offsets = [6, 0, 0], sizes = [1, 8, 32], strides = [1, 1, 1]} : vector<8x8x32xf32> to vector<1x8x32xf32>
    %79 = vector.shape_cast %78 : vector<1x8x32xf32> to vector<8x32xf32>
    %80 = arith.addf %77, %79 : vector<8x32xf32>
    %81 = vector.extract_strided_slice %61 {offsets = [7, 0, 0], sizes = [1, 8, 32], strides = [1, 1, 1]} : vector<8x8x32xf32> to vector<1x8x32xf32>
    %82 = vector.shape_cast %81 : vector<1x8x32xf32> to vector<8x32xf32>
    %83 = arith.addf %80, %82 : vector<8x32xf32>
    %84 = tpu.concatenate %72, %83 in 0 : vector<8x32xf32>, vector<8x32xf32> -> vector<16x32xf32>
    %85 = arith.addf %0, %84 : vector<16x32xf32>
    %c1 = arith.constant 1 : index
    %c0_23 = arith.constant 0 : index
    %86 = vector.load %arg5[%c1, %c0_23] : memref<8x32xf32, #tpu.memory_space<vmem>>, vector<1x32xf32>
    %87 = arith.mulf %85, %85 : vector<16x32xf32>
    %cst_24 = arith.constant dense<0.000000e+00> : vector<16xf32>
    %88 = vector.multi_reduction <add>, %87, %cst_24 [1] : vector<16x32xf32> to vector<16xf32>
    %89 = vector.shape_cast %88 : vector<16xf32> to vector<16x1xf32>
    %cst_25 = arith.constant 3.200000e+01 : f32
    %90 = vector.broadcast %cst_25 : f32 to vector<16x1xf32>
    %91 = arith.divf %89, %90 : vector<16x1xf32>
    %cst_26 = arith.constant 9.99999997E-7 : f32
    %92 = vector.broadcast %cst_26 : f32 to vector<16x1xf32>
    %93 = arith.addf %91, %92 : vector<16x1xf32>
    %94 = math.rsqrt %93 : vector<16x1xf32>
    %95 = vector.broadcast %94 : vector<16x1xf32> to vector<16x32xf32>
    %96 = arith.mulf %85, %95 : vector<16x32xf32>
    %97 = vector.broadcast %86 : vector<1x32xf32> to vector<16x32xf32>
    %98 = arith.mulf %96, %97 : vector<16x32xf32>
    %c0_27 = arith.constant 0 : index
    %c0_28 = arith.constant 0 : index
    %c0_29 = arith.constant 0 : index
    %99 = vector.load %arg11[%c0_27, %c0_28, %c0_29] : memref<2x32x64xbf16, #tpu.memory_space<vmem>>, vector<1x32x64xbf16>
    %100 = vector.shape_cast %99 : vector<1x32x64xbf16> to vector<32x64xbf16>
    %101 = arith.truncf %98 : vector<16x32xf32> to vector<16x32xbf16>
    %cst_30 = arith.constant dense<0.000000e+00> : vector<16x64xf32>
    %102 = tpu.matmul %101, %100, %cst_30 {dimension_numbers = #tpu.dot_dimension_numbers<[1], [0], [0], [1], [0, 0, 1, 1], [], []>} : vector<16x32xbf16>, vector<32x64xbf16>, vector<16x64xf32> -> vector<16x64xf32>
    %cst_31 = arith.constant 0.000000e+00 : f32
    %103 = vector.broadcast %cst_31 : f32 to vector<16x64xf32>
    %104 = arith.maximumf %102, %103 : vector<16x64xf32>
    %c0_32 = arith.constant 0 : index
    %c0_33 = arith.constant 0 : index
    %c0_34 = arith.constant 0 : index
    %105 = vector.load %arg12[%c0_32, %c0_33, %c0_34] : memref<2x64x32xbf16, #tpu.memory_space<vmem>>, vector<1x64x32xbf16>
    %106 = vector.shape_cast %105 : vector<1x64x32xbf16> to vector<64x32xbf16>
    %107 = arith.truncf %104 : vector<16x64xf32> to vector<16x64xbf16>
    %cst_35 = arith.constant dense<0.000000e+00> : vector<16x32xf32>
    %108 = tpu.matmul %107, %106, %cst_35 {dimension_numbers = #tpu.dot_dimension_numbers<[1], [0], [0], [1], [0, 0, 1, 1], [], []>} : vector<16x64xbf16>, vector<64x32xbf16>, vector<16x32xf32> -> vector<16x32xf32>
    %109 = arith.addf %85, %108 : vector<16x32xf32>
    %c2 = arith.constant 2 : index
    %c0_36 = arith.constant 0 : index
    %110 = vector.load %arg5[%c2, %c0_36] : memref<8x32xf32, #tpu.memory_space<vmem>>, vector<1x32xf32>
    %111 = arith.mulf %109, %109 : vector<16x32xf32>
    %cst_37 = arith.constant dense<0.000000e+00> : vector<16xf32>
    %112 = vector.multi_reduction <add>, %111, %cst_37 [1] : vector<16x32xf32> to vector<16xf32>
    %113 = vector.shape_cast %112 : vector<16xf32> to vector<16x1xf32>
    %cst_38 = arith.constant 3.200000e+01 : f32
    %114 = vector.broadcast %cst_38 : f32 to vector<16x1xf32>
    %115 = arith.divf %113, %114 : vector<16x1xf32>
    %cst_39 = arith.constant 9.99999997E-7 : f32
    %116 = vector.broadcast %cst_39 : f32 to vector<16x1xf32>
    %117 = arith.addf %115, %116 : vector<16x1xf32>
    %118 = math.rsqrt %117 : vector<16x1xf32>
    %119 = vector.broadcast %118 : vector<16x1xf32> to vector<16x32xf32>
    %120 = arith.mulf %109, %119 : vector<16x32xf32>
    %121 = vector.broadcast %110 : vector<1x32xf32> to vector<16x32xf32>
    %122 = arith.mulf %120, %121 : vector<16x32xf32>
    %c0_40 = arith.constant 0 : index
    %c0_41 = arith.constant 0 : index
    %123 = vector.load %arg1[%c0_40, %c0_41] : memref<16x32xf32, #tpu.memory_space<vmem>>, vector<16x32xf32>
    %c3 = arith.constant 3 : index
    %c0_42 = arith.constant 0 : index
    %124 = vector.load %arg5[%c3, %c0_42] : memref<8x32xf32, #tpu.memory_space<vmem>>, vector<1x32xf32>
    %125 = arith.mulf %123, %123 : vector<16x32xf32>
    %cst_43 = arith.constant dense<0.000000e+00> : vector<16xf32>
    %126 = vector.multi_reduction <add>, %125, %cst_43 [1] : vector<16x32xf32> to vector<16xf32>
    %127 = vector.shape_cast %126 : vector<16xf32> to vector<16x1xf32>
    %cst_44 = arith.constant 3.200000e+01 : f32
    %128 = vector.broadcast %cst_44 : f32 to vector<16x1xf32>
    %129 = arith.divf %127, %128 : vector<16x1xf32>
    %cst_45 = arith.constant 9.99999997E-7 : f32
    %130 = vector.broadcast %cst_45 : f32 to vector<16x1xf32>
    %131 = arith.addf %129, %130 : vector<16x1xf32>
    %132 = math.rsqrt %131 : vector<16x1xf32>
    %133 = vector.broadcast %132 : vector<16x1xf32> to vector<16x32xf32>
    %134 = arith.mulf %123, %133 : vector<16x32xf32>
    %135 = vector.broadcast %124 : vector<1x32xf32> to vector<16x32xf32>
    %136 = arith.mulf %134, %135 : vector<16x32xf32>
    %c1_46 = arith.constant 1 : index
    %c0_47 = arith.constant 0 : index
    %c0_48 = arith.constant 0 : index
    %c0_49 = arith.constant 0 : index
    %137 = vector.load %arg6[%c1_46, %c0_47, %c0_48, %c0_49] : memref<2x4x32x24xbf16, #tpu.memory_space<vmem>>, vector<1x4x32x24xbf16>
    %138 = vector.shape_cast %137 : vector<1x4x32x24xbf16> to vector<4x32x24xbf16>
    %139 = vector.extract_strided_slice %136 {offsets = [0, 0], sizes = [8, 32], strides = [1, 1]} : vector<16x32xf32> to vector<8x32xf32>
    %140 = arith.truncf %139 : vector<8x32xf32> to vector<8x32xbf16>
    %141 = vector.shape_cast %140 : vector<8x32xbf16> to vector<1x8x32xbf16>
    %142 = vector.extract_strided_slice %136 {offsets = [8, 0], sizes = [8, 32], strides = [1, 1]} : vector<16x32xf32> to vector<8x32xf32>
    %143 = arith.truncf %142 : vector<8x32xf32> to vector<8x32xbf16>
    %144 = vector.shape_cast %143 : vector<8x32xbf16> to vector<1x8x32xbf16>
    %145 = tpu.concatenate %141, %141, %141, %141, %144, %144, %144, %144 in 0 : vector<1x8x32xbf16>, vector<1x8x32xbf16>, vector<1x8x32xbf16>, vector<1x8x32xbf16>, vector<1x8x32xbf16>, vector<1x8x32xbf16>, vector<1x8x32xbf16>, vector<1x8x32xbf16> -> vector<8x8x32xbf16>
    %146 = vector.shape_cast %138 : vector<4x32x24xbf16> to vector<1x4x32x24xbf16>
    %147 = vector.shape_cast %146 : vector<1x4x32x24xbf16> to vector<1x4x32x24xbf16>
    %148 = vector.broadcast %147 : vector<1x4x32x24xbf16> to vector<2x4x32x24xbf16>
    %149 = vector.shape_cast %148 : vector<2x4x32x24xbf16> to vector<8x32x24xbf16>
    "tpu.trace_start"() <{level = 10 : i32, message = "pnk,pkm->pnm"}> : () -> ()
    %cst_50 = arith.constant dense<0.000000e+00> : vector<8x8x24xf32>
    %150 = tpu.matmul %145, %149, %cst_50 {dimension_numbers = #tpu.dot_dimension_numbers<[2], [1], [1], [2], [0, 0, 0, 1, 1, 2], [0], [0]>} : vector<8x8x32xbf16>, vector<8x32x24xbf16>, vector<8x8x24xf32> -> vector<8x8x24xf32>
    "tpu.trace_stop"() : () -> ()
    %151 = vector.extract_strided_slice %150 {offsets = [0, 0, 0], sizes = [8, 8, 8], strides = [1, 1, 1]} : vector<8x8x24xf32> to vector<8x8x8xf32>
    %152 = vector.extract_strided_slice %150 {offsets = [0, 0, 8], sizes = [8, 8, 8], strides = [1, 1, 1]} : vector<8x8x24xf32> to vector<8x8x8xf32>
    %153 = vector.extract_strided_slice %150 {offsets = [0, 0, 16], sizes = [8, 8, 8], strides = [1, 1, 1]} : vector<8x8x24xf32> to vector<8x8x8xf32>
    %c1_51 = arith.constant 1 : index
    %c0_52 = arith.constant 0 : index
    %c0_53 = arith.constant 0 : index
    %c0_54 = arith.constant 0 : index
    %154 = vector.load %arg3[%c1_51, %c0_52, %c0_53, %c0_54] : memref<3x2x8x8xf32, #tpu.memory_space<vmem>>, vector<1x2x8x8xf32>
    %155 = vector.shape_cast %154 : vector<1x2x8x8xf32> to vector<2x8x8xf32>
    %156 = vector.shape_cast %155 : vector<2x8x8xf32> to vector<2x1x8x8xf32>
    %157 = vector.shape_cast %156 : vector<2x1x8x8xf32> to vector<2x1x8x8xf32>
    %158 = vector.broadcast %157 : vector<2x1x8x8xf32> to vector<2x4x8x8xf32>
    %159 = vector.shape_cast %158 : vector<2x4x8x8xf32> to vector<8x8x8xf32>
    %160 = arith.truncf %151 : vector<8x8x8xf32> to vector<8x8x8xbf16>
    %161 = arith.truncf %152 : vector<8x8x8xf32> to vector<8x8x8xbf16>
    "tpu.trace_start"() <{level = 10 : i32, message = "pqd,pkd->pqk"}> : () -> ()
    %cst_55 = arith.constant dense<0.000000e+00> : vector<8x8x8xf32>
    %162 = tpu.matmul %160, %161, %cst_55 {dimension_numbers = #tpu.dot_dimension_numbers<[2], [2], [1], [1], [0, 0, 0, 1, 1, 1], [0], [0]>} : vector<8x8x8xbf16>, vector<8x8x8xbf16>, vector<8x8x8xf32> -> vector<8x8x8xf32>
    "tpu.trace_stop"() : () -> ()
    %163 = arith.addf %162, %159 : vector<8x8x8xf32>
    %cst_56 = arith.constant dense<0xFF800000> : vector<8x8xf32>
    %164 = vector.multi_reduction <maximumf>, %163, %cst_56 [2] : vector<8x8x8xf32> to vector<8x8xf32>
    %165 = vector.shape_cast %164 : vector<8x8xf32> to vector<8x8x1xf32>
    %166 = vector.broadcast %165 : vector<8x8x1xf32> to vector<8x8x8xf32>
    %167 = arith.subf %163, %166 : vector<8x8x8xf32>
    %168 = math.exp %167 : vector<8x8x8xf32>
    %cst_57 = arith.constant dense<0.000000e+00> : vector<8x8xf32>
    %169 = vector.multi_reduction <add>, %168, %cst_57 [2] : vector<8x8x8xf32> to vector<8x8xf32>
    %170 = vector.shape_cast %169 : vector<8x8xf32> to vector<8x8x1xf32>
    %171 = tpu.reciprocal %170 {approx = true} : vector<8x8x1xf32> -> vector<8x8x1xf32>
    %172 = vector.broadcast %171 : vector<8x8x1xf32> to vector<8x8x8xf32>
    %173 = arith.mulf %168, %172 : vector<8x8x8xf32>
    %174 = arith.truncf %173 : vector<8x8x8xf32> to vector<8x8x8xbf16>
    %175 = arith.truncf %153 : vector<8x8x8xf32> to vector<8x8x8xbf16>
    "tpu.trace_start"() <{level = 10 : i32, message = "pqk,pkd->pqd"}> : () -> ()
    %cst_58 = arith.constant dense<0.000000e+00> : vector<8x8x8xf32>
    %176 = tpu.matmul %174, %175, %cst_58 {dimension_numbers = #tpu.dot_dimension_numbers<[2], [1], [1], [2], [0, 0, 0, 1, 1, 2], [0], [0]>} : vector<8x8x8xbf16>, vector<8x8x8xbf16>, vector<8x8x8xf32> -> vector<8x8x8xf32>
    "tpu.trace_stop"() : () -> ()
    %c1_59 = arith.constant 1 : index
    %c0_60 = arith.constant 0 : index
    %c0_61 = arith.constant 0 : index
    %c0_62 = arith.constant 0 : index
    %177 = vector.load %arg7[%c1_59, %c0_60, %c0_61, %c0_62] : memref<2x4x8x32xbf16, #tpu.memory_space<vmem>>, vector<1x4x8x32xbf16>
    %178 = vector.shape_cast %177 : vector<1x4x8x32xbf16> to vector<4x8x32xbf16>
    %179 = vector.shape_cast %178 : vector<4x8x32xbf16> to vector<1x4x8x32xbf16>
    %180 = vector.shape_cast %179 : vector<1x4x8x32xbf16> to vector<1x4x8x32xbf16>
    %181 = vector.broadcast %180 : vector<1x4x8x32xbf16> to vector<2x4x8x32xbf16>
    %182 = vector.shape_cast %181 : vector<2x4x8x32xbf16> to vector<8x8x32xbf16>
    %183 = arith.truncf %176 : vector<8x8x8xf32> to vector<8x8x8xbf16>
    "tpu.trace_start"() <{level = 10 : i32, message = "pnk,pkm->pnm"}> : () -> ()
    %cst_63 = arith.constant dense<0.000000e+00> : vector<8x8x32xf32>
    %184 = tpu.matmul %183, %182, %cst_63 {dimension_numbers = #tpu.dot_dimension_numbers<[2], [1], [1], [2], [0, 0, 0, 1, 1, 2], [0], [0]>} : vector<8x8x8xbf16>, vector<8x8x32xbf16>, vector<8x8x32xf32> -> vector<8x8x32xf32>
    "tpu.trace_stop"() : () -> ()
    %185 = vector.extract_strided_slice %184 {offsets = [0, 0, 0], sizes = [1, 8, 32], strides = [1, 1, 1]} : vector<8x8x32xf32> to vector<1x8x32xf32>
    %186 = vector.shape_cast %185 : vector<1x8x32xf32> to vector<8x32xf32>
    %187 = vector.extract_strided_slice %184 {offsets = [1, 0, 0], sizes = [1, 8, 32], strides = [1, 1, 1]} : vector<8x8x32xf32> to vector<1x8x32xf32>
    %188 = vector.shape_cast %187 : vector<1x8x32xf32> to vector<8x32xf32>
    %189 = arith.addf %186, %188 : vector<8x32xf32>
    %190 = vector.extract_strided_slice %184 {offsets = [2, 0, 0], sizes = [1, 8, 32], strides = [1, 1, 1]} : vector<8x8x32xf32> to vector<1x8x32xf32>
    %191 = vector.shape_cast %190 : vector<1x8x32xf32> to vector<8x32xf32>
    %192 = arith.addf %189, %191 : vector<8x32xf32>
    %193 = vector.extract_strided_slice %184 {offsets = [3, 0, 0], sizes = [1, 8, 32], strides = [1, 1, 1]} : vector<8x8x32xf32> to vector<1x8x32xf32>
    %194 = vector.shape_cast %193 : vector<1x8x32xf32> to vector<8x32xf32>
    %195 = arith.addf %192, %194 : vector<8x32xf32>
    %196 = vector.extract_strided_slice %184 {offsets = [4, 0, 0], sizes = [1, 8, 32], strides = [1, 1, 1]} : vector<8x8x32xf32> to vector<1x8x32xf32>
    %197 = vector.shape_cast %196 : vector<1x8x32xf32> to vector<8x32xf32>
    %198 = vector.extract_strided_slice %184 {offsets = [5, 0, 0], sizes = [1, 8, 32], strides = [1, 1, 1]} : vector<8x8x32xf32> to vector<1x8x32xf32>
    %199 = vector.shape_cast %198 : vector<1x8x32xf32> to vector<8x32xf32>
    %200 = arith.addf %197, %199 : vector<8x32xf32>
    %201 = vector.extract_strided_slice %184 {offsets = [6, 0, 0], sizes = [1, 8, 32], strides = [1, 1, 1]} : vector<8x8x32xf32> to vector<1x8x32xf32>
    %202 = vector.shape_cast %201 : vector<1x8x32xf32> to vector<8x32xf32>
    %203 = arith.addf %200, %202 : vector<8x32xf32>
    %204 = vector.extract_strided_slice %184 {offsets = [7, 0, 0], sizes = [1, 8, 32], strides = [1, 1, 1]} : vector<8x8x32xf32> to vector<1x8x32xf32>
    %205 = vector.shape_cast %204 : vector<1x8x32xf32> to vector<8x32xf32>
    %206 = arith.addf %203, %205 : vector<8x32xf32>
    %207 = tpu.concatenate %195, %206 in 0 : vector<8x32xf32>, vector<8x32xf32> -> vector<16x32xf32>
    %208 = arith.addf %123, %207 : vector<16x32xf32>
    %c4 = arith.constant 4 : index
    %c0_64 = arith.constant 0 : index
    %209 = vector.load %arg5[%c4, %c0_64] : memref<8x32xf32, #tpu.memory_space<vmem>>, vector<1x32xf32>
    %210 = arith.mulf %208, %208 : vector<16x32xf32>
    %cst_65 = arith.constant dense<0.000000e+00> : vector<16xf32>
    %211 = vector.multi_reduction <add>, %210, %cst_65 [1] : vector<16x32xf32> to vector<16xf32>
    %212 = vector.shape_cast %211 : vector<16xf32> to vector<16x1xf32>
    %cst_66 = arith.constant 3.200000e+01 : f32
    %213 = vector.broadcast %cst_66 : f32 to vector<16x1xf32>
    %214 = arith.divf %212, %213 : vector<16x1xf32>
    %cst_67 = arith.constant 9.99999997E-7 : f32
    %215 = vector.broadcast %cst_67 : f32 to vector<16x1xf32>
    %216 = arith.addf %214, %215 : vector<16x1xf32>
    %217 = math.rsqrt %216 : vector<16x1xf32>
    %218 = vector.broadcast %217 : vector<16x1xf32> to vector<16x32xf32>
    %219 = arith.mulf %208, %218 : vector<16x32xf32>
    %220 = vector.broadcast %209 : vector<1x32xf32> to vector<16x32xf32>
    %221 = arith.mulf %219, %220 : vector<16x32xf32>
    %c0_68 = arith.constant 0 : index
    %c0_69 = arith.constant 0 : index
    %c0_70 = arith.constant 0 : index
    %222 = vector.load %arg8[%c0_68, %c0_69, %c0_70] : memref<4x32x8xbf16, #tpu.memory_space<vmem>>, vector<4x32x8xbf16>
    %223 = vector.extract_strided_slice %221 {offsets = [0, 0], sizes = [8, 32], strides = [1, 1]} : vector<16x32xf32> to vector<8x32xf32>
    %224 = arith.truncf %223 : vector<8x32xf32> to vector<8x32xbf16>
    %225 = vector.shape_cast %224 : vector<8x32xbf16> to vector<1x8x32xbf16>
    %226 = vector.extract_strided_slice %221 {offsets = [8, 0], sizes = [8, 32], strides = [1, 1]} : vector<16x32xf32> to vector<8x32xf32>
    %227 = arith.truncf %226 : vector<8x32xf32> to vector<8x32xbf16>
    %228 = vector.shape_cast %227 : vector<8x32xbf16> to vector<1x8x32xbf16>
    %229 = tpu.concatenate %225, %225, %225, %225, %228, %228, %228, %228 in 0 : vector<1x8x32xbf16>, vector<1x8x32xbf16>, vector<1x8x32xbf16>, vector<1x8x32xbf16>, vector<1x8x32xbf16>, vector<1x8x32xbf16>, vector<1x8x32xbf16>, vector<1x8x32xbf16> -> vector<8x8x32xbf16>
    %230 = vector.shape_cast %222 : vector<4x32x8xbf16> to vector<1x4x32x8xbf16>
    %231 = vector.shape_cast %230 : vector<1x4x32x8xbf16> to vector<1x4x32x8xbf16>
    %232 = vector.broadcast %231 : vector<1x4x32x8xbf16> to vector<2x4x32x8xbf16>
    %233 = vector.shape_cast %232 : vector<2x4x32x8xbf16> to vector<8x32x8xbf16>
    "tpu.trace_start"() <{level = 10 : i32, message = "pnk,pkm->pnm"}> : () -> ()
    %cst_71 = arith.constant dense<0.000000e+00> : vector<8x8x8xf32>
    %234 = tpu.matmul %229, %233, %cst_71 {dimension_numbers = #tpu.dot_dimension_numbers<[2], [1], [1], [2], [0, 0, 0, 1, 1, 2], [0], [0]>} : vector<8x8x32xbf16>, vector<8x32x8xbf16>, vector<8x8x8xf32> -> vector<8x8x8xf32>
    "tpu.trace_stop"() : () -> ()
    %c0_72 = arith.constant 0 : index
    %c0_73 = arith.constant 0 : index
    %c0_74 = arith.constant 0 : index
    %235 = vector.load %arg9[%c0_72, %c0_73, %c0_74] : memref<4x32x16xbf16, #tpu.memory_space<vmem>>, vector<4x32x16xbf16>
    %236 = vector.extract_strided_slice %122 {offsets = [0, 0], sizes = [8, 32], strides = [1, 1]} : vector<16x32xf32> to vector<8x32xf32>
    %237 = arith.truncf %236 : vector<8x32xf32> to vector<8x32xbf16>
    %238 = vector.shape_cast %237 : vector<8x32xbf16> to vector<1x8x32xbf16>
    %239 = vector.extract_strided_slice %122 {offsets = [8, 0], sizes = [8, 32], strides = [1, 1]} : vector<16x32xf32> to vector<8x32xf32>
    %240 = arith.truncf %239 : vector<8x32xf32> to vector<8x32xbf16>
    %241 = vector.shape_cast %240 : vector<8x32xbf16> to vector<1x8x32xbf16>
    %242 = tpu.concatenate %238, %238, %238, %238, %241, %241, %241, %241 in 0 : vector<1x8x32xbf16>, vector<1x8x32xbf16>, vector<1x8x32xbf16>, vector<1x8x32xbf16>, vector<1x8x32xbf16>, vector<1x8x32xbf16>, vector<1x8x32xbf16>, vector<1x8x32xbf16> -> vector<8x8x32xbf16>
    %243 = vector.shape_cast %235 : vector<4x32x16xbf16> to vector<1x4x32x16xbf16>
    %244 = vector.shape_cast %243 : vector<1x4x32x16xbf16> to vector<1x4x32x16xbf16>
    %245 = vector.broadcast %244 : vector<1x4x32x16xbf16> to vector<2x4x32x16xbf16>
    %246 = vector.shape_cast %245 : vector<2x4x32x16xbf16> to vector<8x32x16xbf16>
    "tpu.trace_start"() <{level = 10 : i32, message = "pnk,pkm->pnm"}> : () -> ()
    %cst_75 = arith.constant dense<0.000000e+00> : vector<8x8x16xf32>
    %247 = tpu.matmul %242, %246, %cst_75 {dimension_numbers = #tpu.dot_dimension_numbers<[2], [1], [1], [2], [0, 0, 0, 1, 1, 2], [0], [0]>} : vector<8x8x32xbf16>, vector<8x32x16xbf16>, vector<8x8x16xf32> -> vector<8x8x16xf32>
    "tpu.trace_stop"() : () -> ()
    %248 = vector.extract_strided_slice %247 {offsets = [0, 0, 0], sizes = [8, 8, 8], strides = [1, 1, 1]} : vector<8x8x16xf32> to vector<8x8x8xf32>
    %249 = vector.extract_strided_slice %247 {offsets = [0, 0, 8], sizes = [8, 8, 8], strides = [1, 1, 1]} : vector<8x8x16xf32> to vector<8x8x8xf32>
    %c2_76 = arith.constant 2 : index
    %c0_77 = arith.constant 0 : index
    %c0_78 = arith.constant 0 : index
    %c0_79 = arith.constant 0 : index
    %250 = vector.load %arg3[%c2_76, %c0_77, %c0_78, %c0_79] : memref<3x2x8x8xf32, #tpu.memory_space<vmem>>, vector<1x2x8x8xf32>
    %251 = vector.shape_cast %250 : vector<1x2x8x8xf32> to vector<2x8x8xf32>
    %252 = vector.shape_cast %251 : vector<2x8x8xf32> to vector<2x1x8x8xf32>
    %253 = vector.shape_cast %252 : vector<2x1x8x8xf32> to vector<2x1x8x8xf32>
    %254 = vector.broadcast %253 : vector<2x1x8x8xf32> to vector<2x4x8x8xf32>
    %255 = vector.shape_cast %254 : vector<2x4x8x8xf32> to vector<8x8x8xf32>
    %256 = arith.truncf %234 : vector<8x8x8xf32> to vector<8x8x8xbf16>
    %257 = arith.truncf %248 : vector<8x8x8xf32> to vector<8x8x8xbf16>
    "tpu.trace_start"() <{level = 10 : i32, message = "pqd,pkd->pqk"}> : () -> ()
    %cst_80 = arith.constant dense<0.000000e+00> : vector<8x8x8xf32>
    %258 = tpu.matmul %256, %257, %cst_80 {dimension_numbers = #tpu.dot_dimension_numbers<[2], [2], [1], [1], [0, 0, 0, 1, 1, 1], [0], [0]>} : vector<8x8x8xbf16>, vector<8x8x8xbf16>, vector<8x8x8xf32> -> vector<8x8x8xf32>
    "tpu.trace_stop"() : () -> ()
    %259 = arith.addf %258, %255 : vector<8x8x8xf32>
    %cst_81 = arith.constant dense<0xFF800000> : vector<8x8xf32>
    %260 = vector.multi_reduction <maximumf>, %259, %cst_81 [2] : vector<8x8x8xf32> to vector<8x8xf32>
    %261 = vector.shape_cast %260 : vector<8x8xf32> to vector<8x8x1xf32>
    %262 = vector.broadcast %261 : vector<8x8x1xf32> to vector<8x8x8xf32>
    %263 = arith.subf %259, %262 : vector<8x8x8xf32>
    %264 = math.exp %263 : vector<8x8x8xf32>
    %cst_82 = arith.constant dense<0.000000e+00> : vector<8x8xf32>
    %265 = vector.multi_reduction <add>, %264, %cst_82 [2] : vector<8x8x8xf32> to vector<8x8xf32>
    %266 = vector.shape_cast %265 : vector<8x8xf32> to vector<8x8x1xf32>
    %267 = tpu.reciprocal %266 {approx = true} : vector<8x8x1xf32> -> vector<8x8x1xf32>
    %268 = vector.broadcast %267 : vector<8x8x1xf32> to vector<8x8x8xf32>
    %269 = arith.mulf %264, %268 : vector<8x8x8xf32>
    %270 = arith.truncf %269 : vector<8x8x8xf32> to vector<8x8x8xbf16>
    %271 = arith.truncf %249 : vector<8x8x8xf32> to vector<8x8x8xbf16>
    "tpu.trace_start"() <{level = 10 : i32, message = "pqk,pkd->pqd"}> : () -> ()
    %cst_83 = arith.constant dense<0.000000e+00> : vector<8x8x8xf32>
    %272 = tpu.matmul %270, %271, %cst_83 {dimension_numbers = #tpu.dot_dimension_numbers<[2], [1], [1], [2], [0, 0, 0, 1, 1, 2], [0], [0]>} : vector<8x8x8xbf16>, vector<8x8x8xbf16>, vector<8x8x8xf32> -> vector<8x8x8xf32>
    "tpu.trace_stop"() : () -> ()
    %c0_84 = arith.constant 0 : index
    %c0_85 = arith.constant 0 : index
    %c0_86 = arith.constant 0 : index
    %273 = vector.load %arg10[%c0_84, %c0_85, %c0_86] : memref<4x8x32xbf16, #tpu.memory_space<vmem>>, vector<4x8x32xbf16>
    %274 = vector.shape_cast %273 : vector<4x8x32xbf16> to vector<1x4x8x32xbf16>
    %275 = vector.shape_cast %274 : vector<1x4x8x32xbf16> to vector<1x4x8x32xbf16>
    %276 = vector.broadcast %275 : vector<1x4x8x32xbf16> to vector<2x4x8x32xbf16>
    %277 = vector.shape_cast %276 : vector<2x4x8x32xbf16> to vector<8x8x32xbf16>
    %278 = arith.truncf %272 : vector<8x8x8xf32> to vector<8x8x8xbf16>
    "tpu.trace_start"() <{level = 10 : i32, message = "pnk,pkm->pnm"}> : () -> ()
    %cst_87 = arith.constant dense<0.000000e+00> : vector<8x8x32xf32>
    %279 = tpu.matmul %278, %277, %cst_87 {dimension_numbers = #tpu.dot_dimension_numbers<[2], [1], [1], [2], [0, 0, 0, 1, 1, 2], [0], [0]>} : vector<8x8x8xbf16>, vector<8x8x32xbf16>, vector<8x8x32xf32> -> vector<8x8x32xf32>
    "tpu.trace_stop"() : () -> ()
    %280 = vector.extract_strided_slice %279 {offsets = [0, 0, 0], sizes = [1, 8, 32], strides = [1, 1, 1]} : vector<8x8x32xf32> to vector<1x8x32xf32>
    %281 = vector.shape_cast %280 : vector<1x8x32xf32> to vector<8x32xf32>
    %282 = vector.extract_strided_slice %279 {offsets = [1, 0, 0], sizes = [1, 8, 32], strides = [1, 1, 1]} : vector<8x8x32xf32> to vector<1x8x32xf32>
    %283 = vector.shape_cast %282 : vector<1x8x32xf32> to vector<8x32xf32>
    %284 = arith.addf %281, %283 : vector<8x32xf32>
    %285 = vector.extract_strided_slice %279 {offsets = [2, 0, 0], sizes = [1, 8, 32], strides = [1, 1, 1]} : vector<8x8x32xf32> to vector<1x8x32xf32>
    %286 = vector.shape_cast %285 : vector<1x8x32xf32> to vector<8x32xf32>
    %287 = arith.addf %284, %286 : vector<8x32xf32>
    %288 = vector.extract_strided_slice %279 {offsets = [3, 0, 0], sizes = [1, 8, 32], strides = [1, 1, 1]} : vector<8x8x32xf32> to vector<1x8x32xf32>
    %289 = vector.shape_cast %288 : vector<1x8x32xf32> to vector<8x32xf32>
    %290 = arith.addf %287, %289 : vector<8x32xf32>
    %291 = vector.extract_strided_slice %279 {offsets = [4, 0, 0], sizes = [1, 8, 32], strides = [1, 1, 1]} : vector<8x8x32xf32> to vector<1x8x32xf32>
    %292 = vector.shape_cast %291 : vector<1x8x32xf32> to vector<8x32xf32>
    %293 = vector.extract_strided_slice %279 {offsets = [5, 0, 0], sizes = [1, 8, 32], strides = [1, 1, 1]} : vector<8x8x32xf32> to vector<1x8x32xf32>
    %294 = vector.shape_cast %293 : vector<1x8x32xf32> to vector<8x32xf32>
    %295 = arith.addf %292, %294 : vector<8x32xf32>
    %296 = vector.extract_strided_slice %279 {offsets = [6, 0, 0], sizes = [1, 8, 32], strides = [1, 1, 1]} : vector<8x8x32xf32> to vector<1x8x32xf32>
    %297 = vector.shape_cast %296 : vector<1x8x32xf32> to vector<8x32xf32>
    %298 = arith.addf %295, %297 : vector<8x32xf32>
    %299 = vector.extract_strided_slice %279 {offsets = [7, 0, 0], sizes = [1, 8, 32], strides = [1, 1, 1]} : vector<8x8x32xf32> to vector<1x8x32xf32>
    %300 = vector.shape_cast %299 : vector<1x8x32xf32> to vector<8x32xf32>
    %301 = arith.addf %298, %300 : vector<8x32xf32>
    %302 = tpu.concatenate %290, %301 in 0 : vector<8x32xf32>, vector<8x32xf32> -> vector<16x32xf32>
    %303 = arith.addf %208, %302 : vector<16x32xf32>
    %c5 = arith.constant 5 : index
    %c0_88 = arith.constant 0 : index
    %304 = vector.load %arg5[%c5, %c0_88] : memref<8x32xf32, #tpu.memory_space<vmem>>, vector<1x32xf32>
    %305 = arith.mulf %303, %303 : vector<16x32xf32>
    %cst_89 = arith.constant dense<0.000000e+00> : vector<16xf32>
    %306 = vector.multi_reduction <add>, %305, %cst_89 [1] : vector<16x32xf32> to vector<16xf32>
    %307 = vector.shape_cast %306 : vector<16xf32> to vector<16x1xf32>
    %cst_90 = arith.constant 3.200000e+01 : f32
    %308 = vector.broadcast %cst_90 : f32 to vector<16x1xf32>
    %309 = arith.divf %307, %308 : vector<16x1xf32>
    %cst_91 = arith.constant 9.99999997E-7 : f32
    %310 = vector.broadcast %cst_91 : f32 to vector<16x1xf32>
    %311 = arith.addf %309, %310 : vector<16x1xf32>
    %312 = math.rsqrt %311 : vector<16x1xf32>
    %313 = vector.broadcast %312 : vector<16x1xf32> to vector<16x32xf32>
    %314 = arith.mulf %303, %313 : vector<16x32xf32>
    %315 = vector.broadcast %304 : vector<1x32xf32> to vector<16x32xf32>
    %316 = arith.mulf %314, %315 : vector<16x32xf32>
    %c1_92 = arith.constant 1 : index
    %c0_93 = arith.constant 0 : index
    %c0_94 = arith.constant 0 : index
    %317 = vector.load %arg11[%c1_92, %c0_93, %c0_94] : memref<2x32x64xbf16, #tpu.memory_space<vmem>>, vector<1x32x64xbf16>
    %318 = vector.shape_cast %317 : vector<1x32x64xbf16> to vector<32x64xbf16>
    %319 = arith.truncf %316 : vector<16x32xf32> to vector<16x32xbf16>
    %cst_95 = arith.constant dense<0.000000e+00> : vector<16x64xf32>
    %320 = tpu.matmul %319, %318, %cst_95 {dimension_numbers = #tpu.dot_dimension_numbers<[1], [0], [0], [1], [0, 0, 1, 1], [], []>} : vector<16x32xbf16>, vector<32x64xbf16>, vector<16x64xf32> -> vector<16x64xf32>
    %cst_96 = arith.constant 0.000000e+00 : f32
    %321 = vector.broadcast %cst_96 : f32 to vector<16x64xf32>
    %322 = arith.maximumf %320, %321 : vector<16x64xf32>
    %c1_97 = arith.constant 1 : index
    %c0_98 = arith.constant 0 : index
    %c0_99 = arith.constant 0 : index
    %323 = vector.load %arg12[%c1_97, %c0_98, %c0_99] : memref<2x64x32xbf16, #tpu.memory_space<vmem>>, vector<1x64x32xbf16>
    %324 = vector.shape_cast %323 : vector<1x64x32xbf16> to vector<64x32xbf16>
    %325 = arith.truncf %322 : vector<16x64xf32> to vector<16x64xbf16>
    %cst_100 = arith.constant dense<0.000000e+00> : vector<16x32xf32>
    %326 = tpu.matmul %325, %324, %cst_100 {dimension_numbers = #tpu.dot_dimension_numbers<[1], [0], [0], [1], [0, 0, 1, 1], [], []>} : vector<16x64xbf16>, vector<64x32xbf16>, vector<16x32xf32> -> vector<16x32xf32>
    %327 = arith.addf %303, %326 : vector<16x32xf32>
    %c6 = arith.constant 6 : index
    %c0_101 = arith.constant 0 : index
    %328 = vector.load %arg5[%c6, %c0_101] : memref<8x32xf32, #tpu.memory_space<vmem>>, vector<1x32xf32>
    %329 = arith.mulf %327, %327 : vector<16x32xf32>
    %cst_102 = arith.constant dense<0.000000e+00> : vector<16xf32>
    %330 = vector.multi_reduction <add>, %329, %cst_102 [1] : vector<16x32xf32> to vector<16xf32>
    %331 = vector.shape_cast %330 : vector<16xf32> to vector<16x1xf32>
    %cst_103 = arith.constant 3.200000e+01 : f32
    %332 = vector.broadcast %cst_103 : f32 to vector<16x1xf32>
    %333 = arith.divf %331, %332 : vector<16x1xf32>
    %cst_104 = arith.constant 9.99999997E-7 : f32
    %334 = vector.broadcast %cst_104 : f32 to vector<16x1xf32>
    %335 = arith.addf %333, %334 : vector<16x1xf32>
    %336 = math.rsqrt %335 : vector<16x1xf32>
    %337 = vector.broadcast %336 : vector<16x1xf32> to vector<16x32xf32>
    %338 = arith.mulf %327, %337 : vector<16x32xf32>
    %339 = vector.broadcast %328 : vector<1x32xf32> to vector<16x32xf32>
    %340 = arith.mulf %338, %339 : vector<16x32xf32>
    %341 = arith.truncf %340 : vector<16x32xf32> to vector<16x32xbf16>
    %c0_105 = arith.constant 0 : index
    %c0_106 = arith.constant 0 : index
    %342 = vector.load %arg4[%c0_105, %c0_106] : memref<128x32xbf16, #tpu.memory_space<vmem>>, vector<128x32xbf16>
    %cst_107 = arith.constant dense<0.000000e+00> : vector<16x128xf32>
    %343 = tpu.matmul %341, %342, %cst_107 {dimension_numbers = #tpu.dot_dimension_numbers<[1], [1], [0], [0], [0, 0, 1, 0], [], []>} : vector<16x32xbf16>, vector<128x32xbf16>, vector<16x128xf32> -> vector<16x128xf32>
    %cst_108 = arith.constant 0.176776692 : f32
    %344 = vector.broadcast %cst_108 : f32 to vector<16x128xf32>
    %345 = arith.mulf %343, %344 : vector<16x128xf32>
    %c0_109 = arith.constant 0 : index
    %c0_110 = arith.constant 0 : index
    %346 = vector.load %arg2[%c0_109, %c0_110] : memref<16x1xi32, #tpu.memory_space<vmem>>, vector<16x1xi32>
    %cst_111 = arith.constant dense<0xFF800000> : vector<16xf32>
    %347 = vector.multi_reduction <maximumf>, %345, %cst_111 [1] : vector<16x128xf32> to vector<16xf32>
    %348 = vector.shape_cast %347 : vector<16xf32> to vector<16x1xf32>
    %349 = vector.broadcast %348 : vector<16x1xf32> to vector<16x128xf32>
    %350 = arith.subf %345, %349 : vector<16x128xf32>
    %351 = math.exp %350 : vector<16x128xf32>
    %cst_112 = arith.constant dense<0.000000e+00> : vector<16xf32>
    %352 = vector.multi_reduction <add>, %351, %cst_112 [1] : vector<16x128xf32> to vector<16xf32>
    %353 = vector.shape_cast %352 : vector<16xf32> to vector<16x1xf32>
    %354 = math.log %353 : vector<16x1xf32>
    %355 = arith.addf %354, %348 : vector<16x1xf32>
    %356 = tpu.iota {dimensions = array<i32: 1>} : vector<16x128xi32>
    %357 = vector.broadcast %346 : vector<16x1xi32> to vector<16x128xi32>
    %358 = arith.cmpi eq, %356, %357 : vector<16x128xi32>
    %cst_113 = arith.constant 0.000000e+00 : f32
    %359 = vector.broadcast %cst_113 : f32 to vector<16x128xf32>
    %360 = arith.select %358, %345, %359 : vector<16x128xi1>, vector<16x128xf32>
    %cst_114 = arith.constant dense<0.000000e+00> : vector<16xf32>
    %361 = vector.multi_reduction <add>, %360, %cst_114 [1] : vector<16x128xf32> to vector<16xf32>
    %362 = vector.shape_cast %361 : vector<16xf32> to vector<16x1xf32>
    %c-100_i32 = arith.constant -100 : i32
    %363 = vector.broadcast %c-100_i32 : i32 to vector<16x1xi32>
    %364 = arith.cmpi ne, %346, %363 : vector<16x1xi32>
    %365 = arith.subf %355, %362 : vector<16x1xf32>
    %cst_115 = arith.constant 0.000000e+00 : f32
    %366 = vector.broadcast %cst_115 : f32 to vector<16x1xf32>
    %367 = arith.select %364, %365, %366 : vector<16x1xi1>, vector<16x1xf32>
    %368 = arith.extui %364 : vector<16x1xi1> to vector<16x1xi32>
    %369 = arith.sitofp %368 : vector<16x1xi32> to vector<16x1xf32>
    %370 = vector.shape_cast %369 : vector<16x1xf32> to vector<1x16x1xf32>
    %cst_116 = arith.constant dense<0.000000e+00> : vector<1xf32>
    %371 = vector.multi_reduction <add>, %370, %cst_116 [1, 2] : vector<1x16x1xf32> to vector<1xf32>
    %372 = vector.shape_cast %371 : vector<1xf32> to vector<1x1x1xf32>
    %373 = vector.extract %372[0, 0, 0] : f32 from vector<1x1x1xf32>
    %cst_117 = arith.constant 1.000000e+00 : f32
    %374 = arith.maximumf %373, %cst_117 : f32
    %375 = vector.shape_cast %367 : vector<16x1xf32> to vector<1x16x1xf32>
    %cst_118 = arith.constant dense<0.000000e+00> : vector<1xf32>
    %376 = vector.multi_reduction <add>, %375, %cst_118 [1, 2] : vector<1x16x1xf32> to vector<1xf32>
    %377 = vector.shape_cast %376 : vector<1xf32> to vector<1x1x1xf32>
    %378 = vector.extract %377[0, 0, 0] : f32 from vector<1x1x1xf32>
    %379 = arith.divf %378, %374 : f32
    %380 = vector.broadcast %379 : f32 to vector<1x128xf32>
    %c0_119 = arith.constant 0 : index
    %c0_120 = arith.constant 0 : index
    %381 = vector.load %arg13[%c0_119, %c0_120] : memref<1x128xf32, #tpu.memory_space<vmem>>, vector<1x128xf32>
    tpu.vector_store %arg13[%c0_119, %c0_120], %380 {strides = array<i32>} : memref<1x128xf32, #tpu.memory_space<vmem>>, vector<1x128xf32>,
    return
  }
}

</mosaic_0001>

<bundles_post_ra>
// kernel: llm_backbone_forward.1
= control target key start
LH: loop header
LB: loop body
LE: loop exit
PB: predicated region body
PF: predicated region fallthrough
CT: control target
= control target key end

     0   :  { %vm51_vm0 = vcmask 261120   ;;  %v7509_v8 = vmov 0.0   ;;  %vm7510_vm1 = vmmov 0   ;;  %s8829_s0 = inlined_call_operand.vmem [shape: f32[16,32], index: 0, kind: input, shape index: {}]   ;;  %s8830_s1 = inlined_call_operand.vmem [shape: f32[16,32], index: 1, kind: input, shape index: {}]   ;;  %s8831_s2 = inlined_call_operand.vmem [shape: s32[16,1], index: 2, kind: input, shape index: {}]   ;;  %s8832_s3 = inlined_call_operand.vmem [shape: f32[3,2,8,8], index: 3, kind: input, shape index: {}]   ;;  %s8833_s4 = inlined_call_operand.vmem [shape: bf16[128,32], index: 4, kind: input, shape index: {}]   ;;  %s8834_s5 = inlined_call_operand.vmem [shape: f32[8,32], index: 5, kind: input, shape index: {}]   ;;  %s8835_s6 = inlined_call_operand.vmem [shape: bf16[2,4,32,24], index: 6, kind: input, shape index: {}]   ;;  %s8836_s7 = inlined_call_operand.vmem [shape: bf16[2,4,8,32], index: 7, kind: input, shape index: {}]   ;;  %s8837_s8 = inlined_call_operand.vmem [shape: bf16[4,32,8], index: 8, kind: input, shape index: {}]   ;;  %s8838_s9 = inlined_call_operand.vmem [shape: bf16[4,32,16], index: 9, kind: input, shape index: {}]   ;;  %s8839_s10 = inlined_call_operand.vmem [shape: bf16[4,8,32], index: 10, kind: input, shape index: {}]   ;;  %s8840_s11 = inlined_call_operand.vmem [shape: bf16[2,32,64], index: 11, kind: input, shape index: {}]   ;;  %s8841_s12 = inlined_call_operand.vmem [shape: bf16[2,64,32], index: 12, kind: input, shape index: {}]   ;;  %s8842_s13 = inlined_call_operand.hbm [shape: f32[1,128], index: 13, kind: output, shape index: {}]  }
   0x1   :  { %v46_v0 = vld [vmem:[%s8829_s0] sm:$0xff]  ;;  %v47_v1 = vld [vmem:[%s8829_s0 + $0x8] sm:$0xff]  ;;  %v7296_v7 = vld [vmem:[%s8835_s6 + $0x30] sm:$0xff]   ;;  %6532 = vmatprep.subr.bf16.mxu0 %v7509_v8  ;;  %6556 = vmatprep.subr.bf16.mxu1 %v7509_v8 }
   0x2   :  { %v49_v2 = vmul.f32 %v46_v0, %v46_v0  ;;  %v50_v3 = vmul.f32 %v47_v1, %v47_v1  ;;  %v7597_v6 = vld [vmem:[%s8835_s6] sm:$0xff]   ;;  %v7607_v9 = vld [vmem:[%s8835_s6 + $0x8] sm:$0xff]   ;;  %v7298_v10 = vld [vmem:[%s8835_s6 + $0x38] sm:$0xff]   ;;  %6557 = vmatpush3.bf16.msra.mxu1 %v7296_v7  ;;  %6536 = vmatprep.mubr.msk.bf16.mxu0 %vm7510_vm1, %v7509_v8 }
   0x3   :  { %6533 = vmatpush3.bf16.msra.mxu0 %v7597_v6  ;;  %6558 = vmatprep.subr.bf16.mxu1 %v7509_v8 }
   0x4   :  { %v52_v4 = vsel %vm51_vm0, %v49_v2, 0.0  ;;  %v55_v5 = vsel %vm51_vm0, %v50_v3, 0.0  ;;  %6534 = vmatprep.subr.bf16.mxu0 %v7509_v8  ;;  %6560 = vmatprep.mubr.msk.bf16.mxu1 %vm7510_vm1, %v7509_v8 }
   0x5   :  { %53 = vadd.xlane.f32.xlu0 %v52_v4 }
   0x6   :  { %6559 = vmatpush3.bf16.msra.mxu1 %v7298_v10 }
   0x7   :  { %6535 = vmatpush3.bf16.msra.mxu0 %v7607_v9  ;;  %6572 = vmatprep.subr.bf16.mxu1 %v7509_v8 }
   0x8   :  { %6540 = vmatprep.subr.bf16.mxu0 %v7509_v8 }
   0x9   :  { %56 = vadd.xlane.f32.xlu0 %v55_v5 }
   0xa   :  { %18 = vsyncpa [#allocation3], 0  ;;  %v6061_v18 = vld [vmem:[%s8834_s5] ss:$0 sm:$0xff]  ;;  %v7299_v22 = vld [vmem:[%s8835_s6 + $0x10] sm:$0xff]   ;;  %s7511_s30 = smov 120  }
   0xb   :  { %v7300_v26 = vld [vmem:[%s8835_s6 + $0x18] sm:$0xff]   ;;  %v7301_v28 = vld [vmem:[%s8835_s6 + $0x20] sm:$0xff]   ;;  %v7302_v29 = vld [vmem:[%s8835_s6 + $0x28] sm:$0xff]   ;;  %s7512_s14 = smov 112   ;;  %vm478_vm2 = vcmask 64512   ;;  %vm969_vm3 = vcmask 1043456  }
   0xc   :  { %vm1844_vm4 = vcmask 523264   ;;  %vm6015_vm8 = vcmask 7168   ;;  %s7514_s22 = smov 1.0   ;;  %s7515_s24 = smov [#allocation2]  }
   0xd   :  { %s6053_s25 = sshll.u32 %s7515_s24, 4  ;;  %s6054_s25 = int_to_ptr.vmem [resolvable:$true] %s6053_s25 }
   0xe   :  { %s7489_s28 = scalar_lea.vmem %s6054_s25, 32  ;;  %p7490_p1 = scmp.lt.s32.totalorder %s6054_s25, %s6054_s25 }
  0x92   :  { %v54_v11 = vpop.xlane.xlu0 %53 }
  0x93   :  { %v59_v12 = vmul.f32 0.03125, %v54_v11 }
  0x95   :  { %v61_v13 = vadd.f32 1e-06, %v59_v12 }
  0x96   :  { %v57_v14 = vpop.xlane.xlu0 %56 }
  0x97   :  { %7347 = vrsqrt.f32 %v61_v13  ;;  %v60_v15 = vmul.f32 0.03125, %v57_v14 }
  0x99   :  { %v62_v16 = vadd.f32 1e-06, %v60_v15 }
  0x9b   :  { %7349 = vrsqrt.f32 %v62_v16 }
  0xa1   :  { %v7348_v17 = vpop.eup %7347 }
  0xa2   :  { %v65_v19 = vmul.f32 %v7348_v17, %v46_v0 }
  0xa4   :  { %v71_v20 = vmul.f32 %v6061_v18, %v65_v19 }
  0xa5   :  { %v7350_v21 = vpop.eup %7349 }
  0xa6   :  { %v66_v23 = vmul.f32 %v7350_v21, %v47_v1  ;;  %v89_v24 = vpack.c.bf16 %v71_v20, %v71_v20 }
  0xa8   :  { %v72_v25 = vmul.f32 %v6061_v18, %v66_v23  ;;  %6537 = vmatmul.mubr.msk.bf16.vlgmr.msra.gmra.mrb[0].mxu0 %vm51_vm0, %v89_v24  ;;  %6561 = vmatmul.mubr.msk.bf16.vlgmr.msra.gmra.mrb[0].mxu1 %vm51_vm0, %v89_v24 }
  0xa9   :  { %6541 = vmatpush3.bf16.msra.mxu0 %v7299_v22  ;;  %6573 = vmatpush3.bf16.msra.mxu1 %v7299_v22 }
  0xaa   :  { %6542 = vmatprep.subr.bf16.mxu0 %v7509_v8  ;;  %6544 = vmatprep.mubr.msk.bf16.mxu0 %vm7510_vm1, %v7509_v8  ;;  %v90_v27 = vpack.c.bf16 %v72_v25, %v72_v25  ;;  %v465_v25 = vld [vmem:[%s8832_s3] sm:$0xff] }
  0xab   :  { %6574 = vmatprep.subr.bf16.mxu1 %v7509_v8  ;;  %6576 = vmatprep.mubr.msk.bf16.mxu1 %vm7510_vm1, %v7509_v8 }
  0xad   :  { %6543 = vmatpush3.bf16.msra.mxu0 %v7300_v26  ;;  %6575 = vmatpush3.bf16.msra.mxu1 %v7300_v26 }
  0xae   :  { %6548 = vmatprep.subr.bf16.mxu0 %v7509_v8  ;;  %6588 = vmatprep.subr.bf16.mxu1 %v7509_v8 }
  0xb0   :  { %6545 = vmatmul.mubr.msk.bf16.vlgmr.msra.gmra.mrb[4].mxu0 %vm51_vm0, %v89_v24  ;;  %6577 = vmatmul.mubr.msk.bf16.vlgmr.msra.gmra.mrb[4].mxu1 %vm51_vm0, %v90_v27 }
  0xb1   :  { %6549 = vmatpush3.bf16.msra.mxu0 %v7301_v28  ;;  %6589 = vmatpush3.bf16.msra.mxu1 %v7296_v7 }
  0xb2   :  { %6550 = vmatprep.subr.bf16.mxu0 %v7509_v8  ;;  %6552 = vmatprep.mubr.msk.bf16.mxu0 %vm7510_vm1, %v7509_v8 }
  0xb3   :  { %6590 = vmatprep.subr.bf16.mxu1 %v7509_v8  ;;  %6592 = vmatprep.mubr.msk.bf16.mxu1 %vm7510_vm1, %v7509_v8 }
  0xb5   :  { %6551 = vmatpush3.bf16.msra.mxu0 %v7302_v29  ;;  %6591 = vmatpush3.bf16.msra.mxu1 %v7298_v10 }
  0xb6   :  { %6564 = vmatprep.subr.bf16.mxu0 %v7509_v8  ;;  %6602 = vmatprep.subr.bf16.mxu1 %v7509_v8 }
  0xb8   :  { %6553 = vmatmul.mubr.msk.bf16.vlgmr.msra.gmra.mrb[8].mxu0 %vm51_vm0, %v89_v24  ;;  %6593 = vmatmul.mubr.msk.bf16.vlgmr.msra.gmra.mrb[8].mxu1 %vm51_vm0, %v90_v27 }
  0xb9   :  { %6565 = vmatpush3.bf16.msra.mxu0 %v7597_v6  ;;  %6568 = vmatprep.mubr.msk.bf16.mxu0 %vm7510_vm1, %v7509_v8 }
  0xba   :  { %6566 = vmatprep.subr.bf16.mxu0 %v7509_v8  ;;  %6604 = vmatprep.mubr.msk.bf16.mxu1 %vm7510_vm1, %v7509_v8 }
  0xbd   :  { %6567 = vmatpush3.bf16.msra.mxu0 %v7607_v9 }
  0xbe   :  { %6580 = vmatprep.subr.bf16.mxu0 %v7509_v8 }
  0xc0   :  { %6569 = vmatmul.mubr.msk.bf16.vlgmr.msra.gmra.mrb[12].mxu0 %vm51_vm0, %v90_v27 }
  0xc1   :  { %6581 = vmatpush3.bf16.msra.mxu0 %v7301_v28  ;;  %6584 = vmatprep.mubr.msk.bf16.mxu0 %vm7510_vm1, %v7509_v8 }
  0xc2   :  { %6582 = vmatprep.subr.bf16.mxu0 %v7509_v8 }
  0xc5   :  { %6583 = vmatpush3.bf16.msra.mxu0 %v7302_v29 }
  0xc6   :  { %6596 = vmatprep.subr.bf16.mxu0 %v7509_v8 }
  0xc8   :  { %6585 = vmatmul.mubr.msk.bf16.vlgmr.msra.gmra.mrb[16].mxu0 %vm51_vm0, %v90_v27 }
  0xc9   :  { %6598 = vmatprep.mubr.msk.bf16.mxu0 %vm7510_vm1, %v7509_v8 }
 0x17b   :  { %v140_v30 = vpop.f32.mrb[0].mxu0  ;;  %v296_v31 = vpop.f32.mrb[0].mxu1 }
 0x17c   :  { %v467_v32 = vpack.c.bf16 %v140_v30, %v140_v30  ;;  %v6538_v33 = vpop.f32.mrb[1].mxu0  ;;  %v6562_v34 = vpop.f32.mrb[1].mxu1  ;;  %v7680_v48 = vpack.c.bf16 %v296_v31, %v296_v31 }
 0x17d   :  { %v143_v35 = vpop.f32.mrb[2].mxu0  ;;  %v299_v36 = vpop.f32.mrb[2].mxu1 }
 0x17e   :  { %v6563_v37 = vpop.f32.mrb[3].mxu1  ;;  %476 = vrot.lane.b32.xlu1 %v467_v32, %s7511_s30  ;;  %v6539_v38 = vpop.f32.mrb[3].mxu0 }
 0x183   :  { %v192_v39 = vpop.f32.mrb[4].mxu0  ;;  %v379_v40 = vpop.f32.mrb[4].mxu1 }
 0x184   :  { %v7676_v41 = vpack.c.bf16 %v192_v39, %v192_v39  ;;  %v6546_v42 = vpop.f32.mrb[5].mxu0  ;;  %v6578_v43 = vpop.f32.mrb[5].mxu1  ;;  %v7692_v63 = vpack.c.bf16 %v379_v40, %v379_v40 }
 0x185   :  { %v195_v44 = vpop.f32.mrb[6].mxu0  ;;  %v382_v45 = vpop.f32.mrb[6].mxu1 }
 0x186   :  { %526 = vrot.lane.b32.xlu1 %v7676_v41, %s7511_s30  ;;  %v6547_v46 = vpop.f32.mrb[7].mxu0  ;;  %v6579_v47 = vpop.f32.mrb[7].mxu1 }
 0x18a   :  { %624 = vrot.lane.b32.xlu1 %v7680_v48, %s7511_s30 }
 0x18b   :  { %v244_v49 = vpop.f32.mrb[8].mxu0  ;;  %v459_v50 = vpop.f32.mrb[8].mxu1 }
 0x18c   :  { %v7684_v51 = vpack.c.bf16 %v244_v49, %v244_v49  ;;  %v6554_v52 = vpop.f32.mrb[9].mxu0  ;;  %v6594_v53 = vpop.f32.mrb[9].mxu1  ;;  %v7700_v5 = vpack.c.bf16 %v459_v50, %v459_v50 }
 0x18d   :  { %v247_v54 = vpop.f32.mrb[10].mxu0  ;;  %v462_v55 = vpop.f32.mrb[10].mxu1  ;;  %v466_v53 = vld [vmem:[%s8832_s3 + $0x8] sm:$0xff] }
 0x18e   :  { %575 = vrot.lane.b32.xlu0 %v7684_v51, %s7511_s30  ;;  %v6555_v56 = vpop.f32.mrb[11].mxu0  ;;  %v6595_v57 = vpop.f32.mrb[11].mxu1 }
 0x193   :  { %v339_v58 = vpop.f32.mrb[12].mxu0 }
 0x194   :  { %v7688_v59 = vpack.c.bf16 %v339_v58, %v339_v58  ;;  %v6570_v60 = vpop.f32.mrb[13].mxu0 }
 0x195   :  { %v342_v61 = vpop.f32.mrb[14].mxu0 }
 0x196   :  { %673 = vrot.lane.b32.xlu1 %v7688_v59, %s7511_s30  ;;  %v6571_v62 = vpop.f32.mrb[15].mxu0 }
 0x19a   :  { %722 = vrot.lane.b32.xlu1 %v7692_v63, %s7511_s30 }
 0x19b   :  { %v419_v0 = vpop.f32.mrb[16].mxu0 }
 0x19c   :  { %v7696_v1 = vpack.c.bf16 %v419_v0, %v419_v0  ;;  %v6586_v2 = vpop.f32.mrb[17].mxu0 }
 0x19d   :  { %v422_v3 = vpop.f32.mrb[18].mxu0 }
 0x19e   :  { %771 = vrot.lane.b32.xlu1 %v7696_v1, %s7511_s30  ;;  %v6587_v4 = vpop.f32.mrb[19].mxu0 }
 0x1a2   :  { %820 = vrot.lane.b32.xlu1 %v7700_v5, %s7511_s30 }
 0x1a6   :  { %964 = vrot.lane.b32.xlu1 %v467_v32, %s7512_s14 }
 0x1f0   :  { %v477_v6 = vpop.permute.xlu1 %476 }
 0x1f1   :  { %v483_v7 = vsel %vm478_vm2, %v477_v6, 0 }
 0x1f2   :  { %6597 = vmatpush3.bf16.xpose.msra.mxu0 %v483_v7 }
 0x1f3   :  { %6608 = vmatprep.subr.bf16.mxu0 %v7509_v8 }
 0x1f8   :  { %v527_v9 = vpop.permute.xlu1 %526 }
 0x1f9   :  { %v532_v10 = vsel %vm478_vm2, %v527_v9, 0  ;;  %6599 = vmatmul.mubr.msk.bf16.vlgmr.msra.gmra.mrb[20].mxu0 %vm478_vm2, %v467_v32 }
 0x1fa   :  { %6603 = vmatpush3.bf16.xpose.msra.mxu1 %v532_v10  ;;  %6610 = vmatprep.mubr.msk.bf16.mxu0 %vm7510_vm1, %v7509_v8 }
 0x1fb   :  { %6614 = vmatprep.subr.bf16.mxu1 %v7509_v8 }
 0x1fc   :  { %v625_v11 = vpop.permute.xlu1 %624 }
 0x1fd   :  { %v630_v13 = vsel %vm478_vm2, %v625_v11, 0 }
 0x200   :  { %v576_v12 = vpop.permute.xlu0 %575 }
 0x201   :  { %v581_v14 = vsel %vm478_vm2, %v576_v12, 0  ;;  %6605 = vmatmul.mubr.msk.bf16.vlgmr.msra.gmra.mrb[12].mxu1 %vm478_vm2, %v7676_v41 }
 0x202   :  { %6609 = vmatpush3.bf16.xpose.msra.mxu0 %v581_v14  ;;  %6615 = vmatpush3.bf16.xpose.msra.mxu1 %v630_v13 }
 0x203   :  { %6616 = vmatprep.mubr.msk.bf16.mxu1 %vm7510_vm1, %v7509_v8  ;;  %6620 = vmatprep.subr.bf16.mxu0 %v7509_v8 }
 0x204   :  { %6626 = vmatprep.subr.bf16.mxu1 %v7509_v8 }
 0x208   :  { %v674_v15 = vpop.permute.xlu1 %673 }
 0x209   :  { %v679_v16 = vsel %vm478_vm2, %v674_v15, 0  ;;  %6611 = vmatmul.mubr.msk.bf16.vlgmr.msra.gmra.mrb[24].mxu0 %vm478_vm2, %v7684_v51  ;;  %6617 = vmatmul.mubr.msk.bf16.vlgmr.msra.gmra.mrb[16].mxu1 %vm478_vm2, %v7680_v48 }
 0x20a   :  { %6621 = vmatpush3.bf16.xpose.msra.mxu0 %v679_v16  ;;  %6622 = vmatprep.mubr.msk.bf16.mxu0 %vm7510_vm1, %v7509_v8 }
 0x20b   :  { %6632 = vmatprep.subr.bf16.mxu0 %v7509_v8  ;;  %6628 = vmatprep.mubr.msk.bf16.mxu1 %vm7510_vm1, %v7509_v8 }
 0x20c   :  { %v723_v17 = vpop.permute.xlu1 %722 }
 0x20d   :  { %v728_v18 = vsel %vm478_vm2, %v723_v17, 0 }
 0x20e   :  { %6627 = vmatpush3.bf16.xpose.msra.mxu1 %v728_v18 }
 0x20f   :  { %6638 = vmatprep.subr.bf16.mxu1 %v7509_v8 }
 0x210   :  { %v772_v19 = vpop.permute.xlu1 %771 }
 0x211   :  { %v777_v20 = vsel %vm478_vm2, %v772_v19, 0  ;;  %6623 = vmatmul.mubr.msk.bf16.vlgmr.msra.gmra.mrb[28].mxu0 %vm478_vm2, %v7688_v59 }
 0x212   :  { %6633 = vmatpush3.bf16.xpose.msra.mxu0 %v777_v20  ;;  %6634 = vmatprep.mubr.msk.bf16.mxu0 %vm7510_vm1, %v7509_v8 }
 0x213   :  { %6644 = vmatprep.subr.bf16.mxu0 %v7509_v8 }
 0x214   :  { %v821_v21 = vpop.permute.xlu1 %820 }
 0x215   :  { %v826_v22 = vsel %vm478_vm2, %v821_v21, 0  ;;  %6629 = vmatmul.mubr.msk.bf16.vlgmr.msra.gmra.mrb[20].mxu1 %vm478_vm2, %v7692_v63 }
 0x216   :  { %6639 = vmatpush3.bf16.xpose.msra.mxu1 %v826_v22  ;;  %6640 = vmatprep.mubr.msk.bf16.mxu1 %vm7510_vm1, %v7509_v8 }
 0x217   :  { %6650 = vmatprep.subr.bf16.mxu1 %v7509_v8 }
 0x218   :  { %v965_v23 = vpop.permute.xlu1 %964 }
 0x219   :  { %v971_v24 = vsel %vm969_vm3, %v965_v23, 0  ;;  %6635 = vmatmul.mubr.msk.bf16.vlgmr.msra.gmra.mrb[32].mxu0 %vm478_vm2, %v7696_v1 }
 0x21a   :  { %6645 = vmatpush3.bf16.msra.mxu0 %v971_v24  ;;  %6646 = vmatprep.mubr.msk.bf16.mxu0 %vm7510_vm1, %v7509_v8 }
 0x21b   :  { %6656 = vmatprep.subr.bf16.mxu0 %v7509_v8 }
 0x21d   :  { %6641 = vmatmul.mubr.msk.bf16.vlgmr.msra.gmra.mrb[24].mxu1 %vm478_vm2, %v7700_v5 }
 0x21e   :  { %6652 = vmatprep.mubr.msk.bf16.mxu1 %vm7510_vm1, %v7509_v8 }
 0x2cc   :  { %v519_v26 = vpop.f32.mrb[20].mxu0 }
 0x2cd   :  { %v520_v27 = vadd.f32 %v519_v26, %v465_v25  ;;  %v6600_v28 = vpop.f32.mrb[21].mxu0 }
 0x2ce   :  { %v522_v29 = vpop.f32.mrb[22].mxu0 }
 0x2cf   :  { %v6601_v30 = vpop.f32.mrb[23].mxu0  ;;  %v868_v31 = vsel %vm478_vm2, %v520_v27, -inf }
 0x2d0   :  { %869 = vmax.xlane.f32.xlu1 %v868_v31 }
 0x2d4   :  { %v568_v32 = vpop.f32.mrb[12].mxu1 }
 0x2d5   :  { %v569_v33 = vadd.f32 %v568_v32, %v465_v25  ;;  %v6606_v34 = vpop.f32.mrb[13].mxu1 }
 0x2d6   :  { %v571_v35 = vpop.f32.mrb[14].mxu1 }
 0x2d7   :  { %v6607_v36 = vpop.f32.mrb[15].mxu1  ;;  %v871_v37 = vsel %vm478_vm2, %v569_v33, -inf }
 0x2d8   :  { %872 = vmax.xlane.f32.xlu0 %v871_v37 }
 0x2dc   :  { %v617_v38 = vpop.f32.mrb[24].mxu0  ;;  %v666_v39 = vpop.f32.mrb[16].mxu1 }
 0x2dd   :  { %v7759_v40 = vadd.f32 %v617_v38, %v465_v25  ;;  %v7761_v42 = vadd.f32 %v666_v39, %v465_v25  ;;  %v6612_v43 = vpop.f32.mrb[25].mxu0  ;;  %v6618_v44 = vpop.f32.mrb[17].mxu1 }
 0x2de   :  { %v620_v45 = vpop.f32.mrb[26].mxu0  ;;  %v669_v46 = vpop.f32.mrb[18].mxu1 }
 0x2df   :  { %v6613_v47 = vpop.f32.mrb[27].mxu0  ;;  %v6619_v49 = vpop.f32.mrb[19].mxu1  ;;  %v877_v50 = vsel %vm478_vm2, %v7761_v42, -inf  ;;  %v874_v52 = vsel %vm478_vm2, %v7759_v40, -inf }
 0x2e0   :  { %878 = vmax.xlane.f32.xlu1 %v877_v50  ;;  %875 = vmax.xlane.f32.xlu0 %v874_v52 }
 0x2e4   :  { %v715_v54 = vpop.f32.mrb[28].mxu0 }
 0x2e5   :  { %v716_v55 = vadd.f32 %v715_v54, %v466_v53  ;;  %v6624_v56 = vpop.f32.mrb[29].mxu0 }
 0x2e6   :  { %v718_v57 = vpop.f32.mrb[30].mxu0 }
 0x2e7   :  { %v6625_v58 = vpop.f32.mrb[31].mxu0  ;;  %v880_v60 = vsel %vm478_vm2, %v716_v55, -inf }
 0x2e8   :  { %v764_v61 = vpop.f32.mrb[20].mxu1  ;;  %881 = vmax.xlane.f32.xlu0 %v880_v60 }
 0x2e9   :  { %v765_v62 = vadd.f32 %v764_v61, %v466_v53  ;;  %v6630_v0 = vpop.f32.mrb[21].mxu1 }
 0x2ea   :  { %v767_v2 = vpop.f32.mrb[22].mxu1 }
 0x2eb   :  { %v6631_v3 = vpop.f32.mrb[23].mxu1  ;;  %v883_v4 = vsel %vm478_vm2, %v765_v62, -inf }
 0x2ec   :  { %884 = vmax.xlane.f32.xlu1 %v883_v4  ;;  %v813_v6 = vpop.f32.mrb[32].mxu0 }
 0x2ed   :  { %v814_v7 = vadd.f32 %v813_v6, %v466_v53  ;;  %v6636_v9 = vpop.f32.mrb[33].mxu0 }
 0x2ee   :  { %v816_v10 = vpop.f32.mrb[34].mxu0 }
 0x2ef   :  { %v6637_v11 = vpop.f32.mrb[35].mxu0  ;;  %v886_v12 = vsel %vm478_vm2, %v814_v7, -inf }
 0x2f0   :  { %v862_v13 = vpop.f32.mrb[24].mxu1  ;;  %887 = vmax.xlane.f32.xlu0 %v886_v12 }
 0x2f1   :  { %v6642_v14 = vpop.f32.mrb[25].mxu1  ;;  %v863_v17 = vadd.f32 %v862_v13, %v466_v53 }
 0x2f2   :  { %v865_v15 = vpop.f32.mrb[26].mxu1 }
 0x2f3   :  { %v6643_v16 = vpop.f32.mrb[27].mxu1  ;;  %v889_v18 = vsel %vm478_vm2, %v863_v17, -inf }
 0x2fd   :  { %1061 = vrot.lane.b32.xlu1 %v7684_v51, %s7512_s14 }
 0x306   :  { %1013 = vrot.lane.b32.xlu0 %v7676_v41, %s7512_s14 }
 0x321   :  { %890 = vmax.xlane.f32.xlu1 %v889_v18 }
 0x332   :  { %1109 = vrot.lane.b32.xlu1 %v7680_v48, %s7512_s14 }
 0x35d   :  { %v870_v19 = vpop.xlane.xlu1 %869 }
 0x35e   :  { %v892_v20 = vsub.f32 %v520_v27, %v870_v19 }
 0x360   :  { %v900_v21 = vmul.f32 1.442695, %v892_v20 }
 0x362   :  { %7351 = vpow2.f32 %v900_v21 }
 0x365   :  { %v873_v22 = vpop.xlane.xlu0 %872 }
 0x366   :  { %v893_v23 = vsub.f32 %v569_v33, %v873_v22 }
 0x368   :  { %v902_v24 = vmul.f32 1.442695, %v893_v23 }
 0x36a   :  { %7353 = vpow2.f32 %v902_v24 }
 0x36c   :  { %v7780_v25 = vpop.eup %7351 }
 0x36d   :  { %v916_v41 = vsel %vm478_vm2, %v7780_v25, 0.0  ;;  %v876_v26 = vpop.xlane.xlu0 %875  ;;  %v879_v32 = vpop.xlane.xlu1 %878 }
 0x36e   :  { %917 = vadd.xlane.f32.xlu0 %v916_v41  ;;  %v894_v31 = vsub.f32 %v7759_v40, %v876_v26  ;;  %v895_v35 = vsub.f32 %v7761_v42, %v879_v32 }
 0x370   :  { %v904_v33 = vmul.f32 1.442695, %v894_v31  ;;  %v906_v39 = vmul.f32 1.442695, %v895_v35 }
 0x372   :  { %7355 = vpow2.f32 %v904_v33 }
 0x374   :  { %v7784_v51 = vpop.eup %7353 }
 0x375   :  { %v919_v48 = vsel %vm478_vm2, %v7784_v51, 0.0  ;;  %v882_v27 = vpop.xlane.xlu0 %881 }
 0x376   :  { %920 = vadd.xlane.f32.xlu1 %v919_v48  ;;  %v896_v34 = vsub.f32 %v716_v55, %v882_v27 }
 0x378   :  { %v908_v36 = vmul.f32 1.442695, %v896_v34 }
 0x379   :  { %v885_v38 = vpop.xlane.xlu1 %884 }
 0x37a   :  { %7357 = vpow2.f32 %v908_v36  ;;  %v897_v43 = vsub.f32 %v765_v62, %v885_v38 }
 0x37b   :  { %7359 = vpow2.f32 %v906_v39  ;;  %v1349_v39 = vld [vmem:[%s8836_s7] sm:$0xf] }
 0x37c   :  { %v910_v44 = vmul.f32 1.442695, %v897_v43  ;;  %v7356_v45 = vpop.eup %7355  ;;  %v1365_v43 = vsel %vm969_vm3, %v1349_v39, 0 }
 0x37d   :  { %v888_v28 = vpop.xlane.xlu0 %887  ;;  %v1062_v49 = vpop.permute.xlu1 %1061 }
 0x37e   :  { %v898_v37 = vsub.f32 %v814_v7, %v888_v28  ;;  %v1067_v6 = vsel %vm969_vm3, %v1062_v49, 0 }
 0x381   :  { %v1014_v29 = vpop.permute.xlu0 %1013 }
 0x382   :  { %v1019_v30 = vsel %vm969_vm3, %v1014_v29, 0 }
 0x383   :  { %6651 = vmatpush3.bf16.msra.mxu1 %v1019_v30 }
 0x384   :  { %1205 = vrot.lane.b32.xlu0 %v7692_v63, %s7512_s14  ;;  %6662 = vmatprep.subr.bf16.mxu1 %v7509_v8  ;;  %v912_v63 = vmul.f32 1.442695, %v898_v37  ;;  %v7797_v40 = vpop.eup %7357 }
 0x385   :  { %v7799_v46 = vpop.eup %7359  ;;  %v928_v42 = vsel %vm478_vm2, %v7797_v40, 0.0 }
 0x386   :  { %7361 = vpow2.f32 %v912_v63  ;;  %v925_v50 = vsel %vm478_vm2, %v7799_v46, 0.0  ;;  %v1350_v63 = vld [vmem:[%s8836_s7 + $0x4] sm:$0xf] }
 0x387   :  { %1157 = vrot.lane.b32.xlu1 %v7688_v59, %s7512_s14  ;;  %7363 = vpow2.f32 %v910_v44  ;;  %v922_v59 = vsel %vm478_vm2, %v7356_v45, 0.0  ;;  %v1411_v44 = vsel %vm969_vm3, %v1350_v63, 0 }
 0x390   :  { %v7803_v47 = vpop.eup %7361 }
 0x391   :  { %v934_v52 = vsel %vm478_vm2, %v7803_v47, 0.0  ;;  %v7809_v53 = vpop.eup %7363 }
 0x392   :  { %v931_v55 = vsel %vm478_vm2, %v7809_v53, 0.0 }
 0x3a3   :  { %923 = vadd.xlane.f32.xlu0 %v922_v59 }
 0x3a7   :  { %929 = vadd.xlane.f32.xlu0 %v928_v42 }
 0x3ab   :  { %926 = vadd.xlane.f32.xlu1 %v925_v50  ;;  %935 = vadd.xlane.f32.xlu0 %v934_v52  ;;  %v1352_v50 = vld [vmem:[%s8836_s7 + $0xc] sm:$0xf] }
 0x3ae   :  { %v891_v54 = vpop.xlane.xlu1 %890 }
 0x3af   :  { %v899_v56 = vsub.f32 %v863_v17, %v891_v54  ;;  %932 = vadd.xlane.f32.xlu1 %v931_v55  ;;  %v1503_v55 = vsel %vm969_vm3, %v1352_v50, 0 }
 0x3b1   :  { %v914_v57 = vmul.f32 1.442695, %v899_v56 }
 0x3b2   :  { %v1110_v62 = vpop.permute.xlu1 %1109 }
 0x3b3   :  { %7365 = vpow2.f32 %v914_v57  ;;  %v1115_v9 = vsel %vm969_vm3, %v1110_v62, 0 }
 0x3bd   :  { %v7813_v58 = vpop.eup %7365 }
 0x3be   :  { %v937_v60 = vsel %vm478_vm2, %v7813_v58, 0.0 }
 0x3bf   :  { %938 = vadd.xlane.f32.xlu0 %v937_v60 }
 0x3c0   :  { %1253 = vrot.lane.b32.xlu1 %v7696_v1, %s7512_s14 }
 0x3d5   :  { %1301 = vrot.lane.b32.xlu0 %v7700_v5, %s7512_s14 }
 0x3fb   :  { %v918_v61 = vpop.xlane.xlu0 %917 }
 0x3fc   :  { %7367 = vrcp.f32 %v918_v61 }
 0x3ff   :  { %v1206_v10 = vpop.permute.xlu0 %1205 }
 0x400   :  { %v1211_v27 = vsel %vm969_vm3, %v1206_v10, 0 }
 0x403   :  { %v921_v0 = vpop.xlane.xlu1 %920 }
 0x404   :  { %7369 = vrcp.f32 %v921_v0 }
 0x406   :  { %v7368_v2 = vpop.eup %7367 }
 0x407   :  { %v948_v3 = vmul.f32 %v7368_v2, %v7780_v25  ;;  %v1158_v12 = vpop.permute.xlu1 %1157 }
 0x408   :  { %v1163_v21 = vsel %vm969_vm3, %v1158_v12, 0 }
 0x409   :  { %v956_v4 = vpack.c.bf16 %v948_v3, %v948_v3 }
 0x40b   :  { %6647 = vmatmul.mubr.msk.bf16.vlgmr.msra.gmra.mrb[36].mxu0 %vm478_vm2, %v956_v4 }
 0x40c   :  { %6657 = vmatpush3.bf16.msra.mxu0 %v1067_v6  ;;  %6658 = vmatprep.mubr.msk.bf16.mxu0 %vm7510_vm1, %v7509_v8 }
 0x40d   :  { %6668 = vmatprep.subr.bf16.mxu0 %v7509_v8 }
 0x40e   :  { %v7370_v1 = vpop.eup %7369 }
 0x40f   :  { %v949_v5 = vmul.f32 %v7370_v1, %v7784_v51 }
 0x411   :  { %v957_v7 = vpack.c.bf16 %v949_v5, %v949_v5 }
 0x413   :  { %6653 = vmatmul.mubr.msk.bf16.vlgmr.msra.gmra.mrb[28].mxu1 %vm478_vm2, %v957_v7 }
 0x414   :  { %6663 = vmatpush3.bf16.msra.mxu1 %v1115_v9  ;;  %6664 = vmatprep.mubr.msk.bf16.mxu1 %vm7510_vm1, %v7509_v8 }
 0x415   :  { %6674 = vmatprep.subr.bf16.mxu1 %v7509_v8 }
 0x430   :  { %v924_v11 = vpop.xlane.xlu0 %923 }
 0x431   :  { %7371 = vrcp.f32 %v924_v11 }
 0x434   :  { %v930_v13 = vpop.xlane.xlu0 %929 }
 0x435   :  { %7373 = vrcp.f32 %v930_v13 }
 0x438   :  { %v927_v14 = vpop.xlane.xlu1 %926  ;;  %v936_v15 = vpop.xlane.xlu0 %935 }
 0x439   :  { %7375 = vrcp.f32 %v927_v14 }
 0x43a   :  { %7377 = vrcp.f32 %v936_v15 }
 0x43b   :  { %v7372_v16 = vpop.eup %7371 }
 0x43c   :  { %v950_v17 = vmul.f32 %v7372_v16, %v7356_v45  ;;  %v933_v18 = vpop.xlane.xlu1 %932  ;;  %v1351_v45 = vld [vmem:[%s8836_s7 + $0x8] sm:$0xf] }
 0x43d   :  { %7379 = vrcp.f32 %v933_v18  ;;  %v1457_v42 = vsel %vm969_vm3, %v1351_v45, 0 }
 0x43e   :  { %v958_v19 = vpack.c.bf16 %v950_v17, %v950_v17 }
 0x43f   :  { %v7374_v20 = vpop.eup %7373 }
 0x440   :  { %6659 = vmatmul.mubr.msk.bf16.vlgmr.msra.gmra.mrb[40].mxu0 %vm478_vm2, %v958_v19  ;;  %v952_v22 = vmul.f32 %v7374_v20, %v7797_v40  ;;  %v1254_v25 = vpop.permute.xlu1 %1253 }
 0x441   :  { %6669 = vmatpush3.bf16.msra.mxu0 %v1163_v21  ;;  %6670 = vmatprep.mubr.msk.bf16.mxu0 %vm7510_vm1, %v7509_v8  ;;  %v1259_v28 = vsel %vm969_vm3, %v1254_v25, 0 }
 0x442   :  { %6680 = vmatprep.subr.bf16.mxu0 %v7509_v8  ;;  %v960_v26 = vpack.c.bf16 %v952_v22, %v952_v22 }
 0x443   :  { %v7376_v23 = vpop.eup %7375 }
 0x444   :  { %v951_v24 = vmul.f32 %v7376_v23, %v7799_v46  ;;  %v7378_v41 = vpop.eup %7377 }
 0x445   :  { %v954_v29 = vmul.f32 %v7378_v41, %v7803_v47 }
 0x446   :  { %v959_v51 = vpack.c.bf16 %v951_v24, %v951_v24 }
 0x447   :  { %v7380_v48 = vpop.eup %7379  ;;  %v962_v33 = vpack.c.bf16 %v954_v29, %v954_v29 }
 0x448   :  { %6665 = vmatmul.mubr.msk.bf16.vlgmr.msra.gmra.mrb[32].mxu1 %vm478_vm2, %v959_v51  ;;  %6671 = vmatmul.mubr.msk.bf16.vlgmr.msra.gmra.mrb[44].mxu0 %vm478_vm2, %v960_v26  ;;  %v953_v30 = vmul.f32 %v7380_v48, %v7809_v53 }
 0x449   :  { %6675 = vmatpush3.bf16.msra.mxu1 %v1211_v27  ;;  %6681 = vmatpush3.bf16.msra.mxu0 %v1259_v28 }
 0x44a   :  { %6676 = vmatprep.mubr.msk.bf16.mxu1 %vm7510_vm1, %v7509_v8  ;;  %6682 = vmatprep.mubr.msk.bf16.mxu0 %vm7510_vm1, %v7509_v8  ;;  %v961_v32 = vpack.c.bf16 %v953_v30, %v953_v30 }
 0x44b   :  { %6686 = vmatprep.subr.bf16.mxu1 %v7509_v8  ;;  %6692 = vmatprep.subr.bf16.mxu0 %v7509_v8 }
 0x44c   :  { %v939_v31 = vpop.xlane.xlu0 %938 }
 0x44d   :  { %7381 = vrcp.f32 %v939_v31 }
 0x450   :  { %6677 = vmatmul.mubr.msk.bf16.vlgmr.msra.gmra.mrb[36].mxu1 %vm478_vm2, %v961_v32  ;;  %6683 = vmatmul.mubr.msk.bf16.vlgmr.msra.gmra.mrb[48].mxu0 %vm478_vm2, %v962_v33  ;;  %v1302_v34 = vpop.permute.xlu0 %1301 }
 0x451   :  { %v1307_v35 = vsel %vm969_vm3, %v1302_v34, 0  ;;  %6688 = vmatprep.mubr.msk.bf16.mxu1 %vm7510_vm1, %v7509_v8  ;;  %6694 = vmatprep.mubr.msk.bf16.mxu0 %vm7510_vm1, %v7509_v8 }
 0x452   :  { %6687 = vmatpush3.bf16.msra.mxu1 %v1307_v35  ;;  %6693 = vmatpush3.bf16.msra.mxu0 %v1365_v43 }
 0x453   :  { %6698 = vmatprep.subr.bf16.mxu1 %v7509_v8  ;;  %6704 = vmatprep.subr.bf16.mxu0 %v7509_v8 }
 0x457   :  { %v7382_v36 = vpop.eup %7381 }
 0x458   :  { %v955_v37 = vmul.f32 %v7382_v36, %v7813_v58 }
 0x45a   :  { %v963_v38 = vpack.c.bf16 %v955_v37, %v955_v37 }
 0x45c   :  { %6689 = vmatmul.mubr.msk.bf16.vlgmr.msra.gmra.mrb[40].mxu1 %vm478_vm2, %v963_v38 }
 0x45d   :  { %6700 = vmatprep.mubr.msk.bf16.mxu1 %vm7510_vm1, %v7509_v8  ;;  %6699 = vmatpush3.bf16.msra.mxu1 %v1411_v44 }
 0x45e   :  { %6710 = vmatprep.subr.bf16.mxu1 %v7509_v8 }
 0x4de   :  { %v1007_v59 = vpop.f32.mrb[36].mxu0 }
 0x4df   :  { %v1353_v40 = vpack.c.bf16 %v1007_v59, %v1007_v59  ;;  %v6648_v46 = vpop.f32.mrb[37].mxu0 }
 0x4e0   :  { %v1010_v47 = vpop.f32.mrb[38].mxu0 }
 0x4e1   :  { %v6649_v49 = vpop.f32.mrb[39].mxu0  ;;  %6695 = vmatmul.mubr.msk.bf16.vlgmr.msra.gmra.mrb[52].mxu0 %vm478_vm2, %v1353_v40  ;;  %v7481_v40 = vld [vmem:[%s8829_s0] sm:$0xff] }
 0x4e2   :  { %6705 = vmatpush3.bf16.msra.mxu0 %v1457_v42  ;;  %6706 = vmatprep.mubr.msk.bf16.mxu0 %vm7510_vm1, %v7509_v8 }
 0x4e3   :  { %6716 = vmatprep.subr.bf16.mxu0 %v7509_v8 }
 0x4e6   :  { %v1055_v52 = vpop.f32.mrb[28].mxu1 }
 0x4e7   :  { %v1354_v53 = vpack.c.bf16 %v1055_v52, %v1055_v52  ;;  %v6654_v54 = vpop.f32.mrb[29].mxu1 }
 0x4e8   :  { %v1058_v56 = vpop.f32.mrb[30].mxu1 }
 0x4e9   :  { %v6655_v57 = vpop.f32.mrb[31].mxu1  ;;  %6701 = vmatmul.mubr.msk.bf16.vlgmr.msra.gmra.mrb[44].mxu1 %vm478_vm2, %v1354_v53 }
 0x4ea   :  { %6711 = vmatpush3.bf16.msra.mxu1 %v1503_v55  ;;  %6712 = vmatprep.mubr.msk.bf16.mxu1 %vm7510_vm1, %v7509_v8 }
 0x4eb   :  { %6722 = vmatprep.subr.bf16.mxu1 %v7509_v8 }
 0x513   :  { %v1103_v58 = vpop.f32.mrb[40].mxu0 }
 0x514   :  { %v1355_v60 = vpack.c.bf16 %v1103_v58, %v1103_v58  ;;  %v6660_v61 = vpop.f32.mrb[41].mxu0 }
 0x515   :  { %v1106_v62 = vpop.f32.mrb[42].mxu0 }
 0x516   :  { %v6661_v0 = vpop.f32.mrb[43].mxu0  ;;  %6707 = vmatmul.mubr.msk.bf16.vlgmr.msra.gmra.mrb[56].mxu0 %vm478_vm2, %v1355_v60 }
 0x517   :  { %6717 = vmatpush3.bf16.msra.mxu0 %v1365_v43  ;;  %6718 = vmatprep.mubr.msk.bf16.mxu0 %vm7510_vm1, %v7509_v8 }
 0x518   :  { %6728 = vmatprep.subr.bf16.mxu0 %v7509_v8 }
 0x51b   :  { %v1151_v2 = vpop.f32.mrb[32].mxu1  ;;  %v1199_v3 = vpop.f32.mrb[44].mxu0 }
 0x51c   :  { %v1356_v4 = vpack.c.bf16 %v1151_v2, %v1151_v2  ;;  %v1357_v6 = vpack.c.bf16 %v1199_v3, %v1199_v3  ;;  %v6666_v1 = vpop.f32.mrb[33].mxu1  ;;  %v6672_v5 = vpop.f32.mrb[45].mxu0 }
 0x51d   :  { %v1154_v7 = vpop.f32.mrb[34].mxu1  ;;  %v1202_v9 = vpop.f32.mrb[46].mxu0 }
 0x51e   :  { %v6667_v10 = vpop.f32.mrb[35].mxu1  ;;  %v6673_v11 = vpop.f32.mrb[47].mxu0  ;;  %6713 = vmatmul.mubr.msk.bf16.vlgmr.msra.gmra.mrb[48].mxu1 %vm478_vm2, %v1356_v4  ;;  %6719 = vmatmul.mubr.msk.bf16.vlgmr.msra.gmra.mrb[60].mxu0 %vm478_vm2, %v1357_v6  ;;  %v7482_v6 = vld [vmem:[%s8829_s0 + $0x8] sm:$0xff] }
 0x51f   :  { %6723 = vmatpush3.bf16.msra.mxu1 %v1411_v44  ;;  %6729 = vmatpush3.bf16.msra.mxu0 %v1457_v42  ;;  %v7303_v10 = vld [vmem:[%s8840_s11] sm:$0xff]   ;;  %v7304_v11 = vld [vmem:[%s8840_s11 + $0x8] sm:$0xff]  }
 0x520   :  { %6724 = vmatprep.mubr.msk.bf16.mxu1 %vm7510_vm1, %v7509_v8  ;;  %6730 = vmatprep.mubr.msk.bf16.mxu0 %vm7510_vm1, %v7509_v8 }
 0x521   :  { %6734 = vmatprep.subr.bf16.mxu1 %v7509_v8  ;;  %6740 = vmatprep.subr.bf16.mxu0 %v7509_v8 }
 0x523   :  { %v1247_v12 = vpop.f32.mrb[36].mxu1  ;;  %v1295_v13 = vpop.f32.mrb[48].mxu0 }
 0x524   :  { %v1358_v14 = vpack.c.bf16 %v1247_v12, %v1247_v12  ;;  %v1359_v15 = vpack.c.bf16 %v1295_v13, %v1295_v13  ;;  %v6678_v16 = vpop.f32.mrb[37].mxu1  ;;  %v6684_v17 = vpop.f32.mrb[49].mxu0  ;;  %v1914_v12 = vld [vmem:[%s8830_s1] sm:$0xff]  ;;  %v7942_v13 = vld [vmem:[%s8830_s1 + $0x8] sm:$0xff] }
 0x525   :  { %v1250_v18 = vpop.f32.mrb[38].mxu1  ;;  %v1298_v19 = vpop.f32.mrb[50].mxu0 }
 0x526   :  { %v6679_v20 = vpop.f32.mrb[39].mxu1  ;;  %v6685_v21 = vpop.f32.mrb[51].mxu0  ;;  %6725 = vmatmul.mubr.msk.bf16.vlgmr.msra.gmra.mrb[52].mxu1 %vm478_vm2, %v1358_v14  ;;  %6731 = vmatmul.mubr.msk.bf16.vlgmr.msra.gmra.mrb[64].mxu0 %vm478_vm2, %v1359_v15  ;;  %v1917_v14 = vmul.f32 %v1914_v12, %v1914_v12  ;;  %v1918_v15 = vmul.f32 %v7942_v13, %v7942_v13 }
 0x527   :  { %6735 = vmatpush3.bf16.msra.mxu1 %v1503_v55  ;;  %6736 = vmatprep.mubr.msk.bf16.mxu1 %vm7510_vm1, %v7509_v8 }
 0x528   :  { %6744 = vmatprep.mubr.msk.bf16.mxu0 %vm7510_vm1, %v7509_v8  ;;  %6776 = vmatprep.subr.bf16.mxu1 %v7509_v8  ;;  %v1919_v16 = vsel %vm51_vm0, %v1917_v14, 0.0  ;;  %v1922_v17 = vsel %vm51_vm0, %v1918_v15, 0.0 }
 0x529   :  { %6741 = vmatpush3.bf16.msra.mxu0 %v7303_v10 }
 0x52a   :  { %6742 = vmatprep.subr.bf16.mxu0 %v7509_v8 }
 0x52d   :  { %6743 = vmatpush3.bf16.msra.mxu0 %v7304_v11 }
 0x52e   :  { %6748 = vmatprep.subr.bf16.mxu0 %v7509_v8 }
 0x52f   :  { %v1343_v22 = vpop.f32.mrb[40].mxu1 }
 0x530   :  { %v1360_v23 = vpack.c.bf16 %v1343_v22, %v1343_v22  ;;  %v6690_v24 = vpop.f32.mrb[41].mxu1 }
 0x531   :  { %v1346_v25 = vpop.f32.mrb[42].mxu1 }
 0x532   :  { %v6691_v41 = vpop.f32.mrb[43].mxu1  ;;  %6737 = vmatmul.mubr.msk.bf16.vlgmr.msra.gmra.mrb[56].mxu1 %vm478_vm2, %v1360_v23 }
 0x533   :  { %6780 = vmatprep.mubr.msk.bf16.mxu1 %vm7510_vm1, %v7509_v8 }
 0x5b4   :  { %v1401_v51 = vpop.f32.mrb[52].mxu0 }
 0x5b5   :  { %v6696_v26 = vpop.f32.mrb[53].mxu0 }
 0x5b6   :  { %v1404_v48 = vpop.f32.mrb[54].mxu0 }
 0x5b7   :  { %v6697_v27 = vpop.f32.mrb[55].mxu0 }
 0x5bc   :  { %v1447_v28 = vpop.f32.mrb[44].mxu1 }
 0x5bd   :  { %v1717_v29 = vadd.f32 %v1447_v28, %v1401_v51  ;;  %v6702_v30 = vpop.f32.mrb[45].mxu1  ;;  %v6102_v51 = vld [vmem:[%s8834_s5 + $0x1] ss:$0 sm:$0xff] }
 0x5be   :  { %v1450_v31 = vpop.f32.mrb[46].mxu1  ;;  %v7305_v28 = vld [vmem:[%s8841_s12] sm:$0xff]   ;;  %v7306_v30 = vld [vmem:[%s8841_s12 + $0x8] sm:$0xff]  }
 0x5bf   :  { %v6703_v32 = vpop.f32.mrb[47].mxu1 }
 0x5e9   :  { %v1493_v33 = vpop.f32.mrb[56].mxu0 }
 0x5ea   :  { %v1718_v34 = vadd.f32 %v1717_v29, %v1493_v33  ;;  %v6708_v35 = vpop.f32.mrb[57].mxu0 }
 0x5eb   :  { %v1496_v36 = vpop.f32.mrb[58].mxu0 }
 0x5ec   :  { %v6709_v37 = vpop.f32.mrb[59].mxu0  ;;  %v7308_v36 = vld [vmem:[%s8841_s12 + $0x18] sm:$0xff]  }
 0x5ed   :  { %v7309_v37 = vld [vmem:[%s8835_s6 + $0x60] sm:$0xff]  }
 0x5ee   :  { %6777 = vmatpush3.bf16.msra.mxu1 %v7309_v37 }
 0x5ef   :  { %6778 = vmatprep.subr.bf16.mxu1 %v7509_v8 }
 0x5f1   :  { %v1539_v38 = vpop.f32.mrb[48].mxu1  ;;  %v1582_v39 = vpop.f32.mrb[60].mxu0 }
 0x5f2   :  { %v1719_v43 = vadd.f32 %v1718_v34, %v1539_v38  ;;  %v6714_v63 = vpop.f32.mrb[49].mxu1  ;;  %v6720_v44 = vpop.f32.mrb[61].mxu0  ;;  %v7307_v34 = vld [vmem:[%s8841_s12 + $0x10] sm:$0xff]  }
 0x5f3   :  { %v1542_v45 = vpop.f32.mrb[50].mxu1  ;;  %v1585_v59 = vpop.f32.mrb[62].mxu0  ;;  %v7311_v44 = vld [vmem:[%s8835_s6 + $0x68] sm:$0xff]  }
 0x5f4   :  { %v7915_v46 = vadd.f32 %v7481_v40, %v1719_v43  ;;  %v6715_v42 = vpop.f32.mrb[51].mxu1  ;;  %v6721_v47 = vpop.f32.mrb[63].mxu0  ;;  %v6112_v45 = vld [vmem:[%s8834_s5 + $0x3] ss:$0 sm:$0xff]  ;;  %6779 = vmatpush3.bf16.msra.mxu1 %v7311_v44 }
 0x5f5   :  { %6792 = vmatprep.subr.bf16.mxu1 %v7509_v8  ;;  %v7310_v42 = vld [vmem:[%s8835_s6 + $0x40] sm:$0xff]   ;;  %v7312_v47 = vld [vmem:[%s8835_s6 + $0x48] sm:$0xff]  }
 0x5f6   :  { %v1726_v49 = vmul.f32 %v7915_v46, %v7915_v46 }
 0x5f8   :  { %v1728_v50 = vsel %vm51_vm0, %v1726_v49, 0.0 }
 0x5f9   :  { %v1668_v52 = vpop.f32.mrb[64].mxu0  ;;  %1729 = vadd.xlane.f32.xlu1 %v1728_v50  ;;  %v1625_v53 = vpop.f32.mrb[52].mxu1 }
 0x5fa   :  { %v1720_v54 = vadd.f32 %v1625_v53, %v1582_v39  ;;  %v6726_v55 = vpop.f32.mrb[53].mxu1  ;;  %v6732_v56 = vpop.f32.mrb[65].mxu0 }
 0x5fb   :  { %v1628_v57 = vpop.f32.mrb[54].mxu1  ;;  %v1671_v58 = vpop.f32.mrb[66].mxu0 }
 0x5fc   :  { %v6727_v60 = vpop.f32.mrb[55].mxu1  ;;  %v6733_v61 = vpop.f32.mrb[67].mxu0  ;;  %v1721_v62 = vadd.f32 %v1720_v54, %v1668_v52 }
 0x5fd   :  { %1923 = vadd.xlane.f32.xlu1 %v1922_v17 }
 0x605   :  { %v1711_v0 = vpop.f32.mrb[56].mxu1 }
 0x606   :  { %v1722_v2 = vadd.f32 %v1721_v62, %v1711_v0  ;;  %v6738_v3 = vpop.f32.mrb[57].mxu1  ;;  %v7313_v62 = vld [vmem:[%s8835_s6 + $0x50] sm:$0xff]   ;;  %v7314_v0 = vld [vmem:[%s8835_s6 + $0x58] sm:$0xff]  }
 0x607   :  { %v1714_v4 = vpop.f32.mrb[58].mxu1  ;;  %v7316_v3 = vld [vmem:[%s8835_s6 + $0x78] sm:$0xff]  }
 0x608   :  { %v7923_v1 = vadd.f32 %v7482_v6, %v1722_v2  ;;  %v6739_v5 = vpop.f32.mrb[59].mxu1  ;;  %v7315_v2 = vld [vmem:[%s8835_s6 + $0x70] sm:$0xff]  }
 0x60a   :  { %v1727_v7 = vmul.f32 %v7923_v1, %v7923_v1 }
 0x60c   :  { %v1731_v9 = vsel %vm51_vm0, %v1727_v7, 0.0 }
 0x60d   :  { %1732 = vadd.xlane.f32.xlu0 %v1731_v9 }
 0x611   :  { %1920 = vadd.xlane.f32.xlu0 %v1919_v16 }
 0x686   :  { %v1730_v18 = vpop.xlane.xlu1 %1729 }
 0x687   :  { %v1734_v19 = vmul.f32 0.03125, %v1730_v18 }
 0x689   :  { %v1736_v20 = vadd.f32 1e-06, %v1734_v19 }
 0x68a   :  { %v1924_v39 = vpop.xlane.xlu1 %1923 }
 0x68b   :  { %7383 = vrsqrt.f32 %v1736_v20  ;;  %v1926_v43 = vmul.f32 0.03125, %v1924_v39 }
 0x68d   :  { %v1928_v63 = vadd.f32 1e-06, %v1926_v43 }
 0x695   :  { %v7384_v24 = vpop.eup %7383 }
 0x696   :  { %v1740_v25 = vmul.f32 %v7384_v24, %v7915_v46 }
 0x698   :  { %v1746_v48 = vmul.f32 %v6102_v51, %v1740_v25 }
 0x69a   :  { %v1733_v21 = vpop.xlane.xlu0 %1732 }
 0x69b   :  { %v1735_v22 = vmul.f32 0.03125, %v1733_v21 }
 0x69d   :  { %v1737_v23 = vadd.f32 1e-06, %v1735_v22 }
 0x69e   :  { %v1921_v31 = vpop.xlane.xlu0 %1920 }
 0x69f   :  { %7385 = vrsqrt.f32 %v1737_v23  ;;  %v1925_v32 = vmul.f32 0.03125, %v1921_v31 }
 0x6a1   :  { %v1927_v33 = vadd.f32 1e-06, %v1925_v32 }
 0x6a3   :  { %7387 = vrsqrt.f32 %v1927_v33 }
 0x6a4   :  { %7389 = vrsqrt.f32 %v1928_v63 }
 0x6a9   :  { %v7386_v41 = vpop.eup %7385 }
 0x6aa   :  { %v1741_v26 = vmul.f32 %v7386_v41, %v7923_v1 }
 0x6ac   :  { %v1747_v27 = vmul.f32 %v6102_v51, %v1741_v26 }
 0x6ad   :  { %v7388_v35 = vpop.eup %7387 }
 0x6ae   :  { %v1752_v29 = vpack.c.bf16 %v1747_v27, %v1746_v48  ;;  %v1931_v38 = vmul.f32 %v7388_v35, %v1914_v12  ;;  %v7390_v49 = vpop.eup %7389 }
 0x6af   :  { %v1932_v50 = vmul.f32 %v7390_v49, %v7942_v13 }
 0x6b0   :  { %6745 = vmatmul.mubr.msk.bf16.vlgmr.msra.gmra.mrb[68].mxu0 %vm51_vm0, %v1752_v29  ;;  %v1937_v59 = vmul.f32 %v6112_v45, %v1931_v38 }
 0x6b1   :  { %6749 = vmatpush3.bf16.msra.mxu0 %v7305_v28  ;;  %6756 = vmatprep.mubr.msk.bf16.mxu0 %vm7510_vm1, %v7509_v8  ;;  %v1938_v52 = vmul.f32 %v6112_v45, %v1932_v50 }
 0x6b2   :  { %6750 = vmatprep.subr.bf16.mxu0 %v7509_v8  ;;  %v1956_v40 = vpack.c.bf16 %v1937_v59, %v1937_v59 }
 0x6b3   :  { %v1957_v53 = vpack.c.bf16 %v1938_v52, %v1938_v52 }
 0x6b4   :  { %6781 = vmatmul.mubr.msk.bf16.vlgmr.msra.gmra.mrb[60].mxu1 %vm51_vm0, %v1956_v40 }
 0x6b5   :  { %6751 = vmatpush3.bf16.msra.mxu0 %v7306_v30  ;;  %6793 = vmatpush3.bf16.msra.mxu1 %v7310_v42 }
 0x6b6   :  { %6752 = vmatprep.subr.bf16.mxu0 %v7509_v8  ;;  %6796 = vmatprep.mubr.msk.bf16.mxu1 %vm7510_vm1, %v7509_v8 }
 0x6b7   :  { %6794 = vmatprep.subr.bf16.mxu1 %v7509_v8 }
 0x6b9   :  { %6753 = vmatpush3.bf16.msra.mxu0 %v7307_v34  ;;  %6795 = vmatpush3.bf16.msra.mxu1 %v7312_v47 }
 0x6ba   :  { %6754 = vmatprep.subr.bf16.mxu0 %v7509_v8  ;;  %6808 = vmatprep.subr.bf16.mxu1 %v7509_v8 }
 0x6bc   :  { %6797 = vmatmul.mubr.msk.bf16.vlgmr.msra.gmra.mrb[64].mxu1 %vm51_vm0, %v1957_v53 }
 0x6bd   :  { %6755 = vmatpush3.bf16.msra.mxu0 %v7308_v36  ;;  %6809 = vmatpush3.bf16.msra.mxu1 %v7309_v37 }
 0x6be   :  { %6760 = vmatprep.subr.bf16.mxu0 %v7509_v8  ;;  %6812 = vmatprep.mubr.msk.bf16.mxu1 %vm7510_vm1, %v7509_v8 }
 0x6bf   :  { %6810 = vmatprep.subr.bf16.mxu1 %v7509_v8 }
 0x6c1   :  { %6811 = vmatpush3.bf16.msra.mxu1 %v7311_v44 }
 0x6c2   :  { %6824 = vmatprep.subr.bf16.mxu1 %v7509_v8 }
 0x6c4   :  { %6813 = vmatmul.mubr.msk.bf16.vlgmr.msra.gmra.mrb[68].mxu1 %vm51_vm0, %v1957_v53 }
 0x6c5   :  { %6826 = vmatprep.mubr.msk.bf16.mxu1 %vm7510_vm1, %v7509_v8 }
 0x783   :  { %v1802_v54 = vpop.f32.mrb[68].mxu0 }
 0x784   :  { %v6746_v55 = vpop.f32.mrb[69].mxu0  ;;  %v1809_v57 = vmax.f32 %v1802_v54, 0.0 }
 0x785   :  { %v1805_v56 = vpop.f32.mrb[70].mxu0 }
 0x786   :  { %v1810_v58 = vmax.f32 %v1805_v56, 0.0  ;;  %v6747_v60 = vpop.f32.mrb[71].mxu0 }
 0x787   :  { %v2111_v4 = vpop.f32.mrb[60].mxu1 }
 0x788   :  { %v1819_v61 = vpack.c.bf16 %v1810_v58, %v1809_v57  ;;  %v6782_v6 = vpop.f32.mrb[61].mxu1  ;;  %v8052_v28 = vpack.c.bf16 %v2111_v4, %v2111_v4 }
 0x789   :  { %v2114_v5 = vpop.f32.mrb[62].mxu1  ;;  %v6145_v6 = vld [vmem:[%s8832_s3 + $0x10] sm:$0xff] }
 0x78a   :  { %6757 = vmatmul.mubr.msk.bf16.vlgmr.msra.gmra.mrb[72].mxu0 %vm1844_vm4, %v1819_v61  ;;  %v6783_v7 = vpop.f32.mrb[63].mxu1 }
 0x78b   :  { %6761 = vmatpush3.bf16.msra.mxu0 %v7310_v42  ;;  %6764 = vmatprep.mubr.msk.bf16.mxu0 %vm7510_vm1, %v7509_v8 }
 0x78c   :  { %6762 = vmatprep.subr.bf16.mxu0 %v7509_v8 }
 0x78f   :  { %6763 = vmatpush3.bf16.msra.mxu0 %v7312_v47  ;;  %v2206_v9 = vpop.f32.mrb[64].mxu1 }
 0x790   :  { %6768 = vmatprep.subr.bf16.mxu0 %v7509_v8  ;;  %v6798_v10 = vpop.f32.mrb[65].mxu1  ;;  %v8056_v29 = vpack.c.bf16 %v2206_v9, %v2206_v9 }
 0x791   :  { %v2209_v11 = vpop.f32.mrb[66].mxu1 }
 0x792   :  { %6765 = vmatmul.mubr.msk.bf16.vlgmr.msra.gmra.mrb[76].mxu0 %vm51_vm0, %v1956_v40  ;;  %v6799_v12 = vpop.f32.mrb[67].mxu1 }
 0x793   :  { %6769 = vmatpush3.bf16.msra.mxu0 %v7313_v62  ;;  %6772 = vmatprep.mubr.msk.bf16.mxu0 %vm7510_vm1, %v7509_v8 }
 0x794   :  { %6770 = vmatprep.subr.bf16.mxu0 %v7509_v8 }
 0x797   :  { %6771 = vmatpush3.bf16.msra.mxu0 %v7314_v0  ;;  %v2286_v13 = vpop.f32.mrb[68].mxu1 }
 0x798   :  { %6784 = vmatprep.subr.bf16.mxu0 %v7509_v8  ;;  %v6814_v14 = vpop.f32.mrb[69].mxu1  ;;  %v8064_v35 = vpack.c.bf16 %v2286_v13, %v2286_v13 }
 0x799   :  { %v2289_v15 = vpop.f32.mrb[70].mxu1 }
 0x79a   :  { %6773 = vmatmul.mubr.msk.bf16.vlgmr.msra.gmra.mrb[80].mxu0 %vm51_vm0, %v1956_v40  ;;  %v6815_v16 = vpop.f32.mrb[71].mxu1 }
 0x79b   :  { %6785 = vmatpush3.bf16.msra.mxu0 %v7315_v2  ;;  %6788 = vmatprep.mubr.msk.bf16.mxu0 %vm7510_vm1, %v7509_v8 }
 0x79c   :  { %6786 = vmatprep.subr.bf16.mxu0 %v7509_v8 }
 0x79f   :  { %6787 = vmatpush3.bf16.msra.mxu0 %v7316_v3 }
 0x7a0   :  { %6800 = vmatprep.subr.bf16.mxu0 %v7509_v8 }
 0x7a2   :  { %6789 = vmatmul.mubr.msk.bf16.vlgmr.msra.gmra.mrb[84].mxu0 %vm51_vm0, %v1956_v40 }
 0x7a3   :  { %6801 = vmatpush3.bf16.msra.mxu0 %v7313_v62  ;;  %6804 = vmatprep.mubr.msk.bf16.mxu0 %vm7510_vm1, %v7509_v8 }
 0x7a4   :  { %6802 = vmatprep.subr.bf16.mxu0 %v7509_v8 }
 0x7a7   :  { %6803 = vmatpush3.bf16.msra.mxu0 %v7314_v0 }
 0x7a8   :  { %6816 = vmatprep.subr.bf16.mxu0 %v7509_v8 }
 0x7aa   :  { %6805 = vmatmul.mubr.msk.bf16.vlgmr.msra.gmra.mrb[88].mxu0 %vm51_vm0, %v1957_v53 }
 0x7ab   :  { %6817 = vmatpush3.bf16.msra.mxu0 %v7315_v2  ;;  %6820 = vmatprep.mubr.msk.bf16.mxu0 %vm7510_vm1, %v7509_v8 }
 0x7ac   :  { %6818 = vmatprep.subr.bf16.mxu0 %v7509_v8 }
 0x7af   :  { %6819 = vmatpush3.bf16.msra.mxu0 %v7316_v3 }
 0x7b0   :  { %6830 = vmatprep.subr.bf16.mxu0 %v7509_v8 }
 0x7b2   :  { %6821 = vmatmul.mubr.msk.bf16.vlgmr.msra.gmra.mrb[92].mxu0 %vm51_vm0, %v1957_v53 }
 0x7b3   :  { %6832 = vmatprep.mubr.msk.bf16.mxu0 %vm7510_vm1, %v7509_v8 }
 0x85d   :  { %v8043_v17 = vpop.f32.mrb[72].mxu0 }
 0x85e   :  { %v6758_v18 = vpop.f32.mrb[73].mxu0 }
 0x85f   :  { %v8045_v19 = vpop.f32.mrb[74].mxu0 }
 0x860   :  { %v6759_v20 = vpop.f32.mrb[75].mxu0 }
 0x865   :  { %v2007_v21 = vpop.f32.mrb[76].mxu0 }
 0x866   :  { %v2335_v22 = vpack.c.bf16 %v2007_v21, %v2007_v21  ;;  %v6766_v23 = vpop.f32.mrb[77].mxu0 }
 0x867   :  { %v2010_v24 = vpop.f32.mrb[78].mxu0 }
 0x868   :  { %2344 = vrot.lane.b32.xlu0 %v2335_v22, %s7511_s30  ;;  %v6767_v25 = vpop.f32.mrb[79].mxu0 }
 0x86d   :  { %v2059_v41 = vpop.f32.mrb[80].mxu0 }
 0x86e   :  { %v8048_v51 = vpack.c.bf16 %v2059_v41, %v2059_v41  ;;  %v6774_v26 = vpop.f32.mrb[81].mxu0 }
 0x86f   :  { %v2062_v48 = vpop.f32.mrb[82].mxu0 }
 0x870   :  { %2393 = vrot.lane.b32.xlu1 %v8048_v51, %s7511_s30  ;;  %v6775_v27 = vpop.f32.mrb[83].mxu0 }
 0x874   :  { %2442 = vrot.lane.b32.xlu1 %v8052_v28, %s7511_s30 }
 0x875   :  { %v2163_v30 = vpop.f32.mrb[84].mxu0 }
 0x876   :  { %v8058_v31 = vpack.c.bf16 %v2163_v30, %v2163_v30  ;;  %v6790_v32 = vpop.f32.mrb[85].mxu0 }
 0x877   :  { %v2166_v33 = vpop.f32.mrb[86].mxu0  ;;  %v6146_v32 = vld [vmem:[%s8832_s3 + $0x18] sm:$0xff] }
 0x878   :  { %2491 = vrot.lane.b32.xlu0 %v8058_v31, %s7511_s30  ;;  %v6791_v34 = vpop.f32.mrb[87].mxu0  ;;  %2540 = vrot.lane.b32.xlu1 %v8056_v29, %s7511_s30 }
 0x87c   :  { %2638 = vrot.lane.b32.xlu1 %v8064_v35, %s7511_s30 }
 0x87d   :  { %v2246_v36 = vpop.f32.mrb[88].mxu0 }
 0x87e   :  { %v8068_v37 = vpack.c.bf16 %v2246_v36, %v2246_v36  ;;  %v6806_v38 = vpop.f32.mrb[89].mxu0 }
 0x87f   :  { %v2249_v39 = vpop.f32.mrb[90].mxu0 }
 0x880   :  { %2589 = vrot.lane.b32.xlu0 %v8068_v37, %s7511_s30  ;;  %v6807_v43 = vpop.f32.mrb[91].mxu0  ;;  %2831 = vrot.lane.b32.xlu1 %v2335_v22, %s7512_s14 }
 0x885   :  { %v2326_v63 = vpop.f32.mrb[92].mxu0 }
 0x886   :  { %v8073_v44 = vpack.c.bf16 %v2326_v63, %v2326_v63  ;;  %v6822_v45 = vpop.f32.mrb[93].mxu0 }
 0x887   :  { %v2329_v59 = vpop.f32.mrb[94].mxu0 }
 0x888   :  { %2687 = vrot.lane.b32.xlu0 %v8073_v44, %s7511_s30  ;;  %v6823_v40 = vpop.f32.mrb[95].mxu0 }
 0x8da   :  { %v2345_v42 = vpop.permute.xlu0 %2344 }
 0x8db   :  { %v2350_v47 = vsel %vm478_vm2, %v2345_v42, 0 }
 0x8dc   :  { %6825 = vmatpush3.bf16.xpose.msra.mxu1 %v2350_v47 }
 0x8dd   :  { %6836 = vmatprep.subr.bf16.mxu1 %v7509_v8 }
 0x8e2   :  { %v2394_v49 = vpop.permute.xlu1 %2393 }
 0x8e3   :  { %v2399_v50 = vsel %vm478_vm2, %v2394_v49, 0  ;;  %6827 = vmatmul.mubr.msk.bf16.vlgmr.msra.gmra.mrb[72].mxu1 %vm478_vm2, %v2335_v22 }
 0x8e4   :  { %6831 = vmatpush3.bf16.xpose.msra.mxu0 %v2399_v50  ;;  %6838 = vmatprep.mubr.msk.bf16.mxu1 %vm7510_vm1, %v7509_v8 }
 0x8e5   :  { %6842 = vmatprep.subr.bf16.mxu0 %v7509_v8 }
 0x8e6   :  { %v2443_v52 = vpop.permute.xlu1 %2442 }
 0x8e7   :  { %v2448_v53 = vsel %vm478_vm2, %v2443_v52, 0 }
 0x8e8   :  { %6837 = vmatpush3.bf16.xpose.msra.mxu1 %v2448_v53 }
 0x8e9   :  { %6848 = vmatprep.subr.bf16.mxu1 %v7509_v8 }
 0x8ea   :  { %v2492_v54 = vpop.permute.xlu0 %2491  ;;  %v2541_v56 = vpop.permute.xlu1 %2540 }
 0x8eb   :  { %v2497_v55 = vsel %vm478_vm2, %v2492_v54, 0  ;;  %6833 = vmatmul.mubr.msk.bf16.vlgmr.msra.gmra.mrb[96].mxu0 %vm478_vm2, %v8048_v51  ;;  %v2546_v57 = vsel %vm478_vm2, %v2541_v56, 0 }
 0x8ec   :  { %6843 = vmatpush3.bf16.xpose.msra.mxu0 %v2497_v55  ;;  %6844 = vmatprep.mubr.msk.bf16.mxu0 %vm7510_vm1, %v7509_v8 }
 0x8ed   :  { %6854 = vmatprep.subr.bf16.mxu0 %v7509_v8 }
 0x8ee   :  { %v2639_v61 = vpop.permute.xlu1 %2638 }
 0x8ef   :  { %6839 = vmatmul.mubr.msk.bf16.vlgmr.msra.gmra.mrb[76].mxu1 %vm478_vm2, %v8052_v28  ;;  %v2644_v62 = vsel %vm478_vm2, %v2639_v61, 0 }
 0x8f0   :  { %6849 = vmatpush3.bf16.xpose.msra.mxu1 %v2546_v57  ;;  %6850 = vmatprep.mubr.msk.bf16.mxu1 %vm7510_vm1, %v7509_v8 }
 0x8f1   :  { %6860 = vmatprep.subr.bf16.mxu1 %v7509_v8 }
 0x8f2   :  { %v2590_v58 = vpop.permute.xlu0 %2589  ;;  %v2832_v3 = vpop.permute.xlu1 %2831 }
 0x8f3   :  { %v2595_v60 = vsel %vm478_vm2, %v2590_v58, 0  ;;  %6845 = vmatmul.mubr.msk.bf16.vlgmr.msra.gmra.mrb[100].mxu0 %vm478_vm2, %v8058_v31  ;;  %v2837_v4 = vsel %vm969_vm3, %v2832_v3, 0 }
 0x8f4   :  { %6855 = vmatpush3.bf16.xpose.msra.mxu0 %v2595_v60  ;;  %6856 = vmatprep.mubr.msk.bf16.mxu0 %vm7510_vm1, %v7509_v8 }
 0x8f5   :  { %6866 = vmatprep.subr.bf16.mxu0 %v7509_v8 }
 0x8f7   :  { %6851 = vmatmul.mubr.msk.bf16.vlgmr.msra.gmra.mrb[80].mxu1 %vm478_vm2, %v8056_v29 }
 0x8f8   :  { %6861 = vmatpush3.bf16.xpose.msra.mxu1 %v2644_v62  ;;  %6862 = vmatprep.mubr.msk.bf16.mxu1 %vm7510_vm1, %v7509_v8 }
 0x8f9   :  { %6872 = vmatprep.subr.bf16.mxu1 %v7509_v8 }
 0x8fa   :  { %v2688_v0 = vpop.permute.xlu0 %2687 }
 0x8fb   :  { %v2693_v2 = vsel %vm478_vm2, %v2688_v0, 0  ;;  %6857 = vmatmul.mubr.msk.bf16.vlgmr.msra.gmra.mrb[104].mxu0 %vm478_vm2, %v8068_v37 }
 0x8fc   :  { %6867 = vmatpush3.bf16.xpose.msra.mxu0 %v2693_v2  ;;  %6868 = vmatprep.mubr.msk.bf16.mxu0 %vm7510_vm1, %v7509_v8 }
 0x8fd   :  { %6878 = vmatprep.subr.bf16.mxu0 %v7509_v8 }
 0x8ff   :  { %6863 = vmatmul.mubr.msk.bf16.vlgmr.msra.gmra.mrb[84].mxu1 %vm478_vm2, %v8064_v35 }
 0x900   :  { %6873 = vmatpush3.bf16.msra.mxu1 %v2837_v4  ;;  %6874 = vmatprep.mubr.msk.bf16.mxu1 %vm7510_vm1, %v7509_v8 }
 0x901   :  { %6884 = vmatprep.subr.bf16.mxu1 %v7509_v8 }
 0x903   :  { %6869 = vmatmul.mubr.msk.bf16.vlgmr.msra.gmra.mrb[108].mxu0 %vm478_vm2, %v8073_v44 }
 0x904   :  { %6880 = vmatprep.mubr.msk.bf16.mxu0 %vm7510_vm1, %v7509_v8 }
 0x9b6   :  { %v2386_v5 = vpop.f32.mrb[72].mxu1 }
 0x9b7   :  { %v2387_v7 = vadd.f32 %v6145_v6, %v2386_v5  ;;  %v6828_v9 = vpop.f32.mrb[73].mxu1 }
 0x9b8   :  { %v2389_v10 = vpop.f32.mrb[74].mxu1 }
 0x9b9   :  { %v6829_v11 = vpop.f32.mrb[75].mxu1  ;;  %v2735_v12 = vsel %vm478_vm2, %v2387_v7, -inf }
 0x9ba   :  { %2736 = vmax.xlane.f32.xlu1 %v2735_v12 }
 0x9be   :  { %v2435_v13 = vpop.f32.mrb[96].mxu0 }
 0x9bf   :  { %v2436_v14 = vadd.f32 %v6145_v6, %v2435_v13  ;;  %v6834_v15 = vpop.f32.mrb[97].mxu0 }
 0x9c0   :  { %v2438_v16 = vpop.f32.mrb[98].mxu0 }
 0x9c1   :  { %v6835_v18 = vpop.f32.mrb[99].mxu0  ;;  %v2738_v20 = vsel %vm478_vm2, %v2436_v14, -inf }
 0x9c2   :  { %2739 = vmax.xlane.f32.xlu0 %v2738_v20  ;;  %v2484_v21 = vpop.f32.mrb[76].mxu1 }
 0x9c3   :  { %v8131_v22 = vadd.f32 %v6145_v6, %v2484_v21  ;;  %v6840_v23 = vpop.f32.mrb[77].mxu1 }
 0x9c4   :  { %v2487_v24 = vpop.f32.mrb[78].mxu1 }
 0x9c5   :  { %v6841_v25 = vpop.f32.mrb[79].mxu1  ;;  %v2741_v41 = vsel %vm478_vm2, %v8131_v22, -inf }
 0x9c6   :  { %v2533_v26 = vpop.f32.mrb[100].mxu0  ;;  %2742 = vmax.xlane.f32.xlu0 %v2741_v41 }
 0x9c7   :  { %v8135_v48 = vadd.f32 %v6145_v6, %v2533_v26  ;;  %v6846_v27 = vpop.f32.mrb[101].mxu0 }
 0x9c8   :  { %v2536_v30 = vpop.f32.mrb[102].mxu0 }
 0x9c9   :  { %v6847_v33 = vpop.f32.mrb[103].mxu0  ;;  %v2744_v34 = vsel %vm478_vm2, %v8135_v48, -inf }
 0x9ca   :  { %2745 = vmax.xlane.f32.xlu1 %v2744_v34  ;;  %v2582_v36 = vpop.f32.mrb[80].mxu1 }
 0x9cb   :  { %v2583_v38 = vadd.f32 %v6146_v32, %v2582_v36  ;;  %v6852_v39 = vpop.f32.mrb[81].mxu1 }
 0x9cc   :  { %v2585_v43 = vpop.f32.mrb[82].mxu1 }
 0x9cd   :  { %v6853_v63 = vpop.f32.mrb[83].mxu1  ;;  %v2747_v45 = vsel %vm478_vm2, %v2583_v38, -inf }
 0x9ce   :  { %v2631_v59 = vpop.f32.mrb[104].mxu0  ;;  %2748 = vmax.xlane.f32.xlu0 %v2747_v45 }
 0x9cf   :  { %v2632_v40 = vadd.f32 %v6146_v32, %v2631_v59  ;;  %v6858_v42 = vpop.f32.mrb[105].mxu0 }
 0x9d0   :  { %v2634_v47 = vpop.f32.mrb[106].mxu0 }
 0x9d1   :  { %v6859_v49 = vpop.f32.mrb[107].mxu0  ;;  %v2750_v50 = vsel %vm478_vm2, %v2632_v40, -inf }
 0x9d2   :  { %2751 = vmax.xlane.f32.xlu1 %v2750_v50  ;;  %v2680_v52 = vpop.f32.mrb[84].mxu1 }
 0x9d3   :  { %v2681_v53 = vadd.f32 %v6146_v32, %v2680_v52  ;;  %v6864_v54 = vpop.f32.mrb[85].mxu1 }
 0x9d4   :  { %v2683_v55 = vpop.f32.mrb[86].mxu1 }
 0x9d5   :  { %v6865_v56 = vpop.f32.mrb[87].mxu1  ;;  %v2753_v57 = vsel %vm478_vm2, %v2681_v53, -inf }
 0x9d6   :  { %v2729_v58 = vpop.f32.mrb[108].mxu0  ;;  %2754 = vmax.xlane.f32.xlu0 %v2753_v57 }
 0x9d7   :  { %v6870_v60 = vpop.f32.mrb[109].mxu0  ;;  %v2730_v0 = vadd.f32 %v6146_v32, %v2729_v58 }
 0x9d8   :  { %v2732_v61 = vpop.f32.mrb[110].mxu0 }
 0x9d9   :  { %v6871_v62 = vpop.f32.mrb[111].mxu0  ;;  %v2756_v2 = vsel %vm478_vm2, %v2730_v0, -inf }
 0x9e3   :  { %2927 = vrot.lane.b32.xlu1 %v8052_v28, %s7512_s14 }
 0x9ec   :  { %2879 = vrot.lane.b32.xlu0 %v8048_v51, %s7512_s14 }
 0xa07   :  { %2757 = vmax.xlane.f32.xlu1 %v2756_v2 }
 0xa18   :  { %2975 = vrot.lane.b32.xlu1 %v8058_v31, %s7512_s14 }
 0xa47   :  { %v2737_v3 = vpop.xlane.xlu1 %2736 }
 0xa48   :  { %v2759_v4 = vsub.f32 %v2387_v7, %v2737_v3 }
 0xa4a   :  { %v2767_v6 = vmul.f32 1.442695, %v2759_v4 }
 0xa4c   :  { %7391 = vpow2.f32 %v2767_v6 }
 0xa4f   :  { %v2740_v5 = vpop.xlane.xlu0 %2739 }
 0xa50   :  { %v2760_v9 = vsub.f32 %v2436_v14, %v2740_v5 }
 0xa52   :  { %v2769_v10 = vmul.f32 1.442695, %v2760_v9 }
 0xa53   :  { %v2743_v28 = vpop.xlane.xlu0 %2742 }
 0xa54   :  { %7393 = vpow2.f32 %v2769_v10  ;;  %v2761_v16 = vsub.f32 %v8131_v22, %v2743_v28 }
 0xa56   :  { %v8152_v11 = vpop.eup %7391  ;;  %v2771_v18 = vmul.f32 1.442695, %v2761_v16 }
 0xa57   :  { %v2783_v51 = vsel %vm478_vm2, %v8152_v11, 0.0  ;;  %v2746_v20 = vpop.xlane.xlu1 %2745 }
 0xa58   :  { %2784 = vadd.xlane.f32.xlu0 %v2783_v51  ;;  %v2762_v23 = vsub.f32 %v8135_v48, %v2746_v20  ;;  %7395 = vpow2.f32 %v2771_v18 }
 0xa5a   :  { %v2773_v26 = vmul.f32 1.442695, %v2762_v23 }
 0xa5b   :  { %v2749_v13 = vpop.xlane.xlu0 %2748 }
 0xa5c   :  { %v2763_v21 = vsub.f32 %v2583_v38, %v2749_v13 }
 0xa5e   :  { %v8156_v12 = vpop.eup %7393  ;;  %v2775_v24 = vmul.f32 1.442695, %v2763_v21 }
 0xa5f   :  { %v2786_v31 = vsel %vm478_vm2, %v8156_v12, 0.0  ;;  %v2752_v41 = vpop.xlane.xlu1 %2751 }
 0xa60   :  { %2787 = vadd.xlane.f32.xlu1 %v2786_v31  ;;  %7397 = vpow2.f32 %v2775_v24  ;;  %v2764_v27 = vsub.f32 %v2632_v40, %v2752_v41 }
 0xa61   :  { %7399 = vpow2.f32 %v2773_v26 }
 0xa62   :  { %v7396_v32 = vpop.eup %7395 }
 0xa63   :  { %v2755_v7 = vpop.xlane.xlu0 %2754  ;;  %v2928_v48 = vpop.permute.xlu1 %2927 }
 0xa64   :  { %v2765_v25 = vsub.f32 %v2681_v53, %v2755_v7  ;;  %v2933_v56 = vsel %vm969_vm3, %v2928_v48, 0  ;;  %v6165_v48 = vld [vmem:[%s8836_s7 + $0x18] sm:$0xf] }
 0xa66   :  { %v2779_v30 = vmul.f32 1.442695, %v2765_v25 }
 0xa67   :  { %v2880_v15 = vpop.permute.xlu0 %2879 }
 0xa68   :  { %v2885_v14 = vsel %vm969_vm3, %v2880_v15, 0  ;;  %7401 = vpow2.f32 %v2779_v30 }
 0xa69   :  { %6879 = vmatpush3.bf16.msra.mxu0 %v2885_v14 }
 0xa6a   :  { %6890 = vmatprep.subr.bf16.mxu0 %v7509_v8  ;;  %v8169_v22 = vpop.eup %7397 }
 0xa6b   :  { %v8171_v33 = vpop.eup %7399  ;;  %v2795_v34 = vsel %vm478_vm2, %v8169_v22, 0.0 }
 0xa6c   :  { %v2792_v39 = vsel %vm478_vm2, %v8171_v33, 0.0 }
 0xa6e   :  { %3071 = vrot.lane.b32.xlu0 %v8068_v37, %s7512_s14  ;;  %v2777_v37 = vmul.f32 1.442695, %v2764_v27 }
 0xa70   :  { %7403 = vpow2.f32 %v2777_v37 }
 0xa71   :  { %3023 = vrot.lane.b32.xlu1 %v8056_v29, %s7512_s14  ;;  %v2789_v29 = vsel %vm478_vm2, %v7396_v32, 0.0 }
 0xa72   :  { %v8175_v36 = vpop.eup %7401 }
 0xa73   :  { %v2801_v43 = vsel %vm478_vm2, %v8175_v36, 0.0 }
 0xa7a   :  { %v8181_v63 = vpop.eup %7403 }
 0xa7b   :  { %v2798_v40 = vsel %vm478_vm2, %v8181_v63, 0.0 }
 0xa8d   :  { %2790 = vadd.xlane.f32.xlu0 %v2789_v29 }
 0xa91   :  { %2796 = vadd.xlane.f32.xlu0 %v2795_v34 }
 0xa94   :  { %v2758_v38 = vpop.xlane.xlu1 %2757 }
 0xa95   :  { %v2766_v45 = vsub.f32 %v2730_v0, %v2758_v38  ;;  %2793 = vadd.xlane.f32.xlu1 %v2792_v39  ;;  %2802 = vadd.xlane.f32.xlu0 %v2801_v43  ;;  %v3324_v39 = vsel %vm969_vm3, %v6165_v48, 0 }
 0xa97   :  { %v2781_v59 = vmul.f32 1.442695, %v2766_v45  ;;  %v6166_v45 = vld [vmem:[%s8836_s7 + $0x1c] sm:$0xf] }
 0xa98   :  { %v2976_v50 = vpop.permute.xlu1 %2975 }
 0xa99   :  { %7405 = vpow2.f32 %v2781_v59  ;;  %2799 = vadd.xlane.f32.xlu1 %v2798_v40  ;;  %v2981_v58 = vsel %vm969_vm3, %v2976_v50, 0 }
 0xaa3   :  { %v8185_v42 = vpop.eup %7405 }
 0xaa4   :  { %v2804_v47 = vsel %vm478_vm2, %v8185_v42, 0.0 }
 0xaa5   :  { %2805 = vadd.xlane.f32.xlu0 %v2804_v47  ;;  %v3370_v47 = vsel %vm969_vm3, %v6166_v45, 0  ;;  %v7483_v45 = vld [vmem:[%s8830_s1] sm:$0xff] }
 0xaaa   :  { %3119 = vrot.lane.b32.xlu1 %v8064_v35, %s7512_s14 }
 0xabb   :  { %3167 = vrot.lane.b32.xlu0 %v8073_v44, %s7512_s14 }
 0xae5   :  { %v2785_v49 = vpop.xlane.xlu0 %2784 }
 0xae6   :  { %7407 = vrcp.f32 %v2785_v49 }
 0xae9   :  { %v3072_v60 = vpop.permute.xlu0 %3071 }
 0xaea   :  { %v3077_v16 = vsel %vm969_vm3, %v3072_v60, 0 }
 0xaed   :  { %v2788_v52 = vpop.xlane.xlu1 %2787 }
 0xaee   :  { %7409 = vrcp.f32 %v2788_v52 }
 0xaf0   :  { %v7408_v53 = vpop.eup %7407 }
 0xaf1   :  { %v2815_v54 = vmul.f32 %v7408_v53, %v8152_v11  ;;  %v3024_v62 = vpop.permute.xlu1 %3023 }
 0xaf2   :  { %v3029_v11 = vsel %vm969_vm3, %v3024_v62, 0 }
 0xaf3   :  { %v2823_v55 = vpack.c.bf16 %v2815_v54, %v2815_v54 }
 0xaf5   :  { %6875 = vmatmul.mubr.msk.bf16.vlgmr.msra.gmra.mrb[88].mxu1 %vm478_vm2, %v2823_v55 }
 0xaf6   :  { %6885 = vmatpush3.bf16.msra.mxu1 %v2933_v56  ;;  %6886 = vmatprep.mubr.msk.bf16.mxu1 %vm7510_vm1, %v7509_v8 }
 0xaf7   :  { %6896 = vmatprep.subr.bf16.mxu1 %v7509_v8 }
 0xaf8   :  { %v7410_v35 = vpop.eup %7409 }
 0xaf9   :  { %v2816_v44 = vmul.f32 %v7410_v35, %v8156_v12 }
 0xafb   :  { %v2824_v57 = vpack.c.bf16 %v2816_v44, %v2816_v44 }
 0xafd   :  { %6881 = vmatmul.mubr.msk.bf16.vlgmr.msra.gmra.mrb[112].mxu0 %vm478_vm2, %v2824_v57 }
 0xafe   :  { %6891 = vmatpush3.bf16.msra.mxu0 %v2981_v58  ;;  %6892 = vmatprep.mubr.msk.bf16.mxu0 %vm7510_vm1, %v7509_v8 }
 0xaff   :  { %6902 = vmatprep.subr.bf16.mxu0 %v7509_v8 }
 0xb1a   :  { %v2791_v61 = vpop.xlane.xlu0 %2790 }
 0xb1b   :  { %7411 = vrcp.f32 %v2791_v61 }
 0xb1e   :  { %v2797_v0 = vpop.xlane.xlu0 %2796 }
 0xb1f   :  { %7413 = vrcp.f32 %v2797_v0 }
 0xb22   :  { %v2794_v2 = vpop.xlane.xlu1 %2793  ;;  %v2803_v3 = vpop.xlane.xlu0 %2802 }
 0xb23   :  { %7415 = vrcp.f32 %v2794_v2 }
 0xb24   :  { %7417 = vrcp.f32 %v2803_v3 }
 0xb25   :  { %v7412_v4 = vpop.eup %7411 }
 0xb26   :  { %v2817_v6 = vmul.f32 %v7412_v4, %v7396_v32  ;;  %v2800_v5 = vpop.xlane.xlu1 %2799  ;;  %v6163_v32 = vld [vmem:[%s8836_s7 + $0x10] sm:$0xf] }
 0xb27   :  { %7419 = vrcp.f32 %v2800_v5  ;;  %v3232_v29 = vsel %vm969_vm3, %v6163_v32, 0 }
 0xb28   :  { %v2825_v9 = vpack.c.bf16 %v2817_v6, %v2817_v6 }
 0xb29   :  { %v7414_v10 = vpop.eup %7413 }
 0xb2a   :  { %6887 = vmatmul.mubr.msk.bf16.vlgmr.msra.gmra.mrb[92].mxu1 %vm478_vm2, %v2825_v9  ;;  %v2819_v51 = vmul.f32 %v7414_v10, %v8169_v22  ;;  %v3120_v13 = vpop.permute.xlu1 %3119  ;;  %v6164_v22 = vld [vmem:[%s8836_s7 + $0x14] sm:$0xf] }
 0xb2b   :  { %6897 = vmatpush3.bf16.msra.mxu1 %v3029_v11  ;;  %6898 = vmatprep.mubr.msk.bf16.mxu1 %vm7510_vm1, %v7509_v8  ;;  %v3125_v18 = vsel %vm969_vm3, %v3120_v13, 0 }
 0xb2c   :  { %6908 = vmatprep.subr.bf16.mxu1 %v7509_v8  ;;  %v2827_v15 = vpack.c.bf16 %v2819_v51, %v2819_v51 }
 0xb2d   :  { %v7416_v28 = vpop.eup %7415 }
 0xb2e   :  { %v2818_v12 = vmul.f32 %v7416_v28, %v8171_v33  ;;  %v7418_v31 = vpop.eup %7417  ;;  %v3278_v33 = vsel %vm969_vm3, %v6164_v22, 0 }
 0xb2f   :  { %v2821_v21 = vmul.f32 %v7418_v31, %v8175_v36 }
 0xb30   :  { %v2826_v7 = vpack.c.bf16 %v2818_v12, %v2818_v12 }
 0xb31   :  { %v7420_v14 = vpop.eup %7419  ;;  %v2829_v41 = vpack.c.bf16 %v2821_v21, %v2821_v21 }
 0xb32   :  { %6893 = vmatmul.mubr.msk.bf16.vlgmr.msra.gmra.mrb[116].mxu0 %vm478_vm2, %v2826_v7  ;;  %6899 = vmatmul.mubr.msk.bf16.vlgmr.msra.gmra.mrb[96].mxu1 %vm478_vm2, %v2827_v15  ;;  %v2806_v20 = vpop.xlane.xlu0 %2805  ;;  %v2820_v23 = vmul.f32 %v7420_v14, %v8181_v63 }
 0xb33   :  { %6903 = vmatpush3.bf16.msra.mxu0 %v3077_v16  ;;  %6909 = vmatpush3.bf16.msra.mxu1 %v3125_v18  ;;  %7421 = vrcp.f32 %v2806_v20 }
 0xb34   :  { %6904 = vmatprep.mubr.msk.bf16.mxu0 %vm7510_vm1, %v7509_v8  ;;  %6910 = vmatprep.mubr.msk.bf16.mxu1 %vm7510_vm1, %v7509_v8  ;;  %v2828_v25 = vpack.c.bf16 %v2820_v23, %v2820_v23 }
 0xb35   :  { %6914 = vmatprep.subr.bf16.mxu0 %v7509_v8  ;;  %6920 = vmatprep.subr.bf16.mxu1 %v7509_v8 }
 0xb36   :  { %v3168_v24 = vpop.permute.xlu0 %3167 }
 0xb37   :  { %v3173_v26 = vsel %vm969_vm3, %v3168_v24, 0 }
 0xb3a   :  { %6905 = vmatmul.mubr.msk.bf16.vlgmr.msra.gmra.mrb[120].mxu0 %vm478_vm2, %v2828_v25  ;;  %6911 = vmatmul.mubr.msk.bf16.vlgmr.msra.gmra.mrb[100].mxu1 %vm478_vm2, %v2829_v41 }
 0xb3b   :  { %6915 = vmatpush3.bf16.msra.mxu0 %v3173_v26  ;;  %6916 = vmatprep.mubr.msk.bf16.mxu0 %vm7510_vm1, %v7509_v8 }
 0xb3c   :  { %6922 = vmatprep.mubr.msk.bf16.mxu1 %vm7510_vm1, %v7509_v8  ;;  %6926 = vmatprep.subr.bf16.mxu0 %v7509_v8 }
 0xb3d   :  { %v7422_v27 = vpop.eup %7421  ;;  %6921 = vmatpush3.bf16.msra.mxu1 %v3232_v29 }
 0xb3e   :  { %v2822_v30 = vmul.f32 %v7422_v27, %v8185_v42  ;;  %6932 = vmatprep.subr.bf16.mxu1 %v7509_v8 }
 0xb40   :  { %v2830_v37 = vpack.c.bf16 %v2822_v30, %v2822_v30 }
 0xb42   :  { %6917 = vmatmul.mubr.msk.bf16.vlgmr.msra.gmra.mrb[124].mxu0 %vm478_vm2, %v2830_v37 }
 0xb43   :  { %6928 = vmatprep.mubr.msk.bf16.mxu0 %vm7510_vm1, %v7509_v8  ;;  %6927 = vmatpush3.bf16.msra.mxu0 %v3278_v33 }
 0xb44   :  { %6938 = vmatprep.subr.bf16.mxu0 %v7509_v8 }
 0xbc8   :  { %v2873_v34 = vpop.f32.mrb[88].mxu1 }
 0xbc9   :  { %v3220_v36 = vpack.c.bf16 %v2873_v34, %v2873_v34  ;;  %v6876_v38 = vpop.f32.mrb[89].mxu1 }
 0xbca   :  { %v2876_v43 = vpop.f32.mrb[90].mxu1 }
 0xbcb   :  { %v6877_v63 = vpop.f32.mrb[91].mxu1  ;;  %6923 = vmatmul.mubr.msk.bf16.vlgmr.msra.gmra.mrb[104].mxu1 %vm478_vm2, %v3220_v36 }
 0xbcc   :  { %6933 = vmatpush3.bf16.msra.mxu1 %v3324_v39  ;;  %6934 = vmatprep.mubr.msk.bf16.mxu1 %vm7510_vm1, %v7509_v8  ;;  %v8286_v63 = vadd.f32 %v8045_v19, %v7923_v1 }
 0xbcd   :  { %6944 = vmatprep.subr.bf16.mxu1 %v7509_v8 }
 0xbd0   :  { %v2921_v59 = vpop.f32.mrb[112].mxu0 }
 0xbd1   :  { %v3221_v40 = vpack.c.bf16 %v2921_v59, %v2921_v59  ;;  %v6882_v42 = vpop.f32.mrb[113].mxu0 }
 0xbd2   :  { %v2924_v49 = vpop.f32.mrb[114].mxu0 }
 0xbd3   :  { %v6883_v50 = vpop.f32.mrb[115].mxu0  ;;  %6929 = vmatmul.mubr.msk.bf16.vlgmr.msra.gmra.mrb[128].mxu0 %vm478_vm2, %v3221_v40 }
 0xbd4   :  { %6939 = vmatpush3.bf16.msra.mxu0 %v3370_v47  ;;  %6940 = vmatprep.mubr.msk.bf16.mxu0 %vm7510_vm1, %v7509_v8  ;;  %v1893_v50 = vmul.f32 %v8286_v63, %v8286_v63 }
 0xbd5   :  { %6950 = vmatprep.subr.bf16.mxu0 %v7509_v8 }
 0xbfd   :  { %v2969_v52 = vpop.f32.mrb[92].mxu1 }
 0xbfe   :  { %v3222_v53 = vpack.c.bf16 %v2969_v52, %v2969_v52  ;;  %v6888_v54 = vpop.f32.mrb[93].mxu1 }
 0xbff   :  { %v2972_v55 = vpop.f32.mrb[94].mxu1 }
 0xc00   :  { %v6889_v56 = vpop.f32.mrb[95].mxu1  ;;  %6935 = vmatmul.mubr.msk.bf16.vlgmr.msra.gmra.mrb[108].mxu1 %vm478_vm2, %v3222_v53 }
 0xc01   :  { %6945 = vmatpush3.bf16.msra.mxu1 %v3232_v29  ;;  %6946 = vmatprep.mubr.msk.bf16.mxu1 %vm7510_vm1, %v7509_v8 }
 0xc02   :  { %6956 = vmatprep.subr.bf16.mxu1 %v7509_v8 }
 0xc05   :  { %v3017_v35 = vpop.f32.mrb[116].mxu0  ;;  %v3065_v44 = vpop.f32.mrb[96].mxu1 }
 0xc06   :  { %v3223_v57 = vpack.c.bf16 %v3017_v35, %v3017_v35  ;;  %v3224_v58 = vpack.c.bf16 %v3065_v44, %v3065_v44  ;;  %v6894_v60 = vpop.f32.mrb[117].mxu0  ;;  %v6900_v61 = vpop.f32.mrb[97].mxu1 }
 0xc07   :  { %v3020_v62 = vpop.f32.mrb[118].mxu0  ;;  %v3068_v0 = vpop.f32.mrb[98].mxu1 }
 0xc08   :  { %v6895_v2 = vpop.f32.mrb[119].mxu0  ;;  %v6901_v3 = vpop.f32.mrb[99].mxu1  ;;  %6941 = vmatmul.mubr.msk.bf16.vlgmr.msra.gmra.mrb[132].mxu0 %vm478_vm2, %v3223_v57  ;;  %6947 = vmatmul.mubr.msk.bf16.vlgmr.msra.gmra.mrb[112].mxu1 %vm478_vm2, %v3224_v58  ;;  %v1897_v58 = vsel %vm51_vm0, %v1893_v50, 0.0  ;;  %v7329_v50 = vld [vmem:[%s8838_s9 + $0x20] sm:$0xff]  }
 0xc09   :  { %6951 = vmatpush3.bf16.msra.mxu0 %v3278_v33  ;;  %6957 = vmatpush3.bf16.msra.mxu1 %v3324_v39  ;;  %v8301_v2 = vadd.f32 %v8043_v17, %v7915_v46  ;;  %v7484_v3 = vld [vmem:[%s8830_s1 + $0x8] sm:$0xff]  ;;  %v7317_v46 = vld [vmem:[%s8837_s8] sm:$0xff]   ;;  %v7318_v17 = vld [vmem:[%s8837_s8 + $0x10] sm:$0xff]  }
 0xc0a   :  { %6952 = vmatprep.mubr.msk.bf16.mxu0 %vm7510_vm1, %v7509_v8  ;;  %6958 = vmatprep.mubr.msk.bf16.mxu1 %vm7510_vm1, %v7509_v8 }
 0xc0b   :  { %6962 = vmatprep.subr.bf16.mxu0 %v7509_v8  ;;  %6968 = vmatprep.subr.bf16.mxu1 %v7509_v8 }
 0xc0d   :  { %v3113_v4 = vpop.f32.mrb[120].mxu0  ;;  %v3161_v6 = vpop.f32.mrb[100].mxu1 }
 0xc0e   :  { %v3225_v5 = vpack.c.bf16 %v3113_v4, %v3113_v4  ;;  %v3226_v9 = vpack.c.bf16 %v3161_v6, %v3161_v6  ;;  %v6906_v10 = vpop.f32.mrb[121].mxu0  ;;  %v6912_v11 = vpop.f32.mrb[101].mxu1 }
 0xc0f   :  { %v3116_v51 = vpop.f32.mrb[122].mxu0  ;;  %v3164_v28 = vpop.f32.mrb[102].mxu1  ;;  %v1892_v10 = vmul.f32 %v8301_v2, %v8301_v2 }
 0xc10   :  { %v6907_v12 = vpop.f32.mrb[123].mxu0  ;;  %v6913_v13 = vpop.f32.mrb[103].mxu1  ;;  %6953 = vmatmul.mubr.msk.bf16.vlgmr.msra.gmra.mrb[136].mxu0 %vm478_vm2, %v3225_v5  ;;  %6959 = vmatmul.mubr.msk.bf16.vlgmr.msra.gmra.mrb[116].mxu1 %vm478_vm2, %v3226_v9  ;;  %v7319_v51 = vld [vmem:[%s8837_s8 + $0x8] sm:$0xff]   ;;  %v7320_v28 = vld [vmem:[%s8837_s8 + $0x18] sm:$0xff]  }
 0xc11   :  { %6963 = vmatpush3.bf16.msra.mxu0 %v3370_v47  ;;  %6964 = vmatprep.mubr.msk.bf16.mxu0 %vm7510_vm1, %v7509_v8  ;;  %v1894_v11 = vsel %vm51_vm0, %v1892_v10, 0.0 }
 0xc12   :  { %6976 = vmatprep.subr.bf16.mxu0 %v7509_v8  ;;  %6972 = vmatprep.mubr.msk.bf16.mxu1 %vm7510_vm1, %v7509_v8 }
 0xc13   :  { %6969 = vmatpush3.bf16.msra.mxu1 %v7317_v46 }
 0xc14   :  { %6970 = vmatprep.subr.bf16.mxu1 %v7509_v8 }
 0xc15   :  { %v3209_v31 = vpop.f32.mrb[124].mxu0 }
 0xc16   :  { %v3227_v7 = vpack.c.bf16 %v3209_v31, %v3209_v31  ;;  %v6918_v15 = vpop.f32.mrb[125].mxu0 }
 0xc17   :  { %v3212_v14 = vpop.f32.mrb[126].mxu0  ;;  %6971 = vmatpush3.bf16.msra.mxu1 %v7319_v51  ;;  %v6175_v15 = vld [vmem:[%s8834_s5 + $0x4] ss:$0 sm:$0xff] }
 0xc18   :  { %v6919_v16 = vpop.f32.mrb[127].mxu0  ;;  %6965 = vmatmul.mubr.msk.bf16.vlgmr.msra.gmra.mrb[140].mxu0 %vm478_vm2, %v3227_v7  ;;  %6984 = vmatprep.subr.bf16.mxu1 %v7509_v8 }
 0xc19   :  { %6980 = vmatprep.mubr.msk.bf16.mxu0 %vm7510_vm1, %v7509_v8  ;;  %6977 = vmatpush3.bf16.msra.mxu0 %v7318_v17 }
 0xc1a   :  { %6978 = vmatprep.subr.bf16.mxu0 %v7509_v8 }
 0xc1d   :  { %6979 = vmatpush3.bf16.msra.mxu0 %v7320_v28 }
 0xc1e   :  { %6992 = vmatprep.subr.bf16.mxu0 %v7509_v8 }
 0xc9e   :  { %v3268_v18 = vpop.f32.mrb[104].mxu1 }
 0xc9f   :  { %v6924_v20 = vpop.f32.mrb[105].mxu1 }
 0xca0   :  { %v3271_v21 = vpop.f32.mrb[106].mxu1 }
 0xca1   :  { %v6925_v23 = vpop.f32.mrb[107].mxu1 }
 0xca2   :  { %v7321_v23 = vld [vmem:[%s8837_s8 + $0x20] sm:$0xff]  }
 0xca6   :  { %v3314_v24 = vpop.f32.mrb[128].mxu0 }
 0xca7   :  { %v3584_v25 = vadd.f32 %v3314_v24, %v3268_v18  ;;  %v6930_v41 = vpop.f32.mrb[129].mxu0  ;;  %v7322_v24 = vld [vmem:[%s8837_s8 + $0x30] sm:$0xff]  }
 0xca8   :  { %v3317_v26 = vpop.f32.mrb[130].mxu0 }
 0xca9   :  { %v6931_v27 = vpop.f32.mrb[131].mxu0 }
 0xcaa   :  { %v7323_v27 = vld [vmem:[%s8837_s8 + $0x28] sm:$0xff]  }
 0xcd3   :  { %v3360_v30 = vpop.f32.mrb[108].mxu1 }
 0xcd4   :  { %v3585_v37 = vadd.f32 %v3584_v25, %v3360_v30  ;;  %v6936_v32 = vpop.f32.mrb[109].mxu1  ;;  %v7324_v30 = vld [vmem:[%s8837_s8 + $0x38] sm:$0xff]  }
 0xcd5   :  { %v3363_v29 = vpop.f32.mrb[110].mxu1 }
 0xcd6   :  { %v6937_v22 = vpop.f32.mrb[111].mxu1 }
 0xcdb   :  { %v3406_v33 = vpop.f32.mrb[132].mxu0  ;;  %v3449_v48 = vpop.f32.mrb[112].mxu1 }
 0xcdc   :  { %v3586_v34 = vadd.f32 %v3585_v37, %v3406_v33  ;;  %v6942_v36 = vpop.f32.mrb[133].mxu0  ;;  %v6948_v38 = vpop.f32.mrb[113].mxu1 }
 0xcdd   :  { %v3409_v39 = vpop.f32.mrb[134].mxu0  ;;  %v3452_v43 = vpop.f32.mrb[114].mxu1 }
 0xcde   :  { %v8291_v59 = vadd.f32 %v7483_v45, %v3586_v34  ;;  %v6943_v40 = vpop.f32.mrb[135].mxu0  ;;  %v6949_v42 = vpop.f32.mrb[115].mxu1  ;;  %v7325_v39 = vld [vmem:[%s8838_s9] sm:$0xff]   ;;  %v7326_v43 = vld [vmem:[%s8838_s9 + $0x10] sm:$0xff]  }
 0xcdf   :  { %v7327_v40 = vld [vmem:[%s8838_s9 + $0x8] sm:$0xff]   ;;  %v7328_v42 = vld [vmem:[%s8838_s9 + $0x18] sm:$0xff]  }
 0xce0   :  { %v3593_v47 = vmul.f32 %v8291_v59, %v8291_v59 }
 0xce2   :  { %v3595_v49 = vsel %vm51_vm0, %v3593_v47, 0.0  ;;  %v6111_v47 = vld [vmem:[%s8834_s5 + $0x2] ss:$0 sm:$0xff] }
 0xce3   :  { %v3492_v52 = vpop.f32.mrb[136].mxu0  ;;  %3596 = vadd.xlane.f32.xlu1 %v3595_v49  ;;  %v3535_v1 = vpop.f32.mrb[116].mxu1 }
 0xce4   :  { %v3587_v19 = vadd.f32 %v3492_v52, %v3449_v48  ;;  %v6954_v53 = vpop.f32.mrb[137].mxu0  ;;  %v6960_v54 = vpop.f32.mrb[117].mxu1  ;;  %v7330_v52 = vld [vmem:[%s8838_s9 + $0x30] sm:$0xff]  }
 0xce5   :  { %v3495_v55 = vpop.f32.mrb[138].mxu0  ;;  %v3538_v56 = vpop.f32.mrb[118].mxu1  ;;  %v7332_v53 = vld [vmem:[%s8838_s9 + $0x38] sm:$0xff]  }
 0xce6   :  { %v3588_v35 = vadd.f32 %v3587_v19, %v3535_v1  ;;  %v6955_v44 = vpop.f32.mrb[139].mxu0  ;;  %v6961_v57 = vpop.f32.mrb[119].mxu1  ;;  %v7331_v19 = vld [vmem:[%s8838_s9 + $0x28] sm:$0xff]   ;;  %s7485_s9 = scalar_lea.vmem %s6054_s25, 16 }
 0xce7   :  { %1898 = vadd.xlane.f32.xlu1 %v1897_v58  ;;  %p7486_p0 = scmp.ne.s32.totalorder %s6054_s25, %s7485_s9  ;;  %p7491_p2 = scmp.lt.s32.totalorder %s7489_s28, %s7485_s9 }
 0xce9   :  { %p7492_p3 = por %p7491_p2, %p7490_p1 }
 0xceb   :  { %v3578_v60 = vpop.f32.mrb[140].mxu0  ;;  %p7493_p4 = pnand %p7492_p3, %p7486_p0 }
 0xcec   :  { %v3589_v61 = vadd.f32 %v3588_v35, %v3578_v60  ;;  %v6966_v62 = vpop.f32.mrb[141].mxu0 }
 0xced   :  { %v3581_v0 = vpop.f32.mrb[142].mxu0 }
 0xcee   :  { %v8306_v4 = vadd.f32 %v7484_v3, %v3589_v61  ;;  %v6967_v6 = vpop.f32.mrb[143].mxu0 }
 0xcf0   :  { %v3594_v5 = vmul.f32 %v8306_v4, %v8306_v4 }
 0xcf2   :  { %v3598_v9 = vsel %vm51_vm0, %v3594_v5, 0.0 }
 0xcf3   :  { %3599 = vadd.xlane.f32.xlu0 %v3598_v9 }
 0xcf7   :  { %1895 = vadd.xlane.f32.xlu0 %v1894_v11 }
 0xd70   :  { %v3597_v12 = vpop.xlane.xlu1 %3596 }
 0xd71   :  { %v3601_v13 = vmul.f32 0.03125, %v3597_v12 }
 0xd73   :  { %v3603_v31 = vadd.f32 1e-06, %v3601_v13 }
 0xd74   :  { %v1899_v33 = vpop.xlane.xlu1 %1898 }
 0xd75   :  { %7423 = vrsqrt.f32 %v3603_v31  ;;  %v1901_v34 = vmul.f32 0.03125, %v1899_v33 }
 0xd77   :  { %v1903_v38 = vadd.f32 1e-06, %v1901_v34 }
 0xd7f   :  { %v7424_v7 = vpop.eup %7423 }
 0xd80   :  { %v3607_v14 = vmul.f32 %v7424_v7, %v8291_v59  ;;  %v3600_v16 = vpop.xlane.xlu0 %3599 }
 0xd81   :  { %v3602_v18 = vmul.f32 0.03125, %v3600_v16 }
 0xd82   :  { %v3613_v20 = vmul.f32 %v6175_v15, %v3607_v14 }
 0xd83   :  { %v3604_v21 = vadd.f32 1e-06, %v3602_v18 }
 0xd84   :  { %v1896_v25 = vpop.xlane.xlu0 %1895  ;;  %v3631_v41 = vpack.c.bf16 %v3613_v20, %v3613_v20 }
 0xd85   :  { %7425 = vrsqrt.f32 %v3604_v21  ;;  %v1900_v26 = vmul.f32 0.03125, %v1896_v25 }
 0xd86   :  { %6973 = vmatmul.mubr.msk.bf16.vlgmr.msra.gmra.mrb[120].mxu1 %vm51_vm0, %v3631_v41  ;;  %6981 = vmatmul.mubr.msk.bf16.vlgmr.msra.gmra.mrb[144].mxu0 %vm51_vm0, %v3631_v41 }
 0xd87   :  { %6985 = vmatpush3.bf16.msra.mxu1 %v7321_v23  ;;  %6993 = vmatpush3.bf16.msra.mxu0 %v7322_v24  ;;  %v1902_v37 = vadd.f32 1e-06, %v1900_v26 }
 0xd88   :  { %6986 = vmatprep.subr.bf16.mxu1 %v7509_v8  ;;  %6994 = vmatprep.subr.bf16.mxu0 %v7509_v8 }
 0xd89   :  { %6988 = vmatprep.mubr.msk.bf16.mxu1 %vm7510_vm1, %v7509_v8  ;;  %6996 = vmatprep.mubr.msk.bf16.mxu0 %vm7510_vm1, %v7509_v8  ;;  %7427 = vrsqrt.f32 %v1902_v37 }
 0xd8a   :  { %7429 = vrsqrt.f32 %v1903_v38 }
 0xd8b   :  { %6987 = vmatpush3.bf16.msra.mxu1 %v7323_v27  ;;  %6995 = vmatpush3.bf16.msra.mxu0 %v7324_v30 }
 0xd8c   :  { %7000 = vmatprep.subr.bf16.mxu1 %v7509_v8  ;;  %7008 = vmatprep.subr.bf16.mxu0 %v7509_v8 }
 0xd8e   :  { %6989 = vmatmul.mubr.msk.bf16.vlgmr.msra.gmra.mrb[124].mxu1 %vm51_vm0, %v3631_v41  ;;  %6997 = vmatmul.mubr.msk.bf16.vlgmr.msra.gmra.mrb[148].mxu0 %vm51_vm0, %v3631_v41 }
 0xd8f   :  { %v7426_v32 = vpop.eup %7425  ;;  %7001 = vmatpush3.bf16.msra.mxu1 %v7317_v46  ;;  %7009 = vmatpush3.bf16.msra.mxu0 %v7318_v17 }
 0xd90   :  { %v3608_v29 = vmul.f32 %v7426_v32, %v8306_v4  ;;  %7002 = vmatprep.subr.bf16.mxu1 %v7509_v8  ;;  %7010 = vmatprep.subr.bf16.mxu0 %v7509_v8 }
 0xd91   :  { %7004 = vmatprep.mubr.msk.bf16.mxu1 %vm7510_vm1, %v7509_v8  ;;  %7012 = vmatprep.mubr.msk.bf16.mxu0 %vm7510_vm1, %v7509_v8 }
 0xd92   :  { %v3614_v22 = vmul.f32 %v6175_v15, %v3608_v29 }
 0xd93   :  { %7003 = vmatpush3.bf16.msra.mxu1 %v7319_v51  ;;  %7011 = vmatpush3.bf16.msra.mxu0 %v7320_v28  ;;  %v7428_v36 = vpop.eup %7427 }
 0xd94   :  { %v3632_v48 = vpack.c.bf16 %v3614_v22, %v3614_v22  ;;  %7016 = vmatprep.subr.bf16.mxu1 %v7509_v8  ;;  %7024 = vmatprep.subr.bf16.mxu0 %v7509_v8  ;;  %v1906_v45 = vmul.f32 %v7428_v36, %v8301_v2  ;;  %v7430_v54 = vpop.eup %7429 }
 0xd95   :  { %v1907_v55 = vmul.f32 %v7430_v54, %v8286_v63 }
 0xd96   :  { %7005 = vmatmul.mubr.msk.bf16.vlgmr.msra.gmra.mrb[128].mxu1 %vm51_vm0, %v3632_v48  ;;  %7013 = vmatmul.mubr.msk.bf16.vlgmr.msra.gmra.mrb[152].mxu0 %vm51_vm0, %v3632_v48  ;;  %v1912_v49 = vmul.f32 %v6111_v47, %v1906_v45 }
 0xd97   :  { %7017 = vmatpush3.bf16.msra.mxu1 %v7321_v23  ;;  %7025 = vmatpush3.bf16.msra.mxu0 %v7322_v24  ;;  %v1913_v56 = vmul.f32 %v6111_v47, %v1907_v55 }
 0xd98   :  { %7018 = vmatprep.subr.bf16.mxu1 %v7509_v8  ;;  %7026 = vmatprep.subr.bf16.mxu0 %v7509_v8  ;;  %v4023_v1 = vpack.c.bf16 %v1912_v49, %v1912_v49 }
 0xd99   :  { %7020 = vmatprep.mubr.msk.bf16.mxu1 %vm7510_vm1, %v7509_v8  ;;  %7028 = vmatprep.mubr.msk.bf16.mxu0 %vm7510_vm1, %v7509_v8  ;;  %v4024_v63 = vpack.c.bf16 %v1913_v56, %v1913_v56 }
 0xd9b   :  { %7019 = vmatpush3.bf16.msra.mxu1 %v7323_v27  ;;  %7027 = vmatpush3.bf16.msra.mxu0 %v7324_v30 }
 0xd9c   :  { %7032 = vmatprep.subr.bf16.mxu1 %v7509_v8  ;;  %7040 = vmatprep.subr.bf16.mxu0 %v7509_v8 }
 0xd9e   :  { %7021 = vmatmul.mubr.msk.bf16.vlgmr.msra.gmra.mrb[132].mxu1 %vm51_vm0, %v3632_v48  ;;  %7029 = vmatmul.mubr.msk.bf16.vlgmr.msra.gmra.mrb[156].mxu0 %vm51_vm0, %v3632_v48 }
 0xd9f   :  { %7033 = vmatpush3.bf16.msra.mxu1 %v7325_v39  ;;  %7041 = vmatpush3.bf16.msra.mxu0 %v7326_v43 }
 0xda0   :  { %7034 = vmatprep.subr.bf16.mxu1 %v7509_v8  ;;  %7042 = vmatprep.subr.bf16.mxu0 %v7509_v8 }
 0xda1   :  { %7036 = vmatprep.mubr.msk.bf16.mxu1 %vm7510_vm1, %v7509_v8  ;;  %7044 = vmatprep.mubr.msk.bf16.mxu0 %vm7510_vm1, %v7509_v8 }
 0xda3   :  { %7035 = vmatpush3.bf16.msra.mxu1 %v7327_v40  ;;  %7043 = vmatpush3.bf16.msra.mxu0 %v7328_v42 }
 0xda4   :  { %7048 = vmatprep.subr.bf16.mxu1 %v7509_v8  ;;  %7056 = vmatprep.subr.bf16.mxu0 %v7509_v8 }
 0xda6   :  { %7037 = vmatmul.mubr.msk.bf16.vlgmr.msra.gmra.mrb[136].mxu1 %vm51_vm0, %v4023_v1  ;;  %7045 = vmatmul.mubr.msk.bf16.vlgmr.msra.gmra.mrb[160].mxu0 %vm51_vm0, %v4023_v1 }
 0xda7   :  { %7049 = vmatpush3.bf16.msra.mxu1 %v7329_v50  ;;  %7057 = vmatpush3.bf16.msra.mxu0 %v7330_v52 }
 0xda8   :  { %7050 = vmatprep.subr.bf16.mxu1 %v7509_v8  ;;  %7058 = vmatprep.subr.bf16.mxu0 %v7509_v8 }
 0xda9   :  { %7052 = vmatprep.mubr.msk.bf16.mxu1 %vm7510_vm1, %v7509_v8  ;;  %7060 = vmatprep.mubr.msk.bf16.mxu0 %vm7510_vm1, %v7509_v8 }
 0xdab   :  { %7051 = vmatpush3.bf16.msra.mxu1 %v7331_v19  ;;  %7059 = vmatpush3.bf16.msra.mxu0 %v7332_v53 }
 0xdac   :  { %7064 = vmatprep.subr.bf16.mxu1 %v7509_v8  ;;  %7072 = vmatprep.subr.bf16.mxu0 %v7509_v8 }
 0xdae   :  { %7053 = vmatmul.mubr.msk.bf16.vlgmr.msra.gmra.mrb[140].mxu1 %vm51_vm0, %v4023_v1  ;;  %7061 = vmatmul.mubr.msk.bf16.vlgmr.msra.gmra.mrb[164].mxu0 %vm51_vm0, %v4023_v1 }
 0xdaf   :  { %7065 = vmatpush3.bf16.msra.mxu1 %v7325_v39  ;;  %7073 = vmatpush3.bf16.msra.mxu0 %v7326_v43 }
 0xdb0   :  { %7066 = vmatprep.subr.bf16.mxu1 %v7509_v8  ;;  %7074 = vmatprep.subr.bf16.mxu0 %v7509_v8 }
 0xdb1   :  { %7068 = vmatprep.mubr.msk.bf16.mxu1 %vm7510_vm1, %v7509_v8  ;;  %7076 = vmatprep.mubr.msk.bf16.mxu0 %vm7510_vm1, %v7509_v8 }
 0xdb3   :  { %7067 = vmatpush3.bf16.msra.mxu1 %v7327_v40  ;;  %7075 = vmatpush3.bf16.msra.mxu0 %v7328_v42 }
 0xdb4   :  { %7080 = vmatprep.subr.bf16.mxu1 %v7509_v8  ;;  %7088 = vmatprep.subr.bf16.mxu0 %v7509_v8 }
 0xdb6   :  { %7069 = vmatmul.mubr.msk.bf16.vlgmr.msra.gmra.mrb[144].mxu1 %vm51_vm0, %v4024_v63  ;;  %7077 = vmatmul.mubr.msk.bf16.vlgmr.msra.gmra.mrb[168].mxu0 %vm51_vm0, %v4024_v63 }
 0xdb7   :  { %7081 = vmatpush3.bf16.msra.mxu1 %v7329_v50  ;;  %7089 = vmatpush3.bf16.msra.mxu0 %v7330_v52 }
 0xdb8   :  { %7082 = vmatprep.subr.bf16.mxu1 %v7509_v8  ;;  %7090 = vmatprep.subr.bf16.mxu0 %v7509_v8 }
 0xdb9   :  { %7084 = vmatprep.mubr.msk.bf16.mxu1 %vm7510_vm1, %v7509_v8  ;;  %7092 = vmatprep.mubr.msk.bf16.mxu0 %vm7510_vm1, %v7509_v8 }
 0xdbb   :  { %7083 = vmatpush3.bf16.msra.mxu1 %v7331_v19  ;;  %7091 = vmatpush3.bf16.msra.mxu0 %v7332_v53 }
 0xdbc   :  { %7096 = vmatprep.subr.bf16.mxu1 %v7509_v8  ;;  %7102 = vmatprep.subr.bf16.mxu0 %v7509_v8 }
 0xdbe   :  { %7085 = vmatmul.mubr.msk.bf16.vlgmr.msra.gmra.mrb[148].mxu1 %vm51_vm0, %v4024_v63  ;;  %7093 = vmatmul.mubr.msk.bf16.vlgmr.msra.gmra.mrb[172].mxu0 %vm51_vm0, %v4024_v63 }
 0xdbf   :  { %7098 = vmatprep.mubr.msk.bf16.mxu1 %vm7510_vm1, %v7509_v8  ;;  %7104 = vmatprep.mubr.msk.bf16.mxu0 %vm7510_vm1, %v7509_v8 }
 0xe59   :  { %v8452_v35 = vpop.f32.mrb[120].mxu1  ;;  %v8454_v44 = vpop.f32.mrb[144].mxu0 }
 0xe5a   :  { %v6974_v57 = vpop.f32.mrb[121].mxu1  ;;  %v6982_v58 = vpop.f32.mrb[145].mxu0  ;;  %v4402_v43 = vpack.c.bf16 %v8452_v35, %v8452_v35  ;;  %v4403_v45 = vpack.c.bf16 %v8454_v44, %v8454_v44 }
 0xe5b   :  { %v3685_v60 = vpop.f32.mrb[122].mxu1  ;;  %v3737_v61 = vpop.f32.mrb[146].mxu0 }
 0xe5c   :  { %v6975_v62 = vpop.f32.mrb[123].mxu1  ;;  %v6983_v0 = vpop.f32.mrb[147].mxu0 }
 0xe61   :  { %v8456_v2 = vpop.f32.mrb[124].mxu1  ;;  %v8458_v3 = vpop.f32.mrb[148].mxu0 }
 0xe62   :  { %v6990_v6 = vpop.f32.mrb[125].mxu1  ;;  %v6998_v5 = vpop.f32.mrb[149].mxu0  ;;  %v4404_v63 = vpack.c.bf16 %v8456_v2, %v8456_v2  ;;  %v4405_v35 = vpack.c.bf16 %v8458_v3, %v8458_v3 }
 0xe63   :  { %v3789_v9 = vpop.f32.mrb[126].mxu1  ;;  %v3841_v10 = vpop.f32.mrb[150].mxu0 }
 0xe64   :  { %v6991_v11 = vpop.f32.mrb[127].mxu1  ;;  %v6999_v46 = vpop.f32.mrb[151].mxu0 }
 0xe69   :  { %v8460_v17 = vpop.f32.mrb[128].mxu1  ;;  %v8462_v51 = vpop.f32.mrb[152].mxu0 }
 0xe6a   :  { %v7006_v28 = vpop.f32.mrb[129].mxu1  ;;  %v7014_v12 = vpop.f32.mrb[153].mxu0  ;;  %v4406_v10 = vpack.c.bf16 %v8460_v17, %v8460_v17  ;;  %v4407_v11 = vpack.c.bf16 %v8462_v51, %v8462_v51 }
 0xe6b   :  { %v3884_v13 = vpop.f32.mrb[130].mxu1  ;;  %v3924_v31 = vpop.f32.mrb[154].mxu0 }
 0xe6c   :  { %v7007_v7 = vpop.f32.mrb[131].mxu1  ;;  %v7015_v15 = vpop.f32.mrb[155].mxu0 }
 0xe71   :  { %v8464_v14 = vpop.f32.mrb[132].mxu1  ;;  %v8466_v16 = vpop.f32.mrb[156].mxu0 }
 0xe72   :  { %v7022_v18 = vpop.f32.mrb[133].mxu1  ;;  %v7030_v20 = vpop.f32.mrb[157].mxu0  ;;  %v4408_v17 = vpack.c.bf16 %v8464_v14, %v8464_v14  ;;  %v4409_v51 = vpack.c.bf16 %v8466_v16, %v8466_v16  ;;  %v6208_v14 = vld [vmem:[%s8832_s3 + $0x20] sm:$0xff] }
 0xe73   :  { %v3964_v21 = vpop.f32.mrb[134].mxu1  ;;  %v4004_v23 = vpop.f32.mrb[158].mxu0 }
 0xe74   :  { %v7023_v24 = vpop.f32.mrb[135].mxu1  ;;  %v7031_v25 = vpop.f32.mrb[159].mxu0 }
 0xe79   :  { %v4074_v41 = vpop.f32.mrb[136].mxu1  ;;  %v4126_v26 = vpop.f32.mrb[160].mxu0 }
 0xe7a   :  { %v4410_v27 = vpack.c.bf16 %v4074_v41, %v4074_v41  ;;  %v8468_v30 = vpack.c.bf16 %v4126_v26, %v4126_v26  ;;  %v7038_v37 = vpop.f32.mrb[137].mxu1  ;;  %v7046_v32 = vpop.f32.mrb[161].mxu0 }
 0xe7b   :  { %v4077_v29 = vpop.f32.mrb[138].mxu1  ;;  %v4129_v22 = vpop.f32.mrb[162].mxu0 }
 0xe7c   :  { %v4422_v33 = vsel %vm478_vm2, %v4410_v27, 0  ;;  %v4468_v48 = vsel %vm478_vm2, %v8468_v30, 0  ;;  %v7047_v34 = vpop.f32.mrb[163].mxu0  ;;  %4883 = vrot.lane.b32.xlu1 %v4410_v27, %s7511_s30  ;;  %v7039_v36 = vpop.f32.mrb[139].mxu1 }
 0xe7d   :  { %7097 = vmatpush3.bf16.xpose.msra.mxu1 %v4422_v33  ;;  %7103 = vmatpush3.bf16.xpose.msra.mxu0 %v4468_v48 }
 0xe7e   :  { %7108 = vmatprep.subr.bf16.mxu1 %v7509_v8  ;;  %7114 = vmatprep.subr.bf16.mxu0 %v7509_v8 }
 0xe81   :  { %v4178_v38 = vpop.f32.mrb[140].mxu1  ;;  %v4230_v39 = vpop.f32.mrb[164].mxu0 }
 0xe82   :  { %v8480_v40 = vpack.c.bf16 %v4178_v38, %v4178_v38  ;;  %v8482_v42 = vpack.c.bf16 %v4230_v39, %v4230_v39  ;;  %v7054_v47 = vpop.f32.mrb[141].mxu1  ;;  %v7062_v49 = vpop.f32.mrb[165].mxu0 }
 0xe83   :  { %v4181_v50 = vpop.f32.mrb[142].mxu1  ;;  %v4233_v52 = vpop.f32.mrb[166].mxu0 }
 0xe84   :  { %v4514_v1 = vsel %vm478_vm2, %v8480_v40, 0  ;;  %v4560_v19 = vsel %vm478_vm2, %v8482_v42, 0  ;;  %v7055_v53 = vpop.f32.mrb[143].mxu1  ;;  %v7063_v54 = vpop.f32.mrb[167].mxu0  ;;  %7099 = vmatmul.mubr.msk.bf16.vlgmr.msra.gmra.mrb[152].mxu1 %vm478_vm2, %v4402_v43  ;;  %7105 = vmatmul.mubr.msk.bf16.vlgmr.msra.gmra.mrb[176].mxu0 %vm478_vm2, %v4403_v45 }
 0xe85   :  { %7109 = vmatpush3.bf16.xpose.msra.mxu1 %v4514_v1  ;;  %7115 = vmatpush3.bf16.xpose.msra.mxu0 %v4560_v19  ;;  %v6209_v54 = vld [vmem:[%s8832_s3 + $0x28] sm:$0xff] }
 0xe86   :  { %7110 = vmatprep.mubr.msk.bf16.mxu1 %vm7510_vm1, %v7509_v8  ;;  %7116 = vmatprep.mubr.msk.bf16.mxu0 %vm7510_vm1, %v7509_v8 }
 0xe87   :  { %7120 = vmatprep.subr.bf16.mxu1 %v7509_v8  ;;  %7126 = vmatprep.subr.bf16.mxu0 %v7509_v8 }
 0xe89   :  { %v4273_v55 = vpop.f32.mrb[144].mxu1  ;;  %v4313_v56 = vpop.f32.mrb[168].mxu0 }
 0xe8a   :  { %v8500_v44 = vpack.c.bf16 %v4273_v55, %v4273_v55  ;;  %v8502_v57 = vpack.c.bf16 %v4313_v56, %v4313_v56  ;;  %v7070_v58 = vpop.f32.mrb[145].mxu1  ;;  %v7078_v60 = vpop.f32.mrb[169].mxu0 }
 0xe8b   :  { %v4276_v61 = vpop.f32.mrb[146].mxu1  ;;  %v4316_v62 = vpop.f32.mrb[170].mxu0 }
 0xe8c   :  { %v4606_v0 = vsel %vm478_vm2, %v8500_v44, 0  ;;  %v4652_v6 = vsel %vm478_vm2, %v8502_v57, 0  ;;  %v7071_v5 = vpop.f32.mrb[147].mxu1  ;;  %v7079_v9 = vpop.f32.mrb[171].mxu0  ;;  %7111 = vmatmul.mubr.msk.bf16.vlgmr.msra.gmra.mrb[156].mxu1 %vm478_vm2, %v4404_v63  ;;  %7117 = vmatmul.mubr.msk.bf16.vlgmr.msra.gmra.mrb[180].mxu0 %vm478_vm2, %v4405_v35 }
 0xe8d   :  { %7121 = vmatpush3.bf16.xpose.msra.mxu1 %v4606_v0  ;;  %7127 = vmatpush3.bf16.xpose.msra.mxu0 %v4652_v6 }
 0xe8e   :  { %7122 = vmatprep.mubr.msk.bf16.mxu1 %vm7510_vm1, %v7509_v8  ;;  %7128 = vmatprep.mubr.msk.bf16.mxu0 %vm7510_vm1, %v7509_v8 }
 0xe8f   :  { %7132 = vmatprep.subr.bf16.mxu1 %v7509_v8  ;;  %7138 = vmatprep.subr.bf16.mxu0 %v7509_v8 }
 0xe91   :  { %v4353_v2 = vpop.f32.mrb[148].mxu1  ;;  %v4393_v3 = vpop.f32.mrb[172].mxu0 }
 0xe92   :  { %v8520_v46 = vpack.c.bf16 %v4353_v2, %v4353_v2  ;;  %v8522_v28 = vpack.c.bf16 %v4393_v3, %v4393_v3  ;;  %v7086_v12 = vpop.f32.mrb[149].mxu1  ;;  %v7094_v13 = vpop.f32.mrb[173].mxu0 }
 0xe93   :  { %v4356_v31 = vpop.f32.mrb[150].mxu1  ;;  %v4396_v7 = vpop.f32.mrb[174].mxu0 }
 0xe94   :  { %v4698_v15 = vsel %vm478_vm2, %v8520_v46, 0  ;;  %v4744_v18 = vsel %vm478_vm2, %v8522_v28, 0  ;;  %v7087_v20 = vpop.f32.mrb[151].mxu1  ;;  %v7095_v21 = vpop.f32.mrb[175].mxu0  ;;  %7123 = vmatmul.mubr.msk.bf16.vlgmr.msra.gmra.mrb[160].mxu1 %vm478_vm2, %v4406_v10  ;;  %7129 = vmatmul.mubr.msk.bf16.vlgmr.msra.gmra.mrb[184].mxu0 %vm478_vm2, %v4407_v11 }
 0xe95   :  { %7133 = vmatpush3.bf16.xpose.msra.mxu1 %v4698_v15  ;;  %7139 = vmatpush3.bf16.xpose.msra.mxu0 %v4744_v18 }
 0xe96   :  { %7134 = vmatprep.mubr.msk.bf16.mxu1 %vm7510_vm1, %v7509_v8  ;;  %7140 = vmatprep.mubr.msk.bf16.mxu0 %vm7510_vm1, %v7509_v8 }
 0xe97   :  { %7144 = vmatprep.subr.bf16.mxu1 %v7509_v8  ;;  %7150 = vmatprep.subr.bf16.mxu0 %v7509_v8 }
 0xe9c   :  { %7135 = vmatmul.mubr.msk.bf16.vlgmr.msra.gmra.mrb[164].mxu1 %vm478_vm2, %v4408_v17  ;;  %7141 = vmatmul.mubr.msk.bf16.vlgmr.msra.gmra.mrb[188].mxu0 %vm478_vm2, %v4409_v51 }
 0xe9d   :  { %7146 = vmatprep.mubr.msk.bf16.mxu1 %vm7510_vm1, %v7509_v8  ;;  %7152 = vmatprep.mubr.msk.bf16.mxu0 %vm7510_vm1, %v7509_v8 }
 0xeee   :  { %v4884_v23 = vpop.permute.xlu1 %4883 }
 0xeef   :  { %v4889_v24 = vsel %vm969_vm3, %v4884_v23, 0 }
 0xef0   :  { %7145 = vmatpush3.bf16.msra.mxu1 %v4889_v24 }
 0xef1   :  { %7156 = vmatprep.subr.bf16.mxu1 %v7509_v8 }
 0xf57   :  { %v4458_v16 = vpop.f32.mrb[152].mxu1  ;;  %v4504_v25 = vpop.f32.mrb[176].mxu0 }
 0xf58   :  { %v8551_v41 = vadd.f32 %v6208_v14, %v4458_v16  ;;  %v4505_v26 = vadd.f32 %v6208_v14, %v4504_v25  ;;  %v7100_v27 = vpop.f32.mrb[153].mxu1  ;;  %v7106_v37 = vpop.f32.mrb[177].mxu0 }
 0xf59   :  { %v4461_v32 = vpop.f32.mrb[154].mxu1  ;;  %v4507_v29 = vpop.f32.mrb[178].mxu0 }
 0xf5a   :  { %v7101_v22 = vpop.f32.mrb[155].mxu1  ;;  %v7107_v33 = vpop.f32.mrb[179].mxu0  ;;  %v4789_v48 = vsel %vm478_vm2, %v4505_v26, -inf  ;;  %v4786_v34 = vsel %vm478_vm2, %v8551_v41, -inf }
 0xf5b   :  { %4790 = vmax.xlane.f32.xlu1 %v4789_v48  ;;  %4787 = vmax.xlane.f32.xlu0 %v4786_v34 }
 0xf5f   :  { %v4550_v36 = vpop.f32.mrb[156].mxu1  ;;  %v4596_v38 = vpop.f32.mrb[180].mxu0 }
 0xf60   :  { %v8556_v39 = vadd.f32 %v6208_v14, %v4550_v36  ;;  %v8558_v43 = vadd.f32 %v6208_v14, %v4596_v38  ;;  %v7112_v45 = vpop.f32.mrb[157].mxu1  ;;  %v7118_v47 = vpop.f32.mrb[181].mxu0 }
 0xf61   :  { %v4553_v49 = vpop.f32.mrb[158].mxu1  ;;  %v4599_v50 = vpop.f32.mrb[182].mxu0 }
 0xf62   :  { %v7113_v52 = vpop.f32.mrb[159].mxu1  ;;  %v7119_v1 = vpop.f32.mrb[183].mxu0  ;;  %v4795_v19 = vsel %vm478_vm2, %v8558_v43, -inf  ;;  %v4792_v53 = vsel %vm478_vm2, %v8556_v39, -inf }
 0xf63   :  { %4796 = vmax.xlane.f32.xlu1 %v4795_v19  ;;  %4793 = vmax.xlane.f32.xlu0 %v4792_v53 }
 0xf67   :  { %v4642_v55 = vpop.f32.mrb[160].mxu1  ;;  %v4688_v56 = vpop.f32.mrb[184].mxu0 }
 0xf68   :  { %v8567_v63 = vadd.f32 %v6209_v54, %v4642_v55  ;;  %v4689_v35 = vadd.f32 %v6209_v54, %v4688_v56  ;;  %v7124_v58 = vpop.f32.mrb[161].mxu1  ;;  %v7130_v60 = vpop.f32.mrb[185].mxu0 }
 0xf69   :  { %v4645_v61 = vpop.f32.mrb[162].mxu1  ;;  %v4691_v62 = vpop.f32.mrb[186].mxu0 }
 0xf6a   :  { %v7125_v0 = vpop.f32.mrb[163].mxu1  ;;  %v7131_v6 = vpop.f32.mrb[187].mxu0  ;;  %v4801_v5 = vsel %vm478_vm2, %v4689_v35, -inf  ;;  %v4798_v9 = vsel %vm478_vm2, %v8567_v63, -inf }
 0xf6b   :  { %4802 = vmax.xlane.f32.xlu1 %v4801_v5  ;;  %4799 = vmax.xlane.f32.xlu0 %v4798_v9 }
 0xf6f   :  { %v4734_v2 = vpop.f32.mrb[164].mxu1  ;;  %v4780_v3 = vpop.f32.mrb[188].mxu0 }
 0xf70   :  { %v4735_v10 = vadd.f32 %v6209_v54, %v4734_v2  ;;  %v7136_v11 = vpop.f32.mrb[165].mxu1  ;;  %v7142_v12 = vpop.f32.mrb[189].mxu0  ;;  %v4781_v20 = vadd.f32 %v6209_v54, %v4780_v3 }
 0xf71   :  { %v4737_v13 = vpop.f32.mrb[166].mxu1  ;;  %v4783_v31 = vpop.f32.mrb[190].mxu0 }
 0xf72   :  { %v7137_v7 = vpop.f32.mrb[167].mxu1  ;;  %v7143_v15 = vpop.f32.mrb[191].mxu0  ;;  %v4804_v18 = vsel %vm478_vm2, %v4735_v10, -inf  ;;  %v4807_v21 = vsel %vm478_vm2, %v4781_v20, -inf }
 0xf73   :  { %4805 = vmax.xlane.f32.xlu0 %v4804_v18 }
 0xf7c   :  { %4981 = vrot.lane.b32.xlu1 %v8480_v40, %s7511_s30 }
 0xf89   :  { %4932 = vrot.lane.b32.xlu0 %v8468_v30, %s7511_s30 }
 0xfa0   :  { %4808 = vmax.xlane.f32.xlu1 %v4807_v21 }
 0xfb1   :  { %5030 = vrot.lane.b32.xlu1 %v8482_v42, %s7511_s30 }
 0xfe8   :  { %v4791_v17 = vpop.xlane.xlu1 %4790  ;;  %v4788_v51 = vpop.xlane.xlu0 %4787 }
 0xfe9   :  { %v4811_v23 = vsub.f32 %v4505_v26, %v4791_v17  ;;  %v4810_v24 = vsub.f32 %v8551_v41, %v4788_v51 }
 0xfeb   :  { %v4820_v14 = vmul.f32 1.442695, %v4811_v23  ;;  %v4818_v16 = vmul.f32 1.442695, %v4810_v24 }
 0xfed   :  { %7431 = vpow2.f32 %v4820_v14 }
 0xfee   :  { %7433 = vpow2.f32 %v4818_v16 }
 0xff0   :  { %v4794_v30 = vpop.xlane.xlu0 %4793  ;;  %v4797_v29 = vpop.xlane.xlu1 %4796 }
 0xff1   :  { %v4813_v22 = vsub.f32 %v8558_v43, %v4797_v29  ;;  %v4812_v33 = vsub.f32 %v8556_v39, %v4794_v30 }
 0xff3   :  { %v4824_v34 = vmul.f32 1.442695, %v4813_v22  ;;  %v4822_v38 = vmul.f32 1.442695, %v4812_v33 }
 0xff5   :  { %7435 = vpow2.f32 %v4824_v34 }
 0xff6   :  { %7437 = vpow2.f32 %v4822_v38 }
 0xff7   :  { %v8581_v40 = vpop.eup %7431 }
 0xff8   :  { %v8583_v25 = vpop.eup %7433  ;;  %v4837_v27 = vsel %vm478_vm2, %v8581_v40, 0.0  ;;  %v4800_v26 = vpop.xlane.xlu0 %4799 }
 0xff9   :  { %4838 = vadd.xlane.f32.xlu1 %v4837_v27  ;;  %v4834_v42 = vsel %vm478_vm2, %v8583_v25, 0.0  ;;  %v4803_v48 = vpop.xlane.xlu1 %4802  ;;  %v4814_v45 = vsub.f32 %v8567_v63, %v4800_v26 }
 0xffa   :  { %4835 = vadd.xlane.f32.xlu0 %v4834_v42  ;;  %v4815_v36 = vsub.f32 %v4689_v35, %v4803_v48 }
 0xffb   :  { %v4826_v49 = vmul.f32 1.442695, %v4814_v45 }
 0xffc   :  { %v4828_v47 = vmul.f32 1.442695, %v4815_v36 }
 0xffe   :  { %7439 = vpow2.f32 %v4828_v47 }
 0xfff   :  { %7441 = vpow2.f32 %v4826_v49  ;;  %v7436_v52 = vpop.eup %7435 }
0x1000   :  { %v4806_v37 = vpop.xlane.xlu0 %4805  ;;  %v7438_v43 = vpop.eup %7437  ;;  %v4843_v39 = vsel %vm478_vm2, %v7436_v52, 0.0 }
0x1001   :  { %v4816_v50 = vsub.f32 %v4735_v10, %v4806_v37  ;;  %v4840_v54 = vsel %vm478_vm2, %v7438_v43, 0.0 }
0x1004   :  { %v4933_v41 = vpop.permute.xlu0 %4932 }
0x1005   :  { %v4938_v32 = vsel %vm969_vm3, %v4933_v41, 0 }
0x1006   :  { %7151 = vmatpush3.bf16.msra.mxu0 %v4938_v32 }
0x1007   :  { %7162 = vmatprep.subr.bf16.mxu0 %v7509_v8 }
0x1008   :  { %v8599_v19 = vpop.eup %7439 }
0x1009   :  { %v8602_v55 = vpop.eup %7441  ;;  %v4849_v63 = vsel %vm478_vm2, %v8599_v19, 0.0 }
0x100a   :  { %5079 = vrot.lane.b32.xlu1 %v8500_v44, %s7511_s30  ;;  %v4830_v44 = vmul.f32 1.442695, %v4816_v50  ;;  %v4846_v35 = vsel %vm478_vm2, %v8602_v55, 0.0  ;;  %v5274_v50 = vld [vmem:[%s8839_s10] sm:$0xf] }
0x100c   :  { %7443 = vpow2.f32 %v4830_v44  ;;  %v5275_v44 = vld [vmem:[%s8839_s10 + $0x4] sm:$0xf] }
0x1010   :  { %5128 = vrot.lane.b32.xlu0 %v8502_v57, %s7511_s30  ;;  %v4982_v57 = vpop.permute.xlu1 %4981 }
0x1016   :  { %v8608_v58 = vpop.eup %7443 }
0x1017   :  { %v4852_v60 = vsel %vm478_vm2, %v8608_v58, 0.0 }
0x102d   :  { %v4809_v1 = vpop.xlane.xlu1 %4808 }
0x102e   :  { %v4817_v53 = vsub.f32 %v4781_v20, %v4809_v1  ;;  %4844 = vadd.xlane.f32.xlu1 %v4843_v39  ;;  %v5276_v1 = vld [vmem:[%s8839_s10 + $0x8] sm:$0xf] }
0x102f   :  { %4841 = vadd.xlane.f32.xlu0 %v4840_v54 }
0x1030   :  { %v4832_v56 = vmul.f32 1.442695, %v4817_v53 }
0x1031   :  { %v5031_v0 = vpop.permute.xlu1 %5030 }
0x1032   :  { %7445 = vpow2.f32 %v4832_v56  ;;  %4850 = vadd.xlane.f32.xlu1 %v4849_v63  ;;  %v5036_v13 = vsel %vm969_vm3, %v5031_v0, 0 }
0x1033   :  { %4847 = vadd.xlane.f32.xlu0 %v4846_v35 }
0x1037   :  { %4853 = vadd.xlane.f32.xlu0 %v4852_v60 }
0x103c   :  { %v8612_v61 = vpop.eup %7445 }
0x103d   :  { %v4855_v62 = vsel %vm478_vm2, %v8612_v61, 0.0 }
0x103e   :  { %4856 = vadd.xlane.f32.xlu0 %v4855_v62 }
0x1043   :  { %5177 = vrot.lane.b32.xlu1 %v8520_v46, %s7511_s30  ;;  %v4987_v46 = vsel %vm969_vm3, %v4982_v57, 0  ;;  %v5290_v57 = vsel %vm969_vm3, %v5274_v50, 0 }
0x1054   :  { %5226 = vrot.lane.b32.xlu0 %v8522_v28, %s7511_s30 }
0x1086   :  { %v4839_v6 = vpop.xlane.xlu1 %4838 }
0x1087   :  { %7447 = vrcp.f32 %v4839_v6  ;;  %v4836_v5 = vpop.xlane.xlu0 %4835 }
0x1088   :  { %7449 = vrcp.f32 %v4836_v5 }
0x108a   :  { %v5080_v28 = vpop.permute.xlu1 %5079 }
0x108b   :  { %v5129_v31 = vpop.permute.xlu0 %5128  ;;  %v5085_v42 = vsel %vm969_vm3, %v5080_v28, 0 }
0x108c   :  { %v5134_v30 = vsel %vm969_vm3, %v5129_v31, 0 }
0x1091   :  { %v7448_v9 = vpop.eup %7447 }
0x1092   :  { %v7450_v2 = vpop.eup %7449  ;;  %v4867_v3 = vmul.f32 %v7448_v9, %v8581_v40 }
0x1093   :  { %v4866_v10 = vmul.f32 %v7450_v2, %v8583_v25 }
0x1094   :  { %v4875_v11 = vpack.c.bf16 %v4867_v3, %v4867_v3 }
0x1095   :  { %v4874_v12 = vpack.c.bf16 %v4866_v10, %v4866_v10 }
0x1096   :  { %7153 = vmatmul.mubr.msk.bf16.vlgmr.msra.gmra.mrb[192].mxu0 %vm478_vm2, %v4875_v11 }
0x1097   :  { %7147 = vmatmul.mubr.msk.bf16.vlgmr.msra.gmra.mrb[168].mxu1 %vm478_vm2, %v4874_v12  ;;  %7163 = vmatpush3.bf16.msra.mxu0 %v5036_v13 }
0x1098   :  { %7157 = vmatpush3.bf16.msra.mxu1 %v4987_v46  ;;  %7158 = vmatprep.mubr.msk.bf16.mxu1 %vm7510_vm1, %v7509_v8 }
0x1099   :  { %7164 = vmatprep.mubr.msk.bf16.mxu0 %vm7510_vm1, %v7509_v8  ;;  %7168 = vmatprep.subr.bf16.mxu1 %v7509_v8 }
0x109a   :  { %7174 = vmatprep.subr.bf16.mxu0 %v7509_v8 }
0x10bb   :  { %v4845_v7 = vpop.xlane.xlu1 %4844 }
0x10bc   :  { %7451 = vrcp.f32 %v4845_v7  ;;  %v4842_v15 = vpop.xlane.xlu0 %4841 }
0x10bd   :  { %7453 = vrcp.f32 %v4842_v15 }
0x10bf   :  { %v4851_v18 = vpop.xlane.xlu1 %4850 }
0x10c0   :  { %7455 = vrcp.f32 %v4851_v18  ;;  %v4848_v20 = vpop.xlane.xlu0 %4847 }
0x10c1   :  { %7457 = vrcp.f32 %v4848_v20 }
0x10c3   :  { %v5178_v32 = vpop.permute.xlu1 %5177 }
0x10c4   :  { %v4854_v17 = vpop.xlane.xlu0 %4853  ;;  %v5183_v34 = vsel %vm969_vm3, %v5178_v32, 0 }
0x10c5   :  { %7459 = vrcp.f32 %v4854_v17 }
0x10c6   :  { %v7452_v21 = vpop.eup %7451 }
0x10c7   :  { %v7454_v51 = vpop.eup %7453  ;;  %v4869_v23 = vmul.f32 %v7452_v21, %v7436_v52  ;;  %v5336_v52 = vsel %vm969_vm3, %v5275_v44, 0 }
0x10c8   :  { %v4868_v24 = vmul.f32 %v7454_v51, %v7438_v43  ;;  %v5277_v43 = vld [vmem:[%s8839_s10 + $0xc] sm:$0xf] }
0x10c9   :  { %v4877_v14 = vpack.c.bf16 %v4869_v23, %v4869_v23 }
0x10ca   :  { %v7456_v16 = vpop.eup %7455  ;;  %v4876_v40 = vpack.c.bf16 %v4868_v24, %v4868_v24 }
0x10cb   :  { %v7458_v25 = vpop.eup %7457  ;;  %7165 = vmatmul.mubr.msk.bf16.vlgmr.msra.gmra.mrb[196].mxu0 %vm478_vm2, %v4877_v14  ;;  %v4857_v27 = vpop.xlane.xlu0 %4856  ;;  %v4871_v26 = vmul.f32 %v7456_v16, %v8599_v19 }
0x10cc   :  { %7159 = vmatmul.mubr.msk.bf16.vlgmr.msra.gmra.mrb[172].mxu1 %vm478_vm2, %v4876_v40  ;;  %7175 = vmatpush3.bf16.msra.mxu0 %v5134_v30  ;;  %7461 = vrcp.f32 %v4857_v27  ;;  %v4870_v37 = vmul.f32 %v7458_v25, %v8602_v55  ;;  %v5428_v55 = vsel %vm969_vm3, %v5277_v43, 0 }
0x10cd   :  { %7169 = vmatpush3.bf16.msra.mxu1 %v5085_v42  ;;  %7170 = vmatprep.mubr.msk.bf16.mxu1 %vm7510_vm1, %v7509_v8  ;;  %v4879_v29 = vpack.c.bf16 %v4871_v26, %v4871_v26 }
0x10ce   :  { %7176 = vmatprep.mubr.msk.bf16.mxu0 %vm7510_vm1, %v7509_v8  ;;  %7180 = vmatprep.subr.bf16.mxu1 %v7509_v8  ;;  %v4878_v22 = vpack.c.bf16 %v4870_v37, %v4870_v37 }
0x10cf   :  { %7186 = vmatprep.subr.bf16.mxu0 %v7509_v8  ;;  %v5227_v41 = vpop.permute.xlu0 %5226  ;;  %v7460_v33 = vpop.eup %7459 }
0x10d0   :  { %v5232_v48 = vsel %vm969_vm3, %v5227_v41, 0  ;;  %v4872_v38 = vmul.f32 %v7460_v33, %v8608_v58  ;;  %v5382_v58 = vsel %vm969_vm3, %v5276_v1, 0 }
0x10d2   :  { %v4880_v49 = vpack.c.bf16 %v4872_v38, %v4872_v38 }
0x10d3   :  { %7177 = vmatmul.mubr.msk.bf16.vlgmr.msra.gmra.mrb[200].mxu0 %vm478_vm2, %v4879_v29 }
0x10d4   :  { %7171 = vmatmul.mubr.msk.bf16.vlgmr.msra.gmra.mrb[176].mxu1 %vm478_vm2, %v4878_v22  ;;  %7187 = vmatpush3.bf16.msra.mxu0 %v5232_v48 }
0x10d5   :  { %7181 = vmatpush3.bf16.msra.mxu1 %v5183_v34  ;;  %7182 = vmatprep.mubr.msk.bf16.mxu1 %vm7510_vm1, %v7509_v8 }
0x10d6   :  { %v7462_v36 = vpop.eup %7461  ;;  %7188 = vmatprep.mubr.msk.bf16.mxu0 %vm7510_vm1, %v7509_v8  ;;  %7192 = vmatprep.subr.bf16.mxu1 %v7509_v8 }
0x10d7   :  { %v4873_v45 = vmul.f32 %v7462_v36, %v8612_v61  ;;  %7198 = vmatprep.subr.bf16.mxu0 %v7509_v8 }
0x10d9   :  { %v4881_v47 = vpack.c.bf16 %v4873_v45, %v4873_v45 }
0x10db   :  { %7189 = vmatmul.mubr.msk.bf16.vlgmr.msra.gmra.mrb[204].mxu0 %vm478_vm2, %v4881_v47 }
0x10dc   :  { %7183 = vmatmul.mubr.msk.bf16.vlgmr.msra.gmra.mrb[180].mxu1 %vm478_vm2, %v4880_v49  ;;  %7200 = vmatprep.mubr.msk.bf16.mxu0 %vm7510_vm1, %v7509_v8 }
0x10dd   :  { %7194 = vmatprep.mubr.msk.bf16.mxu1 %vm7510_vm1, %v7509_v8  ;;  %7193 = vmatpush3.bf16.msra.mxu1 %v5290_v57 }
0x10de   :  { %7199 = vmatpush3.bf16.msra.mxu0 %v5336_v52  ;;  %7204 = vmatprep.subr.bf16.mxu1 %v7509_v8 }
0x10df   :  { %7210 = vmatprep.subr.bf16.mxu0 %v7509_v8 }
0x1169   :  { %v4974_v39 = vpop.f32.mrb[192].mxu0 }
0x116a   :  { %v4925_v19 = vpop.f32.mrb[168].mxu1  ;;  %v5279_v53 = vpack.c.bf16 %v4974_v39, %v4974_v39  ;;  %v7154_v54 = vpop.f32.mrb[193].mxu0 }
0x116b   :  { %v5278_v56 = vpack.c.bf16 %v4925_v19, %v4925_v19  ;;  %v7148_v63 = vpop.f32.mrb[169].mxu1  ;;  %v4977_v35 = vpop.f32.mrb[194].mxu0 }
0x116c   :  { %v4928_v60 = vpop.f32.mrb[170].mxu1  ;;  %v7155_v61 = vpop.f32.mrb[195].mxu0  ;;  %7201 = vmatmul.mubr.msk.bf16.vlgmr.msra.gmra.mrb[208].mxu0 %vm478_vm2, %v5279_v53 }
0x116d   :  { %v7149_v62 = vpop.f32.mrb[171].mxu1  ;;  %7195 = vmatmul.mubr.msk.bf16.vlgmr.msra.gmra.mrb[184].mxu1 %vm478_vm2, %v5278_v56  ;;  %7211 = vmatpush3.bf16.msra.mxu0 %v5428_v55 }
0x116e   :  { %7205 = vmatpush3.bf16.msra.mxu1 %v5382_v58  ;;  %7206 = vmatprep.mubr.msk.bf16.mxu1 %vm7510_vm1, %v7509_v8 }
0x116f   :  { %7212 = vmatprep.mubr.msk.bf16.mxu0 %vm7510_vm1, %v7509_v8  ;;  %7216 = vmatprep.subr.bf16.mxu1 %v7509_v8 }
0x1170   :  { %7222 = vmatprep.subr.bf16.mxu0 %v7509_v8 }
0x119e   :  { %v5072_v0 = vpop.f32.mrb[196].mxu0 }
0x119f   :  { %v5023_v6 = vpop.f32.mrb[172].mxu1  ;;  %v5281_v5 = vpack.c.bf16 %v5072_v0, %v5072_v0  ;;  %v7166_v9 = vpop.f32.mrb[197].mxu0 }
0x11a0   :  { %v5280_v2 = vpack.c.bf16 %v5023_v6, %v5023_v6  ;;  %v7160_v3 = vpop.f32.mrb[173].mxu1  ;;  %v5075_v10 = vpop.f32.mrb[198].mxu0 }
0x11a1   :  { %v5026_v11 = vpop.f32.mrb[174].mxu1  ;;  %v7167_v12 = vpop.f32.mrb[199].mxu0  ;;  %7213 = vmatmul.mubr.msk.bf16.vlgmr.msra.gmra.mrb[212].mxu0 %vm478_vm2, %v5281_v5 }
0x11a2   :  { %v7161_v13 = vpop.f32.mrb[175].mxu1  ;;  %7207 = vmatmul.mubr.msk.bf16.vlgmr.msra.gmra.mrb[188].mxu1 %vm478_vm2, %v5280_v2  ;;  %7223 = vmatpush3.bf16.msra.mxu0 %v5336_v52 }
0x11a3   :  { %7217 = vmatpush3.bf16.msra.mxu1 %v5290_v57  ;;  %7218 = vmatprep.mubr.msk.bf16.mxu1 %vm7510_vm1, %v7509_v8 }
0x11a4   :  { %7224 = vmatprep.mubr.msk.bf16.mxu0 %vm7510_vm1, %v7509_v8  ;;  %7228 = vmatprep.subr.bf16.mxu1 %v7509_v8 }
0x11a5   :  { %7234 = vmatprep.subr.bf16.mxu0 %v7509_v8 }
0x11a6   :  { %v5170_v46 = vpop.f32.mrb[200].mxu0 }
0x11a7   :  { %v5121_v28 = vpop.f32.mrb[176].mxu1  ;;  %v5283_v31 = vpack.c.bf16 %v5170_v46, %v5170_v46  ;;  %v7178_v7 = vpop.f32.mrb[201].mxu0 }
0x11a8   :  { %v5282_v15 = vpack.c.bf16 %v5121_v28, %v5121_v28  ;;  %v7172_v18 = vpop.f32.mrb[177].mxu1  ;;  %v5173_v20 = vpop.f32.mrb[202].mxu0  ;;  %v7334_v7 = vld [vmem:[%s8840_s11 + $0x18] sm:$0xff]  }
0x11a9   :  { %v5124_v21 = vpop.f32.mrb[178].mxu1  ;;  %v7179_v17 = vpop.f32.mrb[203].mxu0  ;;  %7225 = vmatmul.mubr.msk.bf16.vlgmr.msra.gmra.mrb[216].mxu0 %vm478_vm2, %v5283_v31  ;;  %v7333_v31 = vld [vmem:[%s8840_s11 + $0x10] sm:$0xff]  }
0x11aa   :  { %v7173_v51 = vpop.f32.mrb[179].mxu1  ;;  %7219 = vmatmul.mubr.msk.bf16.vlgmr.msra.gmra.mrb[192].mxu1 %vm478_vm2, %v5282_v15  ;;  %7235 = vmatpush3.bf16.msra.mxu0 %v5428_v55  ;;  %v7336_v15 = vld [vmem:[%s8841_s12 + $0x28] sm:$0xff]  }
0x11ab   :  { %7229 = vmatpush3.bf16.msra.mxu1 %v5382_v58  ;;  %7230 = vmatprep.mubr.msk.bf16.mxu1 %vm7510_vm1, %v7509_v8 }
0x11ac   :  { %7236 = vmatprep.mubr.msk.bf16.mxu0 %vm7510_vm1, %v7509_v8  ;;  %7240 = vmatprep.subr.bf16.mxu1 %v7509_v8 }
0x11ad   :  { %7248 = vmatprep.subr.bf16.mxu0 %v7509_v8 }
0x11ae   :  { %v5268_v23 = vpop.f32.mrb[204].mxu0 }
0x11af   :  { %v5219_v24 = vpop.f32.mrb[180].mxu1  ;;  %v5285_v14 = vpack.c.bf16 %v5268_v23, %v5268_v23  ;;  %v7190_v16 = vpop.f32.mrb[205].mxu0 }
0x11b0   :  { %v5284_v40 = vpack.c.bf16 %v5219_v24, %v5219_v24  ;;  %v7184_v25 = vpop.f32.mrb[181].mxu1  ;;  %v5271_v30 = vpop.f32.mrb[206].mxu0 }
0x11b1   :  { %v5222_v27 = vpop.f32.mrb[182].mxu1  ;;  %v7191_v42 = vpop.f32.mrb[207].mxu0  ;;  %7237 = vmatmul.mubr.msk.bf16.vlgmr.msra.gmra.mrb[220].mxu0 %vm478_vm2, %v5285_v14 }
0x11b2   :  { %v7185_v26 = vpop.f32.mrb[183].mxu1  ;;  %7231 = vmatmul.mubr.msk.bf16.vlgmr.msra.gmra.mrb[196].mxu1 %vm478_vm2, %v5284_v40  ;;  %7256 = vmatprep.mubr.msk.bf16.mxu0 %vm7510_vm1, %v7509_v8  ;;  %v6234_v40 = vld [vmem:[%s8834_s5 + $0x5] ss:$0 sm:$0xff] }
0x11b3   :  { %7244 = vmatprep.mubr.msk.bf16.mxu1 %vm7510_vm1, %v7509_v8  ;;  %7241 = vmatpush3.bf16.msra.mxu1 %v7333_v31  ;;  %v7337_v26 = vld [vmem:[%s8841_s12 + $0x30] sm:$0xff]  }
0x11b4   :  { %7242 = vmatprep.subr.bf16.mxu1 %v7509_v8 }
0x11b7   :  { %7243 = vmatpush3.bf16.msra.mxu1 %v7334_v7 }
0x11b8   :  { %7260 = vmatprep.subr.bf16.mxu1 %v7509_v8 }
0x123f   :  { %v5372_v37 = vpop.f32.mrb[208].mxu0 }
0x1240   :  { %v5326_v41 = vpop.f32.mrb[184].mxu1  ;;  %v7202_v32 = vpop.f32.mrb[209].mxu0 }
0x1241   :  { %v5642_v29 = vadd.f32 %v5372_v37, %v5326_v41  ;;  %v7196_v22 = vpop.f32.mrb[185].mxu1  ;;  %v5375_v33 = vpop.f32.mrb[210].mxu0  ;;  %v7338_v37 = vld [vmem:[%s8841_s12 + $0x38] sm:$0xff]  }
0x1242   :  { %v5329_v48 = vpop.f32.mrb[186].mxu1  ;;  %v7203_v34 = vpop.f32.mrb[211].mxu0 }
0x1243   :  { %v7197_v36 = vpop.f32.mrb[187].mxu1 }
0x1244   :  { %v7339_v36 = vld [vmem:[%s8833_s4] sm:$0xff]  }
0x1274   :  { %v5464_v38 = vpop.f32.mrb[212].mxu0 }
0x1275   :  { %v5418_v45 = vpop.f32.mrb[188].mxu1  ;;  %v7214_v47 = vpop.f32.mrb[213].mxu0 }
0x1276   :  { %v5643_v49 = vadd.f32 %v5642_v29, %v5418_v45  ;;  %v7208_v50 = vpop.f32.mrb[189].mxu1  ;;  %v5467_v44 = vpop.f32.mrb[214].mxu0  ;;  %v7340_v45 = vld [vmem:[%s8833_s4 + $0x8] sm:$0xff]  }
0x1277   :  { %v5421_v57 = vpop.f32.mrb[190].mxu1  ;;  %v7215_v52 = vpop.f32.mrb[215].mxu0  ;;  %v5904_v47 = vsel %vm51_vm0, %v7340_v45, 0  ;;  %v7342_v44 = vld [vmem:[%s8833_s4 + $0x18] sm:$0xff]  }
0x1278   :  { %v5644_v43 = vadd.f32 %v5643_v49, %v5464_v38  ;;  %v7209_v1 = vpop.f32.mrb[191].mxu1  ;;  %v5901_v38 = vsel %vm51_vm0, %v7339_v36, 0  ;;  %v7341_v49 = vld [vmem:[%s8833_s4 + $0x10] sm:$0xff]   ;;  %v5910_v57 = vsel %vm51_vm0, %v7342_v44, 0  ;;  %v7343_v52 = vld [vmem:[%s8833_s4 + $0x20] sm:$0xff]  }
0x1279   :  { %v5907_v50 = vsel %vm51_vm0, %v7341_v49, 0 }
0x127a   :  { %v8711_v39 = vadd.f32 %v5644_v43, %v8291_v59  ;;  %v5913_v43 = vsel %vm51_vm0, %v7343_v52, 0 }
0x127c   :  { %v5550_v19 = vpop.f32.mrb[216].mxu0  ;;  %v5651_v53 = vmul.f32 %v8711_v39, %v8711_v39 }
0x127d   :  { %v5507_v54 = vpop.f32.mrb[192].mxu1  ;;  %v7226_v55 = vpop.f32.mrb[217].mxu0 }
0x127e   :  { %v5645_v56 = vadd.f32 %v5550_v19, %v5507_v54  ;;  %v7220_v63 = vpop.f32.mrb[193].mxu1  ;;  %v5553_v35 = vpop.f32.mrb[218].mxu0  ;;  %v5653_v58 = vsel %vm51_vm0, %v5651_v53, 0.0 }
0x127f   :  { %5654 = vadd.xlane.f32.xlu1 %v5653_v58  ;;  %v5510_v60 = vpop.f32.mrb[194].mxu1  ;;  %v7227_v61 = vpop.f32.mrb[219].mxu0 }
0x1280   :  { %v7221_v62 = vpop.f32.mrb[195].mxu1  ;;  %v7344_v61 = vld [vmem:[%s8833_s4 + $0x28] sm:$0xff]  }
0x1281   :  { %v5916_v62 = vsel %vm51_vm0, %v7344_v61, 0 }
0x1284   :  { %v5636_v0 = vpop.f32.mrb[220].mxu0 }
0x1285   :  { %v5593_v6 = vpop.f32.mrb[196].mxu1  ;;  %v7238_v5 = vpop.f32.mrb[221].mxu0 }
0x1286   :  { %v5646_v59 = vadd.f32 %v5645_v56, %v5593_v6  ;;  %v7232_v9 = vpop.f32.mrb[197].mxu1  ;;  %v5639_v2 = vpop.f32.mrb[222].mxu0  ;;  %v7346_v6 = vld [vmem:[%s8833_s4 + $0x38] sm:$0xff]  }
0x1287   :  { %v5596_v3 = vpop.f32.mrb[198].mxu1  ;;  %v7239_v10 = vpop.f32.mrb[223].mxu0  ;;  %v5922_v5 = vsel %vm51_vm0, %v7346_v6, 0 }
0x1288   :  { %v5647_v11 = vadd.f32 %v5646_v59, %v5636_v0  ;;  %v7233_v12 = vpop.f32.mrb[199].mxu1 }
0x128a   :  { %v8717_v13 = vadd.f32 %v5647_v11, %v8306_v4  ;;  %v7335_v4 = vld [vmem:[%s8841_s12 + $0x20] sm:$0xff]  }
0x128b   :  { %7249 = vmatpush3.bf16.msra.mxu0 %v7335_v4 }
0x128c   :  { %v5652_v46 = vmul.f32 %v8717_v13, %v8717_v13  ;;  %7250 = vmatprep.subr.bf16.mxu0 %v7509_v8 }
0x128e   :  { %v5656_v28 = vsel %vm51_vm0, %v5652_v46, 0.0 }
0x128f   :  { %5657 = vadd.xlane.f32.xlu0 %v5656_v28  ;;  %7251 = vmatpush3.bf16.msra.mxu0 %v7336_v15  ;;  %v6255_v28 = vld [vmem:[%s8834_s5 + $0x6] ss:$0 sm:$0xff] }
0x1290   :  { %7252 = vmatprep.subr.bf16.mxu0 %v7509_v8 }
0x1293   :  { %7253 = vmatpush3.bf16.msra.mxu0 %v7337_v26 }
0x1294   :  { %7254 = vmatprep.subr.bf16.mxu0 %v7509_v8 }
0x1297   :  { %7255 = vmatpush3.bf16.msra.mxu0 %v7338_v37  ;;  %v5989_v37 = vlaneseq }
0x130c   :  { %v5655_v18 = vpop.xlane.xlu1 %5654 }
0x130d   :  { %v5659_v20 = vmul.f32 0.03125, %v5655_v18  ;;  %v7513_v18 = vmov 0  }
0x130e   :  { %7294 = vset.pattern.permute.xlu1 %v7513_v18  ;;  %7293 = vset.pattern.permute.xlu0 %v7513_v18 }
0x130f   :  { %v5661_v21 = vadd.f32 1e-06, %v5659_v20 }
0x1311   :  { %7463 = vrsqrt.f32 %v5661_v21 }
0x131b   :  { %v7464_v24 = vpop.eup %7463 }
0x131c   :  { %v5658_v17 = vpop.xlane.xlu0 %5657  ;;  %v5665_v14 = vmul.f32 %v7464_v24, %v8711_v39 }
0x131d   :  { %v5660_v51 = vmul.f32 0.03125, %v5658_v17 }
0x131e   :  { %v5671_v30 = vmul.f32 %v6234_v40, %v5665_v14  ;;  %v5968_v14 = vld [vmem:[%s8831_s2 + $0x8] sm:$0xff] }
0x131f   :  { %v5662_v23 = vadd.f32 1e-06, %v5660_v51  ;;  %vm6006_vm5 = vcmp.ne.s32.totalorder %v5968_v14, 4294967196 }
0x1321   :  { %7465 = vrsqrt.f32 %v5662_v23 }
0x132b   :  { %v7466_v16 = vpop.eup %7465 }
0x132c   :  { %v5666_v25 = vmul.f32 %v7466_v16, %v8717_v13  ;;  %v5967_v16 = vld [vmem:[%s8831_s2] sm:$0xff] }
0x132d   :  { %vm6005_vm6 = vcmp.ne.s32.totalorder %v5967_v16, 4294967196 }
0x132e   :  { %v5672_v27 = vmul.f32 %v6234_v40, %v5666_v25 }
0x1330   :  { %v5678_v42 = vpack.c.bf16 %v5672_v27, %v5671_v30 }
0x1332   :  { %7245 = vmatmul.mubr.msk.bf16.vlgmr.msra.gmra.mrb[200].mxu1 %vm51_vm0, %v5678_v42 }
0x1333   :  { %7276 = vmatprep.mubr.msk.bf16.mxu1 %vm7510_vm1, %v7509_v8  ;;  %7261 = vmatpush3.bf16.xpose.msra.mxu1 %v5901_v38 }
0x1334   :  { %7262 = vmatprep.subr.bf16.mxu1 %v7509_v8 }
0x133b   :  { %7263 = vmatpush3.bf16.xpose.msra.mxu1 %v5904_v47 }
0x133c   :  { %7264 = vmatprep.subr.bf16.mxu1 %v7509_v8 }
0x1343   :  { %7265 = vmatpush3.bf16.xpose.msra.mxu1 %v5907_v50 }
0x1344   :  { %7266 = vmatprep.subr.bf16.mxu1 %v7509_v8 }
0x134b   :  { %7267 = vmatpush3.bf16.xpose.msra.mxu1 %v5910_v57 }
0x134c   :  { %7268 = vmatprep.subr.bf16.mxu1 %v7509_v8 }
0x1353   :  { %7269 = vmatpush3.bf16.xpose.msra.mxu1 %v5913_v43 }
0x1354   :  { %7270 = vmatprep.subr.bf16.mxu1 %v7509_v8 }
0x135b   :  { %7271 = vmatpush3.bf16.xpose.msra.mxu1 %v5916_v62 }
0x135c   :  { %7272 = vmatprep.subr.bf16.mxu1 %v7509_v8 }
0x1405   :  { %v5728_v41 = vpop.f32.mrb[200].mxu1 }
0x1406   :  { %v7246_v32 = vpop.f32.mrb[201].mxu1  ;;  %v5735_v22 = vmax.f32 %v5728_v41, 0.0 }
0x1407   :  { %v5731_v29 = vpop.f32.mrb[202].mxu1  ;;  %v5990_v32 = vand.u32 127, %v5989_v37 }
0x1408   :  { %v5736_v33 = vmax.f32 %v5731_v29, 0.0  ;;  %v7247_v48 = vpop.f32.mrb[203].mxu1 }
0x1409   :  { %v6266_v48 = vsel %vm6006_vm5, 1.0, %v7509_v8 }
0x140a   :  { %v5746_v34 = vpack.c.bf16 %v5736_v33, %v5735_v22  ;;  %v6017_v45 = vsel %vm6015_vm8, %v6266_v48, 0.0 }
0x140c   :  { %7257 = vmatmul.mubr.msk.bf16.vlgmr.msra.gmra.mrb[224].mxu0 %vm1844_vm4, %v5746_v34  ;;  %v6265_v34 = vsel %vm6005_vm6, 1.0, %v7509_v8 }
0x140d   :  { %v6016_v38 = vsel %vm6015_vm8, %v6265_v34, 0.0 }
0x140e   :  { %v6018_v49 = vadd.f32 %v6017_v45, %v6016_v38 }
0x14df   :  { %v5808_v1 = vpop.f32.mrb[224].mxu0 }
0x14e0   :  { %v5815_v19 = vadd.f32 %v5808_v1, %v8711_v39  ;;  %v7258_v53 = vpop.f32.mrb[225].mxu0  ;;  %v7345_v39 = vld [vmem:[%s8833_s4 + $0x30] sm:$0xff]  }
0x14e1   :  { %v5811_v54 = vpop.f32.mrb[226].mxu0  ;;  %v5919_v0 = vsel %vm51_vm0, %v7345_v39, 0 }
0x14e2   :  { %v5816_v55 = vadd.f32 %v5811_v54, %v8717_v13  ;;  %v7259_v56 = vpop.f32.mrb[227].mxu0  ;;  %v5818_v63 = vmul.f32 %v5815_v19, %v5815_v19  ;;  %7273 = vmatpush3.bf16.xpose.msra.mxu1 %v5919_v0 }
0x14e3   :  { %7274 = vmatprep.subr.bf16.mxu1 %v7509_v8 }
0x14e4   :  { %v5819_v35 = vmul.f32 %v5816_v55, %v5816_v55  ;;  %v5820_v58 = vsel %vm51_vm0, %v5818_v63, 0.0 }
0x14e5   :  { %5821 = vadd.xlane.f32.xlu0 %v5820_v58 }
0x14e6   :  { %v5823_v60 = vsel %vm51_vm0, %v5819_v35, 0.0 }
0x14e7   :  { %5824 = vadd.xlane.f32.xlu1 %v5823_v60 }
0x14ea   :  { %7275 = vmatpush3.bf16.xpose.msra.mxu1 %v5922_v5 }
0x1572   :  { %v5822_v59 = vpop.xlane.xlu0 %5821 }
0x1573   :  { %v5826_v9 = vmul.f32 0.03125, %v5822_v59 }
0x1574   :  { %v5825_v2 = vpop.xlane.xlu1 %5824 }
0x1575   :  { %v5828_v3 = vadd.f32 1e-06, %v5826_v9  ;;  %v5827_v10 = vmul.f32 0.03125, %v5825_v2 }
0x1577   :  { %7467 = vrsqrt.f32 %v5828_v3  ;;  %v5829_v11 = vadd.f32 1e-06, %v5827_v10 }
0x1579   :  { %7469 = vrsqrt.f32 %v5829_v11 }
0x1581   :  { %v7468_v12 = vpop.eup %7467 }
0x1582   :  { %v5832_v13 = vmul.f32 %v7468_v12, %v5815_v19 }
0x1583   :  { %v7470_v46 = vpop.eup %7469 }
0x1584   :  { %v5833_v31 = vmul.f32 %v7470_v46, %v5816_v55  ;;  %v5838_v7 = vmul.f32 %v6255_v28, %v5832_v13 }
0x1586   :  { %v5839_v4 = vmul.f32 %v6255_v28, %v5833_v31 }
0x1588   :  { %v5840_v15 = vpack.c.bf16 %v5839_v4, %v5838_v7 }
0x158a   :  { %7277 = vmatmul.mubr.msk.bf16.vlgmr.msra.gmra.mrb[204].mxu1 %vm51_vm0, %v5840_v15 }
0x165d   :  { %v5958_v20 = vpop.f32.mrb[204].mxu1 }
0x165e   :  { %v5965_v21 = vmul.f32 0.17677669, %v5958_v20  ;;  %v7278_v17 = vpop.f32.mrb[205].mxu1 }
0x165f   :  { %v5961_v51 = vpop.f32.mrb[206].mxu1 }
0x1660   :  { %v5966_v23 = vmul.f32 0.17677669, %v5961_v51  ;;  %5969 = vmax.xlane.f32.xlu0 %v5965_v21  ;;  %v7279_v24 = vpop.f32.mrb[207].mxu1 }
0x1662   :  { %5971 = vmax.xlane.f32.xlu1 %v5966_v23 }
0x1673   :  { %5995 = vperm.xlu1 %7294, %v5968_v14  }
0x1676   :  { %5992 = vperm.xlu0 %7293, %v5967_v16  }
0x16ed   :  { %v5970_v40 = vpop.xlane.xlu0 %5969 }
0x16ee   :  { %v5973_v25 = vsub.f32 %v5965_v21, %v5970_v40 }
0x16ef   :  { %v5972_v30 = vpop.xlane.xlu1 %5971 }
0x16f0   :  { %v5975_v27 = vmul.f32 1.442695, %v5973_v25  ;;  %v5974_v42 = vsub.f32 %v5966_v23, %v5972_v30 }
0x16f2   :  { %7471 = vpow2.f32 %v5975_v27  ;;  %v5977_v26 = vmul.f32 1.442695, %v5974_v42 }
0x16f3   :  { %v5996_v33 = vpop.permute.xlu1 %5995 }
0x16f4   :  { %7473 = vpow2.f32 %v5977_v26  ;;  %vm5998_vm9 = vcmp.eq.s32.totalorder %v5990_v32, %v5996_v33 }
0x16f5   :  { %v5993_v41 = vpop.permute.xlu0 %5992  ;;  %v6000_v47 = vsel %vm5998_vm9, %v5966_v23, 0.0 }
0x16f6   :  { %vm5997_vm7 = vcmp.eq.s32.totalorder %v5990_v32, %v5993_v41 }
0x16f7   :  { %v5999_v36 = vsel %vm5997_vm7, %v5965_v21, 0.0 }
0x16fc   :  { %v7472_v29 = vpop.eup %7471 }
0x16fd   :  { %5979 = vadd.xlane.f32.xlu1 %v7472_v29 }
0x16fe   :  { %v7474_v22 = vpop.eup %7473 }
0x16ff   :  { %5981 = vadd.xlane.f32.xlu0 %v7474_v22 }
0x1701   :  { %6001 = vadd.xlane.f32.xlu1 %v5999_v36 }
0x1705   :  { %6003 = vadd.xlane.f32.xlu1 %v6000_v47 }
0x1709   :  { %6019 = vadd.xlane.f32.xlu1 %v6018_v49 }
0x178a   :  { %v5980_v50 = vpop.xlane.xlu1 %5979 }
0x178b   :  { %7475 = vlog2.f32 %v5980_v50 }
0x178c   :  { %v5982_v44 = vpop.xlane.xlu0 %5981 }
0x178d   :  { %7477 = vlog2.f32 %v5982_v44 }
0x178e   :  { %v6002_v57 = vpop.xlane.xlu1 %6001 }
0x1792   :  { %v6004_v52 = vpop.xlane.xlu1 %6003 }
0x1795   :  { %v7476_v8 = vpop.eup %7475 }
0x1796   :  { %v5984_v43 = vmul.f32 0.6931472, %v7476_v8  ;;  %v6020_v1 = vpop.xlane.xlu1 %6019 }
0x1797   :  { %v7478_v19 = vpop.eup %7477  ;;  %v6021_v53 = vrot.slane %v6020_v1, 4 }
0x1798   :  { %v5986_v54 = vmul.f32 0.6931472, %v7478_v19  ;;  %v5987_v55 = vadd.f32 %v5984_v43, %v5970_v40 }
0x1799   :  { %v6022_v56 = vadd.f32 %v6021_v53, %v6020_v1 }
0x179a   :  { %v6007_v63 = vsub.f32 %v5987_v55, %v6002_v57  ;;  %v5988_v35 = vadd.f32 %v5986_v54, %v5972_v30 }
0x179b   :  { %v6023_v58 = vrot.slane %v6022_v56, 2 }
0x179c   :  { %v6009_v60 = vsel %vm6005_vm6, %v6007_v63, 0.0  ;;  %v6008_v61 = vsub.f32 %v5988_v35, %v6004_v52 }
0x179d   :  { %v6024_v62 = vadd.f32 %v6023_v58, %v6022_v56  ;;  %v6029_v0 = vsel %vm6015_vm8, %v6009_v60, 0.0 }
0x179e   :  { %v6010_v39 = vsel %vm6006_vm5, %v6008_v61, 0.0 }
0x179f   :  { %v6030_v6 = vsel %vm6015_vm8, %v6010_v39, 0.0  ;;  %v6025_v5 = vrot.slane %v6024_v62, 1 }
0x17a0   :  { %v6031_v59 = vadd.f32 %v6030_v6, %v6029_v0 }
0x17a1   :  { %v6026_v9 = vadd.f32 %v6025_v5, %v6024_v62 }
0x17a2   :  { %6032 = vadd.xlane.f32.xlu1 %v6031_v59 }
0x17a3   :  { %7280 = vpush %v6026_v9 }
0x17d4   :  { %s7281_s2 = spop %7280 }
0x17d5   :  { %s6028_s11 = smax.f32 %s7514_s22, %s7281_s2 }
0x17d6   :  { %v6041_v2 = vstv %s6028_s11 }
0x17d7   :  { %7479 = vrcp.f32 %v6041_v2 }
0x17e1   :  { %v7480_v31 = vpop.eup %7479 }
0x182f   :  { %v6033_v3 = vpop.xlane.xlu1 %6032 }
0x1830   :  { %v6034_v10 = vrot.slane %v6033_v3, 4 }
0x1832   :  { %v6035_v11 = vadd.f32 %v6034_v10, %v6033_v3 }
0x1834   :  { %v6036_v12 = vrot.slane %v6035_v11, 2 }
0x1836   :  { %v6037_v13 = vadd.f32 %v6036_v12, %v6035_v11 }
0x1838   :  { %v6038_v46 = vrot.slane %v6037_v13, 1 }
0x183a   :  { %v6039_v28 = vadd.f32 %v6038_v46, %v6037_v13 }
0x183c   :  { %7282 = vpush %v6039_v28 }
0x183d   :  { %7284 = vpush %v7480_v31 }
0x186d   :  { %s7283_s23 = spop %7282 }
0x186e   :  { %s7285_s26 = spop %7284 }
0x186f   :  { %s6044_s27 = smul.f32 %s7285_s26, %s7283_s23 }
0x1871   :  { %v6045_v7 = vstv %s6044_s27 }
0x1872   :  { %6046 = vst [vmem:[#allocation2] sm:$0x1] %v6045_v7 }
0x1873   :  { %7496 = shalt.err (!%p7493_p4)
}
0x1874   :  { %s7497_s29 = scalar_lea.hbm %s8842_s13, 16 }
0x1875   :  { %p7498_p5 = scmp.ne.s32.totalorder %s8842_s13, %s7497_s29  ;;  %p7501_p6 = scmp.lt.u32.totalorder %s7497_s29, %s8842_s13 }
0x1877   :  { %p7503_p7 = pnand %p7501_p6, %p7498_p5 }
0x1879   :  { %7506 = shalt.err (!%p7503_p7)
}
0x187a   :  { %6056 = dma.vmem_to_hbm [thread:$0]  %s6054_s25, 16, %s8842_s13, [#allocation3]  }
0x187b   :  { %7507 = dma.done.wait [#allocation3], 16  }
0x187c   :  { %7508 = vsyncadd [#allocation3], 4294967280 }
0x187d   :  { %6060 = vsyncpa [#allocation3], 1 }

</bundles_post_ra>
